<compile_context>
chip_gen: v5e
topology: v5e:2x2
jax: 0.10.0
libtpu: 0.0.40
codegen_flags: <defaults>
</compile_context>

<pallas_src>
import jax
import jax.numpy as jnp
from jax.experimental import pallas as pl
from jax.experimental.pallas import tpu as pltpu


def _quadform_kernel(p_ref, xr_ref, xc_ref, o_ref, acc_ref):
    # p_ref  : (tm, tn)    tile of the precision matrix P
    # xr_ref : (1, tn)     slice of x matching the tile columns (lane-aligned)
    # xc_ref : (tm, 1)     slice of x matching the tile rows (sublane-aligned)
    # o_ref  : (1, 1, tn)  per-parallel-partial output (column sums of acc)
    # acc_ref: (tm, tn)    f32 running elementwise partial products
    i = pl.program_id(1)
    j = pl.program_id(2)

    @pl.when((i == 0) & (j == 0))
    def _init():
        acc_ref[...] = jnp.zeros_like(acc_ref)

    p = p_ref[...].astype(jnp.float32)
    xr = xr_ref[...].astype(jnp.float32)   # broadcasts over sublanes
    xc = xc_ref[...].astype(jnp.float32)   # broadcasts over lanes
    acc_ref[...] += p * xr * xc            # pure VPU; no MXU / no per-step XLU

    @pl.when((i == pl.num_programs(1) - 1) & (j == pl.num_programs(2) - 1))
    def _finalize():
        # single cross-sublane reduction per parallel partial, epilogue only
        col_sums = jnp.sum(acc_ref[...], axis=0, keepdims=True)       # (1, tn)
        o_ref[...] = col_sums.reshape(o_ref.shape).astype(o_ref.dtype)


def _pick_tile(n: int, desired: int, quantum: int) -> int:
    """Largest t <= desired with t % quantum == 0 and n % t == 0 (else n)."""
    t = min(desired, n)
    t -= t % quantum
    while t >= quantum:
        if n % t == 0:
            return t
        t -= quantum
    return n  # full-extent block is always layout-legal


def full_1f_gaussian_prior(image_imshape: jax.Array,
                           gaussian_prec_matrix: jax.Array,
                           *,
                           tm: int = 256,
                           tn: int = 2048,
                           num_partials: int = 2,
                           vmem_limit_bytes: int = 48 * 1024 * 1024) -> jax.Array:
    """Pallas equivalent of Full1FGaussianPrior.forward.

    image_imshape:        (H, W)
    gaussian_prec_matrix: (H*W, H*W)
    returns: scalar (shape ())  ==  x^T P x
    """
    dtype = gaussian_prec_matrix.dtype
    x_flat = image_imshape.reshape(-1).astype(dtype)
    n = x_flat.shape[0]
    assert gaussian_prec_matrix.shape == (n, n)

    # Tile selection (row tile multiple of 8 sublanes, col tile multiple of 128 lanes).
    tm = _pick_tile(n, tm, 8)
    tn = _pick_tile(n, tn, 128)

    num_row_blocks = n // tm
    if num_row_blocks % num_partials != 0:
        num_partials = 1  # fall back to a single reduction chain
    rows_per_partial = num_row_blocks // num_partials
    num_col_blocks = n // tn

    # Two layouts of x so no in-kernel transpose/relayout is ever needed.
    x_row = x_flat.reshape(1, n)   # lane-aligned
    x_col = x_flat.reshape(n, 1)   # sublane-aligned

    grid = (num_partials, rows_per_partial, num_col_blocks)

    p_spec = pl.BlockSpec((tm, tn), lambda c, i, j: (c * rows_per_partial + i, j))
    xr_spec = pl.BlockSpec((1, tn), lambda c, i, j: (0, j))
    xc_spec = pl.BlockSpec((tm, 1), lambda c, i, j: (c * rows_per_partial + i, 0))
    out_spec = pl.BlockSpec((1, 1, tn), lambda c, i, j: (c, 0, 0))

    itemsize = gaussian_prec_matrix.dtype.itemsize
    cost = pl.CostEstimate(
        flops=2 * n * n,
        transcendentals=0,
        bytes_accessed=n * n * itemsize + 2 * n * itemsize
                       + num_partials * tn * 4,
    )

    partials = pl.pallas_call(
        _quadform_kernel,
        out_shape=jax.ShapeDtypeStruct((num_partials, 1, tn), jnp.float32),
        grid_spec=pltpu.PrefetchScalarGridSpec(
            num_scalar_prefetch=0,
            grid=grid,
            in_specs=[p_spec, xr_spec, xc_spec],
            out_specs=out_spec,
            scratch_shapes=[pltpu.VMEM((tm, tn), jnp.float32)],
        ),
        compiler_params=pltpu.CompilerParams(
            dimension_semantics=("parallel", "arbitrary", "arbitrary"),
            vmem_limit_bytes=vmem_limit_bytes,
        ),
        cost_estimate=cost,
    )(gaussian_prec_matrix, x_row, x_col)

    # Tiny final reduction over parallel partials / lanes in plain XLA.
    return jnp.sum(partials).astype(dtype)


if __name__ == "__main__":
    H, W = 32, 32
    N = H * W

    key = jax.random.PRNGKey(0)
    k_img, k_mat = jax.random.split(key)

    # Deterministic synthetic symmetric-PSD precision matrix (like a real
    # 1/f Gaussian prior reconstruction matrix).
    a = jax.random.normal(k_mat, (N, N), dtype=jnp.float32)
    prec = (a @ a.T) / N + jnp.eye(N, dtype=jnp.float32)

    image = jax.random.normal(k_img, (H, W), dtype=jnp.float32)

    # Pure-JAX reference mirroring the PyTorch forward (elementwise form, so
    # it is immune to TPU matmul default-precision differences).
    x = image.reshape(-1)
    ref = jnp.sum((x[:, None] * prec) * x[None, :])

    # Default tiles (exercises the parallel-partials path: grid (2, 2, 1)).
    result = full_1f_gaussian_prior(image, prec)
    result = jax.block_until_ready(result)
    assert jnp.allclose(result, ref, rtol=1e-3, atol=1e-2), (result, ref)

    # Small tiles (exercises accumulation over both row and column grid axes).
    result2 = full_1f_gaussian_prior(image, prec, tm=64, tn=128, num_partials=2)
    result2 = jax.block_until_ready(result2)
    assert jnp.allclose(result2, ref, rtol=1e-3, atol=1e-2), (result2, ref)

    print("KERNEL_OK")
</pallas_src>

<mosaic_0001>
module attributes {stable_mosaic.version = 11 : i64} {
  func.func @_quadform_kernel(%arg0: i32, %arg1: i32, %arg2: i32, %arg3: memref<256x1024xf32, #tpu.memory_space<vmem>>, %arg4: memref<1x1024xf32, #tpu.memory_space<vmem>>, %arg5: memref<256x1xf32, #tpu.memory_space<vmem>>, %arg6: memref<1x1x1024xf32, #tpu.memory_space<vmem>>, %arg7: memref<256x1024xf32, #tpu.memory_space<vmem>>) attributes {dimension_semantics = [#tpu.dimension_semantics<parallel>, #tpu.dimension_semantics<arbitrary>, #tpu.dimension_semantics<arbitrary>], iteration_bounds = array<i64: 2, 2, 1>, scalar_prefetch = 0 : i64, scratch_operands = 1 : i64, tpu.core_type = #tpu.core_type<tc>, window_params = [{transform_indices = @transform_0, window_bounds = array<i64: 256, 1024>}, {transform_indices = @transform_1, window_bounds = array<i64: 1, 1024>}, {transform_indices = @transform_2, window_bounds = array<i64: 256, 1>}, {transform_indices = @transform_3, window_bounds = array<i64: 1, 1, 1024>}]} {
    %c0_i32 = arith.constant 0 : i32
    %0 = arith.cmpi eq, %arg1, %c0_i32 : i32
    %c0_i32_0 = arith.constant 0 : i32
    %1 = arith.cmpi eq, %arg2, %c0_i32_0 : i32
    %2 = arith.andi %0, %1 : i1
    %3 = arith.extui %2 : i1 to i32
    %c0_i32_1 = arith.constant 0 : i32
    %4 = arith.cmpi ne, %3, %c0_i32_1 : i32
    scf.if %4 {
      %cst = arith.constant 0.000000e+00 : f32
      %20 = vector.broadcast %cst : f32 to vector<256x1024xf32>
      %c0_13 = arith.constant 0 : index
      %c0_14 = arith.constant 0 : index
      %21 = vector.load %arg7[%c0_13, %c0_14] : memref<256x1024xf32, #tpu.memory_space<vmem>>, vector<256x1024xf32>
      tpu.vector_store %arg7[%c0_13, %c0_14], %20 {strides = array<i32>} : memref<256x1024xf32, #tpu.memory_space<vmem>>, vector<256x1024xf32>,
    } else {
    }
    %c0 = arith.constant 0 : index
    %c0_2 = arith.constant 0 : index
    %5 = vector.load %arg3[%c0, %c0_2] : memref<256x1024xf32, #tpu.memory_space<vmem>>, vector<256x1024xf32>
    %c0_3 = arith.constant 0 : index
    %c0_4 = arith.constant 0 : index
    %6 = vector.load %arg4[%c0_3, %c0_4] : memref<1x1024xf32, #tpu.memory_space<vmem>>, vector<1x1024xf32>
    %c0_5 = arith.constant 0 : index
    %c0_6 = arith.constant 0 : index
    %7 = vector.load %arg5[%c0_5, %c0_6] : memref<256x1xf32, #tpu.memory_space<vmem>>, vector<256x1xf32>
    %c0_7 = arith.constant 0 : index
    %c0_8 = arith.constant 0 : index
    %8 = vector.load %arg7[%c0_7, %c0_8] : memref<256x1024xf32, #tpu.memory_space<vmem>>, vector<256x1024xf32>
    %9 = vector.broadcast %6 : vector<1x1024xf32> to vector<256x1024xf32>
    %10 = arith.mulf %5, %9 : vector<256x1024xf32>
    %11 = vector.broadcast %7 : vector<256x1xf32> to vector<256x1024xf32>
    %12 = arith.mulf %10, %11 : vector<256x1024xf32>
    %13 = arith.addf %8, %12 : vector<256x1024xf32>
    %c0_9 = arith.constant 0 : index
    %c0_10 = arith.constant 0 : index
    %14 = vector.load %arg7[%c0_9, %c0_10] : memref<256x1024xf32, #tpu.memory_space<vmem>>, vector<256x1024xf32>
    tpu.vector_store %arg7[%c0_9, %c0_10], %13 {strides = array<i32>} : memref<256x1024xf32, #tpu.memory_space<vmem>>, vector<256x1024xf32>,
    %c1_i32 = arith.constant 1 : i32
    %15 = arith.cmpi eq, %arg1, %c1_i32 : i32
    %c0_i32_11 = arith.constant 0 : i32
    %16 = arith.cmpi eq, %arg2, %c0_i32_11 : i32
    %17 = arith.andi %15, %16 : i1
    %18 = arith.extui %17 : i1 to i32
    %c0_i32_12 = arith.constant 0 : i32
    %19 = arith.cmpi ne, %18, %c0_i32_12 : i32
    scf.if %19 {
      %c0_13 = arith.constant 0 : index
      %c0_14 = arith.constant 0 : index
      %20 = vector.load %arg7[%c0_13, %c0_14] : memref<256x1024xf32, #tpu.memory_space<vmem>>, vector<256x1024xf32>
      %cst = arith.constant dense<0.000000e+00> : vector<1024xf32>
      %21 = vector.multi_reduction <add>, %20, %cst [0] : vector<256x1024xf32> to vector<1024xf32>
      %22 = vector.shape_cast %21 : vector<1024xf32> to vector<1x1024xf32>
      %23 = vector.shape_cast %22 : vector<1x1024xf32> to vector<1x1x1024xf32>
      %c0_15 = arith.constant 0 : index
      %c0_16 = arith.constant 0 : index
      %c0_17 = arith.constant 0 : index
      %24 = vector.load %arg6[%c0_15, %c0_16, %c0_17] : memref<1x1x1024xf32, #tpu.memory_space<vmem>>, vector<1x1x1024xf32>
      tpu.vector_store %arg6[%c0_15, %c0_16, %c0_17], %23 {strides = array<i32>} : memref<1x1x1024xf32, #tpu.memory_space<vmem>>, vector<1x1x1024xf32>,
    } else {
    }
    return
  }
  func.func @transform_0(%arg0: i32, %arg1: i32, %arg2: i32) -> (i32, i32) {
    %c2_i32 = arith.constant 2 : i32
    %0 = arith.muli %arg0, %c2_i32 : i32
    %1 = arith.addi %0, %arg1 : i32
    %c0_i32 = arith.constant 0 : i32
    return %1, %arg2 : i32, i32
  }
  func.func @transform_1(%arg0: i32, %arg1: i32, %arg2: i32) -> (i32, i32) {
    %c0_i32 = arith.constant 0 : i32
    %c0_i32_0 = arith.constant 0 : i32
    return %c0_i32, %arg2 : i32, i32
  }
  func.func @transform_2(%arg0: i32, %arg1: i32, %arg2: i32) -> (i32, i32) {
    %c2_i32 = arith.constant 2 : i32
    %0 = arith.muli %arg0, %c2_i32 : i32
    %1 = arith.addi %0, %arg1 : i32
    %c0_i32 = arith.constant 0 : i32
    %c0_i32_0 = arith.constant 0 : i32
    return %1, %c0_i32 : i32, i32
  }
  func.func @transform_3(%arg0: i32, %arg1: i32, %arg2: i32) -> (i32, i32, i32) {
    %c0_i32 = arith.constant 0 : i32
    %c0_i32_0 = arith.constant 0 : i32
    %c0_i32_1 = arith.constant 0 : i32
    return %arg0, %c0_i32, %c0_i32_0 : i32, i32, i32
  }
}

</mosaic_0001>

<bundles_post_ra>
// kernel: tpu_custom_call.1
= control target key start
LH: loop header
LB: loop body
LE: loop exit
PB: predicated region body
PF: predicated region fallthrough
CT: control target
= control target key end

     0   :  { %s4413_s0 = inlined_call_operand.hbm [shape: f32[1024,1024], index: 0, kind: input, shape index: {}]   ;;  %s4414_s1 = inlined_call_operand.hbm [shape: f32[1,1024], index: 1, kind: input, shape index: {}]   ;;  %s4415_s2 = inlined_call_operand.vmem [shape: f32[1024,1], index: 2, kind: input, shape index: {}]   ;;  %s4416_s3 = inlined_call_operand.hbm [shape: f32[2,1,1024], index: 3, kind: output, shape index: {}]  }
   0x1   :  { %4425 = sst [smem:[#allocation17_spill]] %s4414_s1 }
   0x2   :  { %4426 = sst [smem:[#allocation18_spill]] %s4415_s2 }
   0x3   :  { %4427 = sst [smem:[#allocation19_spill]] %s4416_s3 }
   0x4   :  { %8 = vsyncpa [#allocation4], 0 }
   0x5   :  { %10 = vsyncpa [#allocation4 + $0x1], 0 }
   0x6   :  { %11 = vsyncpa [#allocation7], 0 }
   0x7   :  { %12 = vsyncpa [#allocation5], 0 }
   0x8   :  { %14 = vsyncpa [#allocation5 + $0x1], 0  ;;  %s3373_s12 = smov 0   ;;  %s3375_s13 = smov 0  }
   0x9   :  { %s3377_s14 = smov 0   ;;  %s3379_s15 = smov 0  }
   0xa   :  { %s3381_s16 = smov 0   ;;  %s3383_s17 = smov 0  }
   0xb   :  { %s3385_s18 = smov 0   ;;  %s3387_s19 = smov 0  }
   0xc   :  { %s3389_s20 = smov 0   ;;  %s3391_s21 = smov 0  }
   0xd   :  { %s3393_s22 = smov 0  }
   0xe LB: > { %4428 = sst [smem:[#allocation12_spill]] %s3306_s12  ;;  %s3009_s23 = sadd.s32 4294967295, %s3346_s22   ;;  %s3346_s22 = sphi %s3393_s22, %s20_s22   ;;  %s3342_s21 = sphi %s3391_s21, %s4458_s21   ;;  %s3338_s20 = sphi %s3389_s20, %s4457_s20   ;;  %s3334_s19 = sphi %s3387_s19, %s4456_s19   ;;  %s3330_s18 = sphi %s3385_s18, %s4448_s18   ;;  %s3326_s17 = sphi %s3383_s17, %s4455_s17   ;;  %s3322_s16 = sphi %s3381_s16, %s4454_s16   ;;  %s3318_s15 = sphi %s3379_s15, %s4453_s15   ;;  %s3314_s14 = sphi %s3377_s14, %s4452_s14   ;;  %s3310_s13 = sphi %s3375_s13, %s4451_s13   ;;  %s3306_s12 = sphi %s3373_s12, %s4450_s12  }
   0xf   : > { %4429 = sst [smem:[#allocation13_spill]] %s3338_s20  ;;  %s3010_s24 = sadd.s32 4294967294, %s3346_s22  }
  0x10   : > { %4430 = sst [smem:[#allocation14_spill]] %s3346_s22  ;;  %p59_p0 = scmp.ne.s32.totalorder %s3326_s17, %s3322_s16 }
  0x11   : > { %p60_p1 = scmp.eq.s32.totalorder %s3346_s22, 0  ;;  %p65_p2 = scmp.ne.s32.totalorder %s3322_s16, %s3318_s15 }
  0x12   : > { %p3432_p3 = scmp.eq.s32.totalorder %s3009_s23, 0  ;;  %p144_p6 = scmp.ne.s32.totalorder %s3314_s14, %s3310_s13 }
  0x13   : > { %p3436_p4 = por %p60_p1, %p59_p0  ;;  %p145_p7 = scmp.eq.s32.totalorder %s3009_s23, 3 }
  0x14   : > { %p3443_p5 = por %p3432_p3, %p65_p2  ;;  %p150_p8 = scmp.ne.s32.totalorder %s3310_s13, %s3306_s12 }
  0x15   : > { %p151_p9 = scmp.eq.s32.totalorder %s3010_s24, 3  ;;  %p3015_p10 = scmp.ge.s32.totalorder %s3346_s22, 1 }
  0x16   : > { %p3452_p11 = por %p145_p7, %p144_p6  ;;  %p158_p12 = scmp.lt.s32.totalorder %s3346_s22, 5 }
  0x17   : > { %p3457_p13 = por %p151_p9, %p150_p8  ;;  %s4439_s1 = sld [smem:[#allocation17_spill]] }
  0x18   : > { %s4434_s29 = scalar_select %p3452_p11, 1, 0 }
  0x19   : > { %s4436_s30 = scalar_select %p3457_p13, 1, 0 }
  0x1a   : > { %4435 = sst [smem:[#allocation15_spill]] %s4434_s29  ;;  %p3461_p0 = pnand %p3015_p10, %p158_p12 }
  0x1b   : > { %4437 = sst [smem:[#allocation16_spill]] %s4436_s30  ;;  %s3348_s8 = smov [#allocation6]  }
  0x1c   : > { %p3048_p1 = pneg %p3461_p0  ;;  %s174_s9 = sshll.u32 %s3348_s8, 4  ;;  %s175_s9 = int_to_ptr.vmem [resolvable:$true] %s174_s9 }
  0x1d   : > { %s172_s7 = sshll.u32 %s4439_s1, 4  ;;  %p3061_p6 = scmp.lt.s32.totalorder %s3346_s22, 4  ;;  %s173_s7 = int_to_ptr.hbm [resolvable:$true] %s172_s7 }
  0x1e   : > { %p3049_p2 = pnand %p3048_p1, %p3432_p3  ;;  %s39_s11 = sadd.s32 1, %s3342_s21 }
  0x1f   : > { %p3475_p7 = pnand %p3061_p6, %p3436_p4  ;;  %s35_s15 = sadd.s32 1, %s3338_s20 }
  0x20   : > { %3051 = dma.hbm_to_vmem [thread:$0]  (!%p3049_p2), %s173_s7, 128, %s175_s9, [#allocation7]  }
  0x21   : > { %s3011_s23 = sshll.u32 %s3342_s21, 1  ;;  %p37_p8 = scmp.ge.s32.totalorder %s35_s15, 2 }
  0x22   : > { %s44_s24 = sadd.s32 %s3338_s20, %s3011_s23  ;;  %s52_s5 = sadd.s32 1, %s3326_s17 }
  0x23   : > { %s185_s6 = sand.u32 1, %s3326_s17   ;;  %s4460_s15 = smov (%p37_p8, %s35_s15), 0 }
  0x24   : > { %s4462_s11 = smov (!%p37_p8, %s39_s11), %s3342_s21  ;;  %s3018_s8 = sshll.u32 %s185_s6, 11 }
  0x25   : > { %p41_p4 = scmp.ge.s32.totalorder %s4462_s11, 2  ;;  %s3037_s26 = sshll.u32 %s44_s24, 11 }
  0x26   : > { %s189_s27 = scalar_lea.vmem [#allocation3], %s3018_s8  ;;  %s199_s23 = scalar_lea.hbm %s4413_s0, %s3037_s26 }
  0x27   : > { %s202_s7 = sshll.u32 %s189_s27, 4  ;;  %s4464_s11 = smov (%p41_p4, %s4462_s11), 0  ;;  %s203_s7 = int_to_ptr.vmem [resolvable:$true] %s202_s7 }
  0x28   : > { %s3012_s20 = sshll.u32 %s4464_s11, 1  ;;  %s131_s30 = ssub.s32 %s3342_s21, %s4464_s11 }
  0x29   : > { %s46_s12 = sadd.s32 %s3012_s20, %s4460_s15  ;;  %p132_p9 = scmp.eq.s32.totalorder %s131_s30, 0 }
  0x2a   : > { %s47_s22 = ssub.s32 %s44_s24, %s46_s12  ;;  %s200_s3 = sshll.u32 %s199_s23, 4  ;;  %s201_s3 = int_to_ptr.hbm [resolvable:$true] %s200_s3 }
  0x2b   : > { %p50_p10 = scmp.eq.s32.totalorder %s47_s22, 0  ;;  %s4441_s8 = sadd.s32 1, %s3314_s14 }
  0x2c   : > { %s3500_s27 = scalar_select %p132_p9, %s3314_s14, %s4441_s8  }
  0x2d   : > { %s3503_s29 = scalar_select %p50_p10, %s3326_s17, %s52_s5  }
  0x2e   : > { %s186_s2 = scalar_lea.sflag [#allocation4], %s185_s6  ;;  %s3349_s1 = smov 1024  }
  0x2f   : > { %s3350_s9 = smov 64   ;;  %227 = sbr.rel (%p3461_p0) target bundleno = 774 (0x306), region = 32 }
  0x30   : > { %3055 = dma.hbm_to_vmem [thread:$0]  (!%p3475_p7), %s201_s3, 32768, %s203_s7, %s186_s2, %s3349_s1, %s3349_s1, %s3350_s9  }
  0x31   : > { %s229_s20 = sand.u32 (!%p3461_p0), 1, %s3322_s16  }
  0x32   : > { %s3024_s12 = sshll.u32 (!%p3461_p0), %s229_s20, 11  ;;  %s230_s30 = scalar_lea.sflag (!%p3461_p0), [#allocation4], %s229_s20 }
  0x33   : > { %s3510_s22 = scalar_lea.vmem (!%p3461_p0), [#allocation3], %s3024_s12 }
  0x34   : > { %3293 = dma.done.wait (%p3443_p5), %s230_s30, 32768  }
  0x35   : > { %3295 = vsyncadd (%p3443_p5), %s230_s30, 4294934528 }
  0x36   : > { %3297 = dma.done.wait (%p3432_p3), [#allocation7], 128  }
  0x37   : > { %3299 = vsyncadd (%p3432_p3), [#allocation7], 4294967168  ;;  %s266_s2 = sand.u32 1, %s3310_s13   ;;  %s3027_s3 = sshll.u32 %s3334_s19, 1 }
  0x38   : > { %s3524_s4 = sshll.u32 %s266_s2, 3  ;;  %s275_s10 = sadd.s32 %s3330_s18, %s3027_s3 }
  0x39   : > { %s3028_s28 = sshll.u32 %s275_s10, 5  ;;  %p284_p12 = scmp.eq.s32.totalorder %s3330_s18, 0 }
  0x3a   : > { %p277_p5 = scmp.lt.s32.totalorder %s3028_s28, 127  ;;  %s4442_s6 = sld [smem:[#allocation18_spill]]  ;;  %v3351_v0 = vmov (%p284_p12), 0.0  }
  0x3b   : > { %s268_s7 = scalar_lea.vmem [#allocation8], %s3524_s4  ;;  %290 = vst [vmem:[#allocation2 + $0x2b0] sm:$0xff] (%p284_p12), %v3351_v0 }
  0x3c   : > { %s4466_s28 = smov (!%p277_p5, %s3028_s28), 127  ;;  %289 = sbr.rel (!%p284_p12) target bundleno = 315 (0x13b), region = 44  ;;  %291 = vst [vmem:[#allocation2 + $0x3b0] sm:$0xff] (%p284_p12), %v3351_v0 }
  0x3d   : > { %s3029_s24 = sshll.u32 %s4466_s28, 3  ;;  %292 = vst [vmem:[#allocation2 + $0x4d8] sm:$0xff] (%p284_p12), %v3351_v0 }
  0x3e   : > { %293 = vst [vmem:[#allocation2 + $0x18] sm:$0xff] (%p284_p12), %v3351_v0 }
  0x3f   : > { %294 = vst [vmem:[#allocation2 + $0x450] sm:$0xff] (%p284_p12), %v3351_v0 }
  0x40   : > { %s3531_s26 = scalar_lea.vmem %s4442_s6, %s3029_s24  ;;  %295 = vst [vmem:[#allocation2 + $0x768] sm:$0xff] (%p284_p12), %v3351_v0 }
  0x41   : > { %296 = vst [vmem:[#allocation2 + $0x330] sm:$0xff] %v3351_v0 }
  0x42   : > { %297 = vst [vmem:[#allocation2 + $0x448] sm:$0xff] %v3351_v0 }
  0x43   : > { %298 = vst [vmem:[#allocation2 + $0x380] sm:$0xff] %v3351_v0 }
  0x44   : > { %299 = vst [vmem:[#allocation2 + $0x110] sm:$0xff] %v3351_v0 }
  0x45   : > { %300 = vst [vmem:[#allocation2 + $0x518] sm:$0xff] %v3351_v0 }
  0x46   : > { %301 = vst [vmem:[#allocation2 + $0x498] sm:$0xff] %v3351_v0 }
  0x47   : > { %302 = vst [vmem:[#allocation2 + $0x320] sm:$0xff] %v3351_v0 }
  0x48   : > { %303 = vst [vmem:[#allocation2 + $0x550] sm:$0xff] %v3351_v0 }
  0x49   : > { %304 = vst [vmem:[#allocation2 + $0x508] sm:$0xff] %v3351_v0 }
  0x4a   : > { %305 = vst [vmem:[#allocation2 + $0x720] sm:$0xff] %v3351_v0 }
  0x4b   : > { %306 = vst [vmem:[#allocation2 + $0x6e0] sm:$0xff] %v3351_v0 }
  0x4c   : > { %307 = vst [vmem:[#allocation2 + $0x788] sm:$0xff] %v3351_v0 }
  0x4d   : > { %308 = vst [vmem:[#allocation2 + $0x338] sm:$0xff] %v3351_v0 }
  0x4e   : > { %309 = vst [vmem:[#allocation2 + $0x740] sm:$0xff] %v3351_v0 }
  0x4f   : > { %310 = vst [vmem:[#allocation2 + $0x2e0] sm:$0xff] %v3351_v0 }
  0x50   : > { %311 = vst [vmem:[#allocation2 + $0x5a8] sm:$0xff] %v3351_v0 }
  0x51   : > { %312 = vst [vmem:[#allocation2 + $0x5b8] sm:$0xff] %v3351_v0 }
  0x52   : > { %313 = vst [vmem:[#allocation2 + $0x568] sm:$0xff] %v3351_v0 }
  0x53   : > { %314 = vst [vmem:[#allocation2 + $0x3e8] sm:$0xff] %v3351_v0 }
  0x54   : > { %315 = vst [vmem:[#allocation2 + $0x6f8] sm:$0xff] %v3351_v0 }
  0x55   : > { %316 = vst [vmem:[#allocation2 + $0x690] sm:$0xff] %v3351_v0 }
  0x56   : > { %317 = vst [vmem:[#allocation2 + $0x368] sm:$0xff] %v3351_v0 }
  0x57   : > { %318 = vst [vmem:[#allocation2 + $0x138] sm:$0xff] %v3351_v0 }
  0x58   : > { %319 = vst [vmem:[#allocation2 + $0xc0] sm:$0xff] %v3351_v0 }
  0x59   : > { %320 = vst [vmem:[#allocation2 + $0x1c0] sm:$0xff] %v3351_v0 }
  0x5a   : > { %321 = vst [vmem:[#allocation2 + $0x280] sm:$0xff] %v3351_v0 }
  0x5b   : > { %322 = vst [vmem:[#allocation2 + $0x100] sm:$0xff] %v3351_v0 }
  0x5c   : > { %323 = vst [vmem:[#allocation2 + $0x3c0] sm:$0xff] %v3351_v0 }
  0x5d   : > { %324 = vst [vmem:[#allocation2 + $0x558] sm:$0xff] %v3351_v0 }
  0x5e   : > { %325 = vst [vmem:[#allocation2 + $0x3e0] sm:$0xff] %v3351_v0 }
  0x5f   : > { %326 = vst [vmem:[#allocation2 + $0x618] sm:$0xff] %v3351_v0 }
  0x60   : > { %327 = vst [vmem:[#allocation2 + $0x4c0] sm:$0xff] %v3351_v0 }
  0x61   : > { %328 = vst [vmem:[#allocation2 + $0x70] sm:$0xff] %v3351_v0 }
  0x62   : > { %329 = vst [vmem:[#allocation2 + $0x7b8] sm:$0xff] %v3351_v0 }
  0x63   : > { %330 = vst [vmem:[#allocation2 + $0x400] sm:$0xff] %v3351_v0 }
  0x64   : > { %331 = vst [vmem:[#allocation2 + $0x6a8] sm:$0xff] %v3351_v0 }
  0x65   : > { %332 = vst [vmem:[#allocation2 + $0x3f8] sm:$0xff] %v3351_v0 }
  0x66   : > { %333 = vst [vmem:[#allocation2 + $0x2e8] sm:$0xff] %v3351_v0 }
  0x67   : > { %334 = vst [vmem:[#allocation2 + $0x6c8] sm:$0xff] %v3351_v0 }
  0x68   : > { %335 = vst [vmem:[#allocation2 + $0x5c0] sm:$0xff] %v3351_v0 }
  0x69   : > { %336 = vst [vmem:[#allocation2 + $0x5e8] sm:$0xff] %v3351_v0 }
  0x6a   : > { %337 = vst [vmem:[#allocation2 + $0x5f8] sm:$0xff] %v3351_v0 }
  0x6b   : > { %338 = vst [vmem:[#allocation2 + $0x770] sm:$0xff] %v3351_v0 }
  0x6c   : > { %339 = vst [vmem:[#allocation2 + $0x520] sm:$0xff] %v3351_v0 }
  0x6d   : > { %340 = vst [vmem:[#allocation2 + $0x640] sm:$0xff] %v3351_v0 }
  0x6e   : > { %341 = vst [vmem:[#allocation2 + $0x250] sm:$0xff] %v3351_v0 }
  0x6f   : > { %342 = vst [vmem:[#allocation2 + $0x348] sm:$0xff] %v3351_v0 }
  0x70   : > { %343 = vst [vmem:[#allocation2 + $0x420] sm:$0xff] %v3351_v0 }
  0x71   : > { %344 = vst [vmem:[#allocation2 + $0xe0] sm:$0xff] %v3351_v0 }
  0x72   : > { %345 = vst [vmem:[#allocation2 + $0x620] sm:$0xff] %v3351_v0 }
  0x73   : > { %346 = vst [vmem:[#allocation2 + $0x148] sm:$0xff] %v3351_v0 }
  0x74   : > { %347 = vst [vmem:[#allocation2 + $0x3a0] sm:$0xff] %v3351_v0 }
  0x75   : > { %348 = vst [vmem:[#allocation2 + $0x4e8] sm:$0xff] %v3351_v0 }
  0x76   : > { %349 = vst [vmem:[#allocation2 + $0x310] sm:$0xff] %v3351_v0 }
  0x77   : > { %350 = vst [vmem:[#allocation2 + $0x38] sm:$0xff] %v3351_v0 }
  0x78   : > { %351 = vst [vmem:[#allocation2 + $0x440] sm:$0xff] %v3351_v0 }
  0x79   : > { %352 = vst [vmem:[#allocation2 + $0x50] sm:$0xff] %v3351_v0 }
  0x7a   : > { %353 = vst [vmem:[#allocation2 + $0x390] sm:$0xff] %v3351_v0 }
  0x7b   : > { %354 = vst [vmem:[#allocation2 + $0x538] sm:$0xff] %v3351_v0 }
  0x7c   : > { %355 = vst [vmem:[#allocation2 + $0xf0] sm:$0xff] %v3351_v0 }
  0x7d   : > { %356 = vst [vmem:[#allocation2 + $0x790] sm:$0xff] %v3351_v0 }
  0x7e   : > { %357 = vst [vmem:[#allocation2 + $0x680] sm:$0xff] %v3351_v0 }
  0x7f   : > { %358 = vst [vmem:[#allocation2 + $0xb8] sm:$0xff] %v3351_v0 }
  0x80   : > { %359 = vst [vmem:[#allocation2 + $0x120] sm:$0xff] %v3351_v0 }
  0x81   : > { %360 = vst [vmem:[#allocation2 + $0xd0] sm:$0xff] %v3351_v0 }
  0x82   : > { %361 = vst [vmem:[#allocation2 + $0x40] sm:$0xff] %v3351_v0 }
  0x83   : > { %362 = vst [vmem:[#allocation2 + $0x6f0] sm:$0xff] %v3351_v0 }
  0x84   : > { %363 = vst [vmem:[#allocation2 + $0x2f8] sm:$0xff] %v3351_v0 }
  0x85   : > { %364 = vst [vmem:[#allocation2 + $0x758] sm:$0xff] %v3351_v0 }
  0x86   : > { %365 = vst [vmem:[#allocation2 + $0x178] sm:$0xff] %v3351_v0 }
  0x87   : > { %366 = vst [vmem:[#allocation2 + $0x738] sm:$0xff] %v3351_v0 }
  0x88   : > { %367 = vst [vmem:[#allocation2 + $0x598] sm:$0xff] %v3351_v0 }
  0x89   : > { %368 = vst [vmem:[#allocation2 + $0x7d8] sm:$0xff] %v3351_v0 }
  0x8a   : > { %369 = vst [vmem:[#allocation2 + $0x6d8] sm:$0xff] %v3351_v0 }
  0x8b   : > { %370 = vst [vmem:[#allocation2 + $0x398] sm:$0xff] %v3351_v0 }
  0x8c   : > { %371 = vst [vmem:[#allocation2 + $0x1a8] sm:$0xff] %v3351_v0 }
  0x8d   : > { %372 = vst [vmem:[#allocation2 + $0x698] sm:$0xff] %v3351_v0 }
  0x8e   : > { %373 = vst [vmem:[#allocation2 + $0x3b8] sm:$0xff] %v3351_v0 }
  0x8f   : > { %374 = vst [vmem:[#allocation2 + $0x5d8] sm:$0xff] %v3351_v0 }
  0x90   : > { %375 = vst [vmem:[#allocation2 + $0x610] sm:$0xff] %v3351_v0 }
  0x91   : > { %376 = vst [vmem:[#allocation2 + $0x218] sm:$0xff] %v3351_v0 }
  0x92   : > { %377 = vst [vmem:[#allocation2 + $0x1d8] sm:$0xff] %v3351_v0 }
  0x93   : > { %378 = vst [vmem:[#allocation2 + $0x628] sm:$0xff] %v3351_v0 }
  0x94   : > { %379 = vst [vmem:[#allocation2 + $0x1f8] sm:$0xff] %v3351_v0 }
  0x95   : > { %380 = vst [vmem:[#allocation2 + $0x388] sm:$0xff] %v3351_v0 }
  0x96   : > { %381 = vst [vmem:[#allocation2 + $0x278] sm:$0xff] %v3351_v0 }
  0x97   : > { %382 = vst [vmem:[#allocation2 + $0x478] sm:$0xff] %v3351_v0 }
  0x98   : > { %383 = vst [vmem:[#allocation2 + $0x2c0] sm:$0xff] %v3351_v0 }
  0x99   : > { %384 = vst [vmem:[#allocation2 + $0x1c8] sm:$0xff] %v3351_v0 }
  0x9a   : > { %385 = vst [vmem:[#allocation2 + $0x7c0] sm:$0xff] %v3351_v0 }
  0x9b   : > { %386 = vst [vmem:[#allocation2 + $0x418] sm:$0xff] %v3351_v0 }
  0x9c   : > { %387 = vst [vmem:[#allocation2 + $0x7f0] sm:$0xff] %v3351_v0 }
  0x9d   : > { %388 = vst [vmem:[#allocation2 + $0x4b0] sm:$0xff] %v3351_v0 }
  0x9e   : > { %389 = vst [vmem:[#allocation2 + $0x318] sm:$0xff] %v3351_v0 }
  0x9f   : > { %390 = vst [vmem:[#allocation2 + $0x90] sm:$0xff] %v3351_v0 }
  0xa0   : > { %391 = vst [vmem:[#allocation2 + $0x540] sm:$0xff] %v3351_v0 }
  0xa1   : > { %392 = vst [vmem:[#allocation2 + $0x588] sm:$0xff] %v3351_v0 }
  0xa2   : > { %393 = vst [vmem:[#allocation2 + $0x648] sm:$0xff] %v3351_v0 }
  0xa3   : > { %394 = vst [vmem:[#allocation2 + $0x58] sm:$0xff] %v3351_v0 }
  0xa4   : > { %395 = vst [vmem:[#allocation2 + $0x198] sm:$0xff] %v3351_v0 }
  0xa5   : > { %396 = vst [vmem:[#allocation2 + $0x68] sm:$0xff] %v3351_v0 }
  0xa6   : > { %397 = vst [vmem:[#allocation2 + $0x600] sm:$0xff] %v3351_v0 }
  0xa7   : > { %398 = vst [vmem:[#allocation2 + $0x3a8] sm:$0xff] %v3351_v0 }
  0xa8   : > { %399 = vst [vmem:[#allocation2 + $0xb0] sm:$0xff] %v3351_v0 }
  0xa9   : > { %400 = vst [vmem:[#allocation2 + $0x630] sm:$0xff] %v3351_v0 }
  0xaa   : > { %401 = vst [vmem:[#allocation2 + $0x158] sm:$0xff] %v3351_v0 }
  0xab   : > { %402 = vst [vmem:[#allocation2 + $0x370] sm:$0xff] %v3351_v0 }
  0xac   : > { %403 = vst [vmem:[#allocation2 + $0x1e0] sm:$0xff] %v3351_v0 }
  0xad   : > { %404 = vst [vmem:[#allocation2 + $0x7b0] sm:$0xff] %v3351_v0 }
  0xae   : > { %405 = vst [vmem:[#allocation2 + $0x6c0] sm:$0xff] %v3351_v0 }
  0xaf   : > { %406 = vst [vmem:[#allocation2 + $0xd8] sm:$0xff] %v3351_v0 }
  0xb0   : > { %407 = vst [vmem:[#allocation2 + $0x6b8] sm:$0xff] %v3351_v0 }
  0xb1   : > { %408 = vst [vmem:[#allocation2 + $0x140] sm:$0xff] %v3351_v0 }
  0xb2   : > { %409 = vst [vmem:[#allocation2 + $0x5b0] sm:$0xff] %v3351_v0 }
  0xb3   : > { %410 = vst [vmem:[#allocation2 + $0x30] sm:$0xff] %v3351_v0 }
  0xb4   : > { %411 = vst [vmem:[#allocation2 + $0x128] sm:$0xff] %v3351_v0 }
  0xb5   : > { %412 = vst [vmem:[#allocation2 + $0x1a0] sm:$0xff] %v3351_v0 }
  0xb6   : > { %413 = vst [vmem:[#allocation2 + $0x5f0] sm:$0xff] %v3351_v0 }
  0xb7   : > { %414 = vst [vmem:[#allocation2 + $0x670] sm:$0xff] %v3351_v0 }
  0xb8   : > { %415 = vst [vmem:[#allocation2 + $0x240] sm:$0xff] %v3351_v0 }
  0xb9   : > { %416 = vst [vmem:[#allocation2 + $0x118] sm:$0xff] %v3351_v0 }
  0xba   : > { %417 = vst [vmem:[#allocation2 + $0x268] sm:$0xff] %v3351_v0 }
  0xbb   : > { %418 = vst [vmem:[#allocation2 + $0x4a8] sm:$0xff] %v3351_v0 }
  0xbc   : > { %419 = vst [vmem:[#allocation2 + $0x5c8] sm:$0xff] %v3351_v0 }
  0xbd   : > { %420 = vst [vmem:[#allocation2 + $0x438] sm:$0xff] %v3351_v0 }
  0xbe   : > { %421 = vst [vmem:[#allocation2 + $0x350] sm:$0xff] %v3351_v0 }
  0xbf   : > { %422 = vst [vmem:[#allocation2 + $0x2c8] sm:$0xff] %v3351_v0 }
  0xc0   : > { %423 = vst [vmem:[#allocation2 + $0xf8] sm:$0xff] %v3351_v0 }
  0xc1   : > { %424 = vst [vmem:[#allocation2 + $0x488] sm:$0xff] %v3351_v0 }
  0xc2   : > { %425 = vst [vmem:[#allocation2 + $0x6a0] sm:$0xff] %v3351_v0 }
  0xc3   : > { %426 = vst [vmem:[#allocation2 + $0x3c8] sm:$0xff] %v3351_v0 }
  0xc4   : > { %427 = vst [vmem:[#allocation2 + $0x1e8] sm:$0xff] %v3351_v0 }
  0xc5   : > { %428 = vst [vmem:[#allocation2 + $0x6d0] sm:$0xff] %v3351_v0 }
  0xc6   : > { %429 = vst [vmem:[#allocation2 + $0x688] sm:$0xff] %v3351_v0 }
  0xc7   : > { %430 = vst [vmem:[#allocation2 + $0x730] sm:$0xff] %v3351_v0 }
  0xc8   : > { %431 = vst [vmem:[#allocation2 + $0x658] sm:$0xff] %v3351_v0 }
  0xc9   : > { %432 = vst [vmem:[#allocation2 + $0x458] sm:$0xff] %v3351_v0 }
  0xca   : > { %433 = vst [vmem:[#allocation2 + $0x1b8] sm:$0xff] %v3351_v0 }
  0xcb   : > { %434 = vst [vmem:[#allocation2 + $0x460] sm:$0xff] %v3351_v0 }
  0xcc   : > { %435 = vst [vmem:[#allocation2 + $0x4f0] sm:$0xff] %v3351_v0 }
  0xcd   : > { %436 = vst [vmem:[#allocation2 + $0x528] sm:$0xff] %v3351_v0 }
  0xce   : > { %437 = vst [vmem:[#allocation2 + $0x258] sm:$0xff] %v3351_v0 }
  0xcf   : > { %438 = vst [vmem:[#allocation2 + $0x4d0] sm:$0xff] %v3351_v0 }
  0xd0   : > { %439 = vst [vmem:[#allocation2 + $0x4f8] sm:$0xff] %v3351_v0 }
  0xd1   : > { %440 = vst [vmem:[#allocation2 + $0x78] sm:$0xff] %v3351_v0 }
  0xd2   : > { %441 = vst [vmem:[#allocation2 + $0x2a0] sm:$0xff] %v3351_v0 }
  0xd3   : > { %442 = vst [vmem:[#allocation2 + $0x10] sm:$0xff] %v3351_v0 }
  0xd4   : > { %443 = vst [vmem:[#allocation2 + $0x778] sm:$0xff] %v3351_v0 }
  0xd5   : > { %444 = vst [vmem:[#allocation2 + $0x7a8] sm:$0xff] %v3351_v0 }
  0xd6   : > { %445 = vst [vmem:[#allocation2 + $0x530] sm:$0xff] %v3351_v0 }
  0xd7   : > { %446 = vst [vmem:[#allocation2 + $0x590] sm:$0xff] %v3351_v0 }
  0xd8   : > { %447 = vst [vmem:[#allocation2 + $0x660] sm:$0xff] %v3351_v0 }
  0xd9   : > { %448 = vst [vmem:[#allocation2 + $0x358] sm:$0xff] %v3351_v0 }
  0xda   : > { %449 = vst [vmem:[#allocation2 + $0x700] sm:$0xff] %v3351_v0 }
  0xdb   : > { %450 = vst [vmem:[#allocation2 + $0x340] sm:$0xff] %v3351_v0 }
  0xdc   : > { %451 = vst [vmem:[#allocation2 + $0x5a0] sm:$0xff] %v3351_v0 }
  0xdd   : > { %452 = vst [vmem:[#allocation2 + $0x3d0] sm:$0xff] %v3351_v0 }
  0xde   : > { %453 = vst [vmem:[#allocation2 + $0x230] sm:$0xff] %v3351_v0 }
  0xdf   : > { %454 = vst [vmem:[#allocation2 + $0x560] sm:$0xff] %v3351_v0 }
  0xe0   : > { %455 = vst [vmem:[#allocation2 + $0x7f8] sm:$0xff] %v3351_v0 }
  0xe1   : > { %456 = vst [vmem:[#allocation2 + $0x4e0] sm:$0xff] %v3351_v0 }
  0xe2   : > { %457 = vst [vmem:[#allocation2 + $0x200] sm:$0xff] %v3351_v0 }
  0xe3   : > { %458 = vst [vmem:[#allocation2 + $0x468] sm:$0xff] %v3351_v0 }
  0xe4   : > { %459 = vst [vmem:[#allocation2 + $0x2a8] sm:$0xff] %v3351_v0 }
  0xe5   : > { %460 = vst [vmem:[#allocation2 + $0x1d0] sm:$0xff] %v3351_v0 }
  0xe6   : > { %461 = vst [vmem:[#allocation2 + $0x510] sm:$0xff] %v3351_v0 }
  0xe7   : > { %462 = vst [vmem:[#allocation2 + $0x750] sm:$0xff] %v3351_v0 }
  0xe8   : > { %463 = vst [vmem:[#allocation2 + $0x130] sm:$0xff] %v3351_v0 }
  0xe9   : > { %464 = vst [vmem:[#allocation2 + $0x28] sm:$0xff] %v3351_v0 }
  0xea   : > { %465 = vst [vmem:[#allocation2 + $0x760] sm:$0xff] %v3351_v0 }
  0xeb   : > { %466 = vst [vmem:[#allocation2 + $0x5d0] sm:$0xff] %v3351_v0 }
  0xec   : > { %467 = vst [vmem:[#allocation2 + $0x228] sm:$0xff] %v3351_v0 }
  0xed   : > { %468 = vst [vmem:[#allocation2 + $0x208] sm:$0xff] %v3351_v0 }
  0xee   : > { %469 = vst [vmem:[#allocation2 + $0x290] sm:$0xff] %v3351_v0 }
  0xef   : > { %470 = vst [vmem:[#allocation2 + $0x7a0] sm:$0xff] %v3351_v0 }
  0xf0   : > { %471 = vst [vmem:[#allocation2 + $0x80] sm:$0xff] %v3351_v0 }
  0xf1   : > { %472 = vst [vmem:[#allocation2 + $0x4c8] sm:$0xff] %v3351_v0 }
  0xf2   : > { %473 = vst [vmem:[#allocation2 + $0x3f0] sm:$0xff] %v3351_v0 }
  0xf3   : > { %474 = vst [vmem:[#allocation2 + $0x798] sm:$0xff] %v3351_v0 }
  0xf4   : > { %475 = vst [vmem:[#allocation2 + $0x378] sm:$0xff] %v3351_v0 }
  0xf5   : > { %476 = vst [vmem:[#allocation2 + $0x160] sm:$0xff] %v3351_v0 }
  0xf6   : > { %477 = vst [vmem:[#allocation2 + $0x260] sm:$0xff] %v3351_v0 }
  0xf7   : > { %478 = vst [vmem:[#allocation2 + $0x728] sm:$0xff] %v3351_v0 }
  0xf8   : > { %479 = vst [vmem:[#allocation2 + $0x288] sm:$0xff] %v3351_v0 }
  0xf9   : > { %480 = vst [vmem:[#allocation2 + $0x188] sm:$0xff] %v3351_v0 }
  0xfa   : > { %481 = vst [vmem:[#allocation2 + $0x408] sm:$0xff] %v3351_v0 }
  0xfb   : > { %482 = vst [vmem:[#allocation2 + $0x678] sm:$0xff] %v3351_v0 }
  0xfc   : > { %483 = vst [vmem:[#allocation2 + $0x98] sm:$0xff] %v3351_v0 }
  0xfd   : > { %484 = vst [vmem:[#allocation2 + $0x470] sm:$0xff] %v3351_v0 }
  0xfe   : > { %485 = vst [vmem:[#allocation2 + $0x410] sm:$0xff] %v3351_v0 }
  0xff   : > { %486 = vst [vmem:[#allocation2 + $0x248] sm:$0xff] %v3351_v0 }
 0x100   : > { %487 = vst [vmem:[#allocation2 + $0x548] sm:$0xff] %v3351_v0 }
 0x101   : > { %488 = vst [vmem:[#allocation2 + $0x220] sm:$0xff] %v3351_v0 }
 0x102   : > { %489 = vst [vmem:[#allocation2 + $0x780] sm:$0xff] %v3351_v0 }
 0x103   : > { %490 = vst [vmem:[#allocation2 + $0x708] sm:$0xff] %v3351_v0 }
 0x104   : > { %491 = vst [vmem:[#allocation2 + $0x8] sm:$0xff] %v3351_v0 }
 0x105   : > { %492 = vst [vmem:[#allocation2 + $0x428] sm:$0xff] %v3351_v0 }
 0x106   : > { %493 = vst [vmem:[#allocation2 + $0x170] sm:$0xff] %v3351_v0 }
 0x107   : > { %494 = vst [vmem:[#allocation2 + $0x7e0] sm:$0xff] %v3351_v0 }
 0x108   : > { %495 = vst [vmem:[#allocation2 + $0x20] sm:$0xff] %v3351_v0 }
 0x109   : > { %496 = vst [vmem:[#allocation2 + $0x308] sm:$0xff] %v3351_v0 }
 0x10a   : > { %497 = vst [vmem:[#allocation2 + $0x88] sm:$0xff] %v3351_v0 }
 0x10b   : > { %498 = vst [vmem:[#allocation2 + $0x6e8] sm:$0xff] %v3351_v0 }
 0x10c   : > { %499 = vst [vmem:[#allocation2 + $0x6b0] sm:$0xff] %v3351_v0 }
 0x10d   : > { %500 = vst [vmem:[#allocation2 + $0x300] sm:$0xff] %v3351_v0 }
 0x10e   : > { %501 = vst [vmem:[#allocation2 + $0x108] sm:$0xff] %v3351_v0 }
 0x10f   : > { %502 = vst [vmem:[#allocation2 + $0x180] sm:$0xff] %v3351_v0 }
 0x110   : > { %503 = vst [vmem:[#allocation2 + $0x490] sm:$0xff] %v3351_v0 }
 0x111   : > { %504 = vst [vmem:[#allocation2 + $0x570] sm:$0xff] %v3351_v0 }
 0x112   : > { %505 = vst [vmem:[#allocation2 + $0x500] sm:$0xff] %v3351_v0 }
 0x113   : > { %506 = vst [vmem:[#allocation2 + $0xe8] sm:$0xff] %v3351_v0 }
 0x114   : > { %507 = vst [vmem:[#allocation2 + $0x2f0] sm:$0xff] %v3351_v0 }
 0x115   : > { %508 = vst [vmem:[#allocation2 + $0x7e8] sm:$0xff] %v3351_v0 }
 0x116   : > { %509 = vst [vmem:[#allocation2 + $0x360] sm:$0xff] %v3351_v0 }
 0x117   : > { %510 = vst [vmem:[#allocation2 + $0x60] sm:$0xff] %v3351_v0 }
 0x118   : > { %511 = vst [vmem:[#allocation2 + $0x210] sm:$0xff] %v3351_v0 }
 0x119   : > { %512 = vst [vmem:[#allocation2 + $0x4a0] sm:$0xff] %v3351_v0 }
 0x11a   : > { %513 = vst [vmem:[#allocation2 + $0x748] sm:$0xff] %v3351_v0 }
 0x11b   : > { %514 = vst [vmem:[#allocation2 + $0x168] sm:$0xff] %v3351_v0 }
 0x11c   : > { %515 = vst [vmem:[#allocation2 + $0x668] sm:$0xff] %v3351_v0 }
 0x11d   : > { %516 = vst [vmem:[#allocation2 + $0x270] sm:$0xff] %v3351_v0 }
 0x11e   : > { %517 = vst [vmem:[#allocation2 + $0x2d8] sm:$0xff] %v3351_v0 }
 0x11f   : > { %518 = vst [vmem:[#allocation2 + $0xc8] sm:$0xff] %v3351_v0 }
 0x120   : > { %519 = vst [vmem:[#allocation2 + $0xa0] sm:$0xff] %v3351_v0 }
 0x121   : > { %520 = vst [vmem:[#allocation2 + $0x48] sm:$0xff] %v3351_v0 }
 0x122   : > { %521 = vst [vmem:[#allocation2 + $0x328] sm:$0xff] %v3351_v0 }
 0x123   : > { %522 = vst [vmem:[#allocation2 + $0x7c8] sm:$0xff] %v3351_v0 }
 0x124   : > { %523 = vst [vmem:[#allocation2 + $0x430] sm:$0xff] %v3351_v0 }
 0x125   : > { %524 = vst [vmem:[#allocation2 + $0x578] sm:$0xff] %v3351_v0 }
 0x126   : > { %525 = vst [vmem:[#allocation2 + $0x608] sm:$0xff] %v3351_v0 }
 0x127   : > { %526 = vst [vmem:[#allocation2 + $0x638] sm:$0xff] %v3351_v0 }
 0x128   : > { %527 = vst [vmem:[#allocation2 + $0x4b8] sm:$0xff] %v3351_v0 }
 0x129   : > { %528 = vst [vmem:[#allocation2 + $0x298] sm:$0xff] %v3351_v0 }
 0x12a   : > { %529 = vst [vmem:[#allocation2 + $0x1f0] sm:$0xff] %v3351_v0 }
 0x12b   : > { %530 = vst [vmem:[#allocation2] sm:$0xff] %v3351_v0 }
 0x12c   : > { %531 = vst [vmem:[#allocation2 + $0x2d0] sm:$0xff] %v3351_v0 }
 0x12d   : > { %532 = vst [vmem:[#allocation2 + $0x650] sm:$0xff] %v3351_v0 }
 0x12e   : > { %533 = vst [vmem:[#allocation2 + $0x480] sm:$0xff] %v3351_v0 }
 0x12f   : > { %534 = vst [vmem:[#allocation2 + $0x3d8] sm:$0xff] %v3351_v0 }
 0x130   : > { %535 = vst [vmem:[#allocation2 + $0x718] sm:$0xff] %v3351_v0 }
 0x131   : > { %536 = vst [vmem:[#allocation2 + $0x7d0] sm:$0xff] %v3351_v0 }
 0x132   : > { %537 = vst [vmem:[#allocation2 + $0x190] sm:$0xff] %v3351_v0 }
 0x133   : > { %538 = vst [vmem:[#allocation2 + $0x710] sm:$0xff] %v3351_v0 }
 0x134   : > { %539 = vst [vmem:[#allocation2 + $0xa8] sm:$0xff] %v3351_v0 }
 0x135   : > { %540 = vst [vmem:[#allocation2 + $0x2b8] sm:$0xff] %v3351_v0 }
 0x136   : > { %541 = vst [vmem:[#allocation2 + $0x238] sm:$0xff] %v3351_v0 }
 0x137   : > { %542 = vst [vmem:[#allocation2 + $0x1b0] sm:$0xff] %v3351_v0 }
 0x138   : > { %543 = vst [vmem:[#allocation2 + $0x5e0] sm:$0xff] %v3351_v0 }
 0x139   : > { %544 = vst [vmem:[#allocation2 + $0x580] sm:$0xff] %v3351_v0 }
 0x13a   : > { %545 = vst [vmem:[#allocation2 + $0x150] sm:$0xff] %v3351_v0 }
 0x13b PF: > { %v807_v1 = vld [vmem:[%s3531_s26 + $0x20] sm:$0xff]  ;;  %v805_v2 = vld [vmem:[%s3531_s26 + $0x10] sm:$0xff]  ;;  %v3352_v4 = vmov 0   ;;  %v808_v5 = vld [vmem:[%s3531_s26 + $0x28] sm:$0xff]  ;;  %p2292_p3 = scmp.eq.s32.totalorder %s3330_s18, 1 }
 0x13c   : > { %v803_v3 = vld [vmem:[%s3531_s26] sm:$0xff]  ;;  %3159 = vset.pattern.permute.xlu2 %v3352_v4  ;;  %3158 = vset.pattern.permute.xlu1 %v3352_v4  ;;  %v806_v6 = vld [vmem:[%s3531_s26 + $0x18] sm:$0xff]  ;;  %v804_v7 = vld [vmem:[%s3531_s26 + $0x8] sm:$0xff]  ;;  %vm2864_vm0 = vcmask (%p2292_p3), 1040384   ;;  %vm2866_vm1 = vcmask (%p2292_p3), 1042434   ;;  %vm2868_vm2 = vcmask (%p2292_p3), 1041408  }
 0x13d   : > { %3157 = vset.pattern.permute.xlu0 %v3352_v4  ;;  %1386 = vperm.xlu2 %3159, %v807_v1   ;;  %v811_v8 = vld [vmem:[%s3531_s26 + $0x40] sm:$0xff]  ;;  %v810_v9 = vld [vmem:[%s3531_s26 + $0x38] sm:$0xff]  ;;  %v809_v10 = vld [vmem:[%s3531_s26 + $0x30] sm:$0xff]  ;;  %vm2870_vm3 = vcmask (%p2292_p3), 1044484   ;;  %vm2872_vm4 = vcmask (%p2292_p3), 1046534   ;;  %vm2874_vm5 = vcmask (%p2292_p3), 1045508  }
 0x13e   : > { %1376 = vperm.xlu1 %3158, %v805_v2   ;;  %1366 = vperm.xlu0 %3157, %v803_v3   ;;  %v814_v11 = vld [vmem:[%s3531_s26 + $0x58] sm:$0xff]  ;;  %v813_v12 = vld [vmem:[%s3531_s26 + $0x50] sm:$0xff]  ;;  %v812_v13 = vld [vmem:[%s3531_s26 + $0x48] sm:$0xff]  ;;  %vm2876_vm6 = vcmask (%p2292_p3), 1043456  }
 0x13f   : > { %v817_v14 = vld [vmem:[%s3531_s26 + $0x70] sm:$0xff]  ;;  %v816_v15 = vld [vmem:[%s3531_s26 + $0x68] sm:$0xff]  ;;  %v815_v16 = vld [vmem:[%s3531_s26 + $0x60] sm:$0xff] }
 0x140   : > { %v820_v17 = vld [vmem:[%s3531_s26 + $0x88] sm:$0xff]  ;;  %v819_v18 = vld [vmem:[%s3531_s26 + $0x80] sm:$0xff]  ;;  %v818_v19 = vld [vmem:[%s3531_s26 + $0x78] sm:$0xff] }
 0x141   : > { %v823_v20 = vld [vmem:[%s3531_s26 + $0xa0] sm:$0xff]  ;;  %v822_v21 = vld [vmem:[%s3531_s26 + $0x98] sm:$0xff]  ;;  %v821_v22 = vld [vmem:[%s3531_s26 + $0x90] sm:$0xff] }
 0x142   : > { %v826_v23 = vld [vmem:[%s3531_s26 + $0xb8] sm:$0xff]  ;;  %v825_v24 = vld [vmem:[%s3531_s26 + $0xb0] sm:$0xff]  ;;  %v824_v25 = vld [vmem:[%s3531_s26 + $0xa8] sm:$0xff] }
 0x143   : > { %v829_v26 = vld [vmem:[%s3531_s26 + $0xd0] sm:$0xff]  ;;  %v828_v27 = vld [vmem:[%s3531_s26 + $0xc8] sm:$0xff]  ;;  %v827_v28 = vld [vmem:[%s3531_s26 + $0xc0] sm:$0xff] }
 0x144   : > { %v832_v29 = vld [vmem:[%s3531_s26 + $0xe8] sm:$0xff]  ;;  %v831_v30 = vld [vmem:[%s3531_s26 + $0xe0] sm:$0xff]  ;;  %v830_v31 = vld [vmem:[%s3531_s26 + $0xd8] sm:$0xff] }
 0x145   : > { %1391 = vperm.xlu2 %3159, %v808_v5   ;;  %v834_v32 = vld [vmem:[%s3531_s26 + $0xf8] sm:$0xff]  ;;  %v833_v33 = vld [vmem:[%s3531_s26 + $0xf0] sm:$0xff]  ;;  %v802_v34 = vld [vmem:[#allocation6] sm:$0xff] }
 0x146   : > { %1381 = vperm.xlu1 %3158, %v806_v6   ;;  %1371 = vperm.xlu0 %3157, %v804_v7   ;;  %v578_v35 = vld [vmem:[%s3510_s22 + $0x100] sm:$0xff]  ;;  %v579_v36 = vld [vmem:[%s3510_s22 + $0x108] sm:$0xff]  ;;  %v580_v37 = vld [vmem:[%s3510_s22 + $0x110] sm:$0xff]  ;;  %v3828_v41 = vperm.slane %v802_v34, 0  ;;  %v3830_v42 = vperm.slane %v802_v34, 1  ;;  %v3832_v43 = vperm.slane %v802_v34, 2 }
 0x147   : > { %v581_v38 = vld [vmem:[%s3510_s22 + $0x118] sm:$0xff]  ;;  %v582_v39 = vld [vmem:[%s3510_s22 + $0x120] sm:$0xff]  ;;  %v583_v40 = vld [vmem:[%s3510_s22 + $0x128] sm:$0xff]  ;;  %v3834_v44 = vperm.slane %v802_v34, 3  ;;  %v3837_v46 = vperm.slane %v802_v34, 4  ;;  %v3839_v47 = vperm.slane %v802_v34, 5 }
 0x148   : > { %v584_v45 = vld [vmem:[%s3510_s22 + $0x130] sm:$0xff]  ;;  %v3841_v48 = vperm.slane %v802_v34, 6  ;;  %v585_v49 = vld [vmem:[%s3510_s22 + $0x138] sm:$0xff]  ;;  %v1140_v50 = vmul.f32 %v3828_v41, %v578_v35  ;;  %v1141_v51 = vmul.f32 %v3830_v42, %v579_v36  ;;  %v1142_v52 = vmul.f32 %v3832_v43, %v580_v37  ;;  %v867_v58 = vld [vmem:[#allocation2 + $0x100] sm:$0xff] }
 0x149   : > { %v1143_v53 = vmul.f32 %v3834_v44, %v581_v38  ;;  %v3848_v54 = vperm.slane %v802_v34, 7  ;;  %v1144_v55 = vmul.f32 %v3837_v46, %v582_v39  ;;  %v1145_v56 = vmul.f32 %v3839_v47, %v583_v40  ;;  %v868_v59 = vld [vmem:[#allocation2 + $0x3c0] sm:$0xff]  ;;  %v869_v60 = vld [vmem:[#allocation2 + $0x558] sm:$0xff]  ;;  %v876_v36 = vld [vmem:[#allocation2 + $0x6a8] sm:$0xff] }
 0x14a   : > { %v1146_v57 = vmul.f32 %v3841_v48, %v584_v45  ;;  %v870_v63 = vld [vmem:[#allocation2 + $0x3e0] sm:$0xff]  ;;  %v871_v0 = vld [vmem:[#allocation2 + $0x618] sm:$0xff]  ;;  %v878_v40 = vld [vmem:[#allocation2 + $0x2e8] sm:$0xff] }
 0x14b   : > { %v1147_v62 = vmul.f32 %v3848_v54, %v585_v49  ;;  %v586_v5 = vld [vmem:[%s3510_s22 + $0x140] sm:$0xff]  ;;  %v877_v37 = vld [vmem:[#allocation2 + $0x3f8] sm:$0xff]  ;;  %v879_v45 = vld [vmem:[#allocation2 + $0x6c8] sm:$0xff] }
 0x14c   : > { %v875_v35 = vld [vmem:[#allocation2 + $0x400] sm:$0xff] }
 0x14d   : > { %1406 = vperm.xlu2 %3159, %v811_v8   ;;  %v587_v8 = vld [vmem:[%s3510_s22 + $0x148] sm:$0xff] }
 0x14e   : > { %1401 = vperm.xlu1 %3158, %v810_v9   ;;  %1396 = vperm.xlu0 %3157, %v809_v10   ;;  %v588_v9 = vld [vmem:[%s3510_s22 + $0x150] sm:$0xff]  ;;  %v589_v10 = vld [vmem:[%s3510_s22 + $0x158] sm:$0xff] }
 0x155   : > { %1421 = vperm.xlu2 %3159, %v814_v11   ;;  %v872_v11 = vld [vmem:[#allocation2 + $0x4c0] sm:$0xff] }
 0x156   : > { %1416 = vperm.xlu1 %3158, %v813_v12   ;;  %1411 = vperm.xlu0 %3157, %v812_v13  }
 0x15d   : > { %1436 = vperm.xlu2 %3159, %v817_v14  }
 0x15e   : > { %1431 = vperm.xlu1 %3158, %v816_v15   ;;  %1426 = vperm.xlu0 %3157, %v815_v16   ;;  %v590_v16 = vld [vmem:[%s3510_s22 + $0x160] sm:$0xff] }
 0x165   : > { %1451 = vperm.xlu2 %3159, %v820_v17   ;;  %v591_v17 = vld [vmem:[%s3510_s22 + $0x168] sm:$0xff] }
 0x166   : > { %1446 = vperm.xlu1 %3158, %v819_v18   ;;  %1441 = vperm.xlu0 %3157, %v818_v19   ;;  %v873_v18 = vld [vmem:[#allocation2 + $0x70] sm:$0xff] }
 0x16d   : > { %1466 = vperm.xlu2 %3159, %v823_v20  }
 0x16e   : > { %1461 = vperm.xlu1 %3158, %v822_v21   ;;  %1456 = vperm.xlu0 %3157, %v821_v22   ;;  %v592_v21 = vld [vmem:[%s3510_s22 + $0x170] sm:$0xff]  ;;  %v1148_v22 = vmul.f32 %v3828_v41, %v586_v5 }
 0x175   : > { %1481 = vperm.xlu2 %3159, %v826_v23   ;;  %v874_v23 = vld [vmem:[#allocation2 + $0x7b8] sm:$0xff] }
 0x176   : > { %1476 = vperm.xlu1 %3158, %v825_v24   ;;  %1471 = vperm.xlu0 %3157, %v824_v25   ;;  %v593_v25 = vld [vmem:[%s3510_s22 + $0x178] sm:$0xff] }
 0x177   : > { %v1155_v39 = vmul.f32 %v3848_v54, %v593_v25  ;;  %v902_v25 = vld [vmem:[#allocation2 + $0x680] sm:$0xff] }
 0x17d   : > { %1496 = vperm.xlu2 %3159, %v829_v26   ;;  %v1149_v26 = vmul.f32 %v3830_v42, %v587_v8  ;;  %v882_v8 = vld [vmem:[#allocation2 + $0x5f8] sm:$0xff] }
 0x17e   : > { %1491 = vperm.xlu1 %3158, %v828_v27   ;;  %1486 = vperm.xlu0 %3157, %v827_v28   ;;  %v1150_v27 = vmul.f32 %v3832_v43, %v588_v9  ;;  %v1151_v28 = vmul.f32 %v3834_v44, %v589_v10  ;;  %v617_v10 = vld [vmem:[%s3510_s22 + $0x238] sm:$0xff] }
 0x185   : > { %1511 = vperm.xlu2 %3159, %v832_v29  }
 0x186   : > { %1506 = vperm.xlu1 %3158, %v831_v30   ;;  %1501 = vperm.xlu0 %3157, %v830_v31   ;;  %v1152_v30 = vmul.f32 %v3837_v46, %v590_v16  ;;  %v1153_v31 = vmul.f32 %v3839_v47, %v591_v17 }
 0x18e   : > { %1521 = vperm.xlu1 %3158, %v834_v32   ;;  %1516 = vperm.xlu0 %3157, %v833_v33   ;;  %v1154_v33 = vmul.f32 %v3841_v48, %v592_v21  ;;  %v900_v21 = vld [vmem:[#allocation2 + $0xf0] sm:$0xff] }
 0x197   : > { %v1387_v61 = vpop.permute.xlu2 %1386 }
 0x198   : > { %v1556_v1 = vmul.f32 %v1387_v61, %v1140_v50  ;;  %v1557_v2 = vmul.f32 %v1387_v61, %v1141_v51  ;;  %v1558_v3 = vmul.f32 %v1387_v61, %v1142_v52  ;;  %v1559_v4 = vmul.f32 %v1387_v61, %v1143_v53  ;;  %v610_v53 = vld [vmem:[%s3510_s22 + $0x200] sm:$0xff] }
 0x199   : > { %v1560_v6 = vmul.f32 %v1387_v61, %v1144_v55  ;;  %v1561_v7 = vmul.f32 %v1387_v61, %v1145_v56  ;;  %v1562_v12 = vmul.f32 %v1387_v61, %v1146_v57  ;;  %v1563_v19 = vmul.f32 %v1387_v61, %v1147_v62  ;;  %v611_v57 = vld [vmem:[%s3510_s22 + $0x208] sm:$0xff] }
 0x19a   : > { %v1812_v13 = vadd.f32 %v1556_v1, %v867_v58  ;;  %v1813_v14 = vadd.f32 %v1557_v2, %v868_v59  ;;  %v1814_v15 = vadd.f32 %v1558_v3, %v869_v60  ;;  %v1815_v20 = vadd.f32 %v1559_v4, %v870_v63  ;;  %v612_v58 = vld [vmem:[%s3510_s22 + $0x210] sm:$0xff]  ;;  %v613_v59 = vld [vmem:[%s3510_s22 + $0x218] sm:$0xff]  ;;  %v880_v60 = vld [vmem:[#allocation2 + $0x5c0] sm:$0xff] }
 0x19b   : > { %v1816_v24 = vadd.f32 %v1560_v6, %v871_v0  ;;  %v1817_v29 = vadd.f32 %v1561_v7, %v872_v11  ;;  %v1818_v32 = vadd.f32 %v1562_v12, %v873_v18  ;;  %v1819_v34 = vadd.f32 %v1563_v19, %v874_v23  ;;  %v614_v1 = vld [vmem:[%s3510_s22 + $0x220] sm:$0xff]  ;;  %v615_v2 = vld [vmem:[%s3510_s22 + $0x228] sm:$0xff]  ;;  %v616_v6 = vld [vmem:[%s3510_s22 + $0x230] sm:$0xff] }
 0x19c   : > { %2068 = vst [vmem:[#allocation2 + $0x100] sm:$0xff] %v1812_v13  ;;  %v881_v3 = vld [vmem:[#allocation2 + $0x5e8] sm:$0xff]  ;;  %v1172_v7 = vmul.f32 %v3828_v41, %v610_v53  ;;  %v1173_v11 = vmul.f32 %v3830_v42, %v611_v57  ;;  %v1174_v12 = vmul.f32 %v3832_v43, %v612_v58  ;;  %v1175_v13 = vmul.f32 %v3834_v44, %v613_v59  ;;  %v906_v57 = vld [vmem:[#allocation2 + $0x40] sm:$0xff]  ;;  %v641_v59 = vld [vmem:[%s3510_s22 + $0x2f8] sm:$0xff] }
 0x19d   : > { %2069 = vst [vmem:[#allocation2 + $0x3c0] sm:$0xff] %v1813_v14  ;;  %v1177_v16 = vmul.f32 %v3839_v47, %v615_v2  ;;  %v1178_v18 = vmul.f32 %v3841_v48, %v616_v6  ;;  %v564_v6 = vld [vmem:[%s3510_s22 + $0x90] sm:$0xff] }
 0x19e   : > { %2070 = vst [vmem:[#allocation2 + $0x558] sm:$0xff] %v1814_v15  ;;  %v1176_v15 = vmul.f32 %v3837_v46, %v614_v1 }
 0x19f   : > { %2071 = vst [vmem:[#allocation2 + $0x3e0] sm:$0xff] %v1815_v20  ;;  %v1392_v38 = vpop.permute.xlu2 %1391  ;;  %v899_v20 = vld [vmem:[#allocation2 + $0x538] sm:$0xff] }
 0x1a0   : > { %2072 = vst [vmem:[#allocation2 + $0x618] sm:$0xff] %v1816_v24  ;;  %v1564_v49 = vmul.f32 %v1392_v38, %v1148_v22  ;;  %v1565_v50 = vmul.f32 %v1392_v38, %v1149_v26  ;;  %v1566_v51 = vmul.f32 %v1392_v38, %v1150_v27  ;;  %v1567_v52 = vmul.f32 %v1392_v38, %v1151_v28  ;;  %v901_v22 = vld [vmem:[#allocation2 + $0x790] sm:$0xff]  ;;  %v903_v26 = vld [vmem:[#allocation2 + $0xb8] sm:$0xff] }
 0x1a1   : > { %2073 = vst [vmem:[#allocation2 + $0x4c0] sm:$0xff] %v1817_v29  ;;  %v1568_v55 = vmul.f32 %v1392_v38, %v1152_v30  ;;  %v1569_v56 = vmul.f32 %v1392_v38, %v1153_v31  ;;  %v1570_v61 = vmul.f32 %v1392_v38, %v1154_v33  ;;  %v1571_v4 = vmul.f32 %v1392_v38, %v1155_v39  ;;  %v634_v31 = vld [vmem:[%s3510_s22 + $0x2c0] sm:$0xff] }
 0x1a2   : > { %2074 = vst [vmem:[#allocation2 + $0x70] sm:$0xff] %v1818_v32  ;;  %v1820_v62 = vadd.f32 %v1564_v49, %v875_v35  ;;  %v1821_v63 = vadd.f32 %v1565_v50, %v876_v36  ;;  %v1822_v0 = vadd.f32 %v1566_v51, %v877_v37  ;;  %v1823_v5 = vadd.f32 %v1567_v52, %v878_v40  ;;  %v636_v35 = vld [vmem:[%s3510_s22 + $0x2d0] sm:$0xff]  ;;  %v637_v36 = vld [vmem:[%s3510_s22 + $0x2d8] sm:$0xff]  ;;  %v904_v37 = vld [vmem:[#allocation2 + $0x120] sm:$0xff] }
 0x1a3   : > { %2075 = vst [vmem:[#allocation2 + $0x7b8] sm:$0xff] %v1819_v34  ;;  %v1824_v9 = vadd.f32 %v1568_v55, %v879_v45  ;;  %v1825_v14 = vadd.f32 %v1569_v56, %v880_v60  ;;  %v1826_v17 = vadd.f32 %v1570_v61, %v881_v3  ;;  %v1827_v19 = vadd.f32 %v1571_v4, %v882_v8  ;;  %v635_v34 = vld [vmem:[%s3510_s22 + $0x2c8] sm:$0xff]  ;;  %v638_v49 = vld [vmem:[%s3510_s22 + $0x2e0] sm:$0xff]  ;;  %v905_v51 = vld [vmem:[#allocation2 + $0xd0] sm:$0xff] }
 0x1a4   : > { %2076 = vst [vmem:[#allocation2 + $0x400] sm:$0xff] %v1820_v62  ;;  %v1179_v24 = vmul.f32 %v3848_v54, %v617_v10  ;;  %v639_v50 = vld [vmem:[%s3510_s22 + $0x2e8] sm:$0xff]  ;;  %v640_v55 = vld [vmem:[%s3510_s22 + $0x2f0] sm:$0xff]  ;;  %v1196_v56 = vmul.f32 %v3828_v41, %v634_v31  ;;  %v1197_v60 = vmul.f32 %v3830_v42, %v635_v34  ;;  %v1198_v61 = vmul.f32 %v3832_v43, %v636_v35 }
 0x1a5   : > { %2077 = vst [vmem:[#allocation2 + $0x6a8] sm:$0xff] %v1821_v63  ;;  %v1199_v62 = vmul.f32 %v3834_v44, %v637_v36  ;;  %v562_v63 = vld [vmem:[%s3510_s22 + $0x80] sm:$0xff]  ;;  %v1200_v1 = vmul.f32 %v3837_v46, %v638_v49  ;;  %v1201_v2 = vmul.f32 %v3839_v47, %v639_v50  ;;  %v1202_v4 = vmul.f32 %v3841_v48, %v640_v55  ;;  %v923_v8 = vld [vmem:[#allocation2 + $0x628] sm:$0xff]  ;;  %v568_v36 = vld [vmem:[%s3510_s22 + $0xb0] sm:$0xff] }
 0x1a6   : > { %2078 = vst [vmem:[#allocation2 + $0x3f8] sm:$0xff] %v1822_v0  ;;  %v925_v10 = vld [vmem:[#allocation2 + $0x388] sm:$0xff]  ;;  %v546_v55 = vld [vmem:[%s3510_s22] sm:$0xff] }
 0x1a7   : > { %2079 = vst [vmem:[#allocation2 + $0x2e8] sm:$0xff] %v1823_v5  ;;  %v1407_v23 = vpop.permute.xlu2 %1406  ;;  %v563_v5 = vld [vmem:[%s3510_s22 + $0x88] sm:$0xff] }
 0x1a8   : > { %2080 = vst [vmem:[#allocation2 + $0x6c8] sm:$0xff] %v1824_v9  ;;  %v1588_v27 = vmul.f32 %v1407_v23, %v1172_v7  ;;  %v1589_v28 = vmul.f32 %v1407_v23, %v1173_v11  ;;  %v1590_v29 = vmul.f32 %v1407_v23, %v1174_v12  ;;  %v1591_v30 = vmul.f32 %v1407_v23, %v1175_v13  ;;  %v924_v9 = vld [vmem:[#allocation2 + $0x1f8] sm:$0xff] }
 0x1a9   : > { %2081 = vst [vmem:[#allocation2 + $0x5c0] sm:$0xff] %v1825_v14  ;;  %v1592_v32 = vmul.f32 %v1407_v23, %v1176_v15  ;;  %v1593_v33 = vmul.f32 %v1407_v23, %v1177_v16  ;;  %v1594_v38 = vmul.f32 %v1407_v23, %v1178_v18  ;;  %v1595_v52 = vmul.f32 %v1407_v23, %v1179_v24  ;;  %v926_v14 = vld [vmem:[#allocation2 + $0x278] sm:$0xff]  ;;  %v566_v24 = vld [vmem:[%s3510_s22 + $0xa0] sm:$0xff] }
 0x1aa   : > { %2082 = vst [vmem:[#allocation2 + $0x5e8] sm:$0xff] %v1826_v17  ;;  %v1844_v39 = vadd.f32 %v1588_v27, %v899_v20  ;;  %v1845_v40 = vadd.f32 %v1589_v28, %v900_v21  ;;  %v1846_v45 = vadd.f32 %v1590_v29, %v901_v22  ;;  %v1847_v53 = vadd.f32 %v1591_v30, %v902_v25  ;;  %v927_v20 = vld [vmem:[#allocation2 + $0x478] sm:$0xff]  ;;  %v928_v27 = vld [vmem:[#allocation2 + $0x2c0] sm:$0xff] }
 0x1ab   : > { %2083 = vst [vmem:[#allocation2 + $0x5f8] sm:$0xff] %v1827_v19  ;;  %v1848_v58 = vadd.f32 %v1592_v32, %v903_v26  ;;  %v1849_v0 = vadd.f32 %v1593_v33, %v904_v37  ;;  %v1850_v3 = vadd.f32 %v1594_v38, %v905_v51  ;;  %v1851_v7 = vadd.f32 %v1595_v52, %v906_v57  ;;  %v565_v19 = vld [vmem:[%s3510_s22 + $0x98] sm:$0xff]  ;;  %v567_v32 = vld [vmem:[%s3510_s22 + $0xa8] sm:$0xff]  ;;  %v930_v38 = vld [vmem:[#allocation2 + $0x7c0] sm:$0xff] }
 0x1ac   : > { %2100 = vst [vmem:[#allocation2 + $0x538] sm:$0xff] %v1844_v39  ;;  %v1203_v12 = vmul.f32 %v3848_v54, %v641_v59  ;;  %v1124_v13 = vmul.f32 %v3828_v41, %v562_v63  ;;  %v1125_v25 = vmul.f32 %v3830_v42, %v563_v5  ;;  %v1126_v26 = vmul.f32 %v3832_v43, %v564_v6  ;;  %v929_v33 = vld [vmem:[#allocation2 + $0x1c8] sm:$0xff]  ;;  %v851_v51 = vld [vmem:[#allocation2 + $0x6e0] sm:$0xff]  ;;  %v549_v5 = vld [vmem:[%s3510_s22 + $0x18] sm:$0xff] }
 0x1ad   : > { %2101 = vst [vmem:[#allocation2 + $0xf0] sm:$0xff] %v1845_v40  ;;  %v1127_v37 = vmul.f32 %v3834_v44, %v565_v19  ;;  %v569_v40 = vld [vmem:[%s3510_s22 + $0xb8] sm:$0xff]  ;;  %v1129_v52 = vmul.f32 %v3839_v47, %v567_v32  ;;  %v852_v57 = vld [vmem:[#allocation2 + $0x788] sm:$0xff]  ;;  %v1108_v6 = vmul.f32 %v3828_v41, %v546_v55 }
 0x1ae   : > { %2102 = vst [vmem:[#allocation2 + $0x790] sm:$0xff] %v1846_v45  ;;  %v1128_v45 = vmul.f32 %v3837_v46, %v566_v24  ;;  %v1131_v63 = vmul.f32 %v3848_v54, %v569_v40  ;;  %v858_v24 = vld [vmem:[#allocation2 + $0x568] sm:$0xff] }
 0x1af   : > { %2103 = vst [vmem:[#allocation2 + $0x680] sm:$0xff] %v1847_v53  ;;  %v1422_v11 = vpop.permute.xlu2 %1421 }
 0x1b0   : > { %2104 = vst [vmem:[#allocation2 + $0xb8] sm:$0xff] %v1848_v58  ;;  %v1612_v15 = vmul.f32 %v1422_v11, %v1196_v56  ;;  %v1613_v16 = vmul.f32 %v1422_v11, %v1197_v60  ;;  %v1614_v17 = vmul.f32 %v1422_v11, %v1198_v61  ;;  %v1615_v18 = vmul.f32 %v1422_v11, %v1199_v62  ;;  %v1377_v23 = vpop.permute.xlu1 %1376  ;;  %v547_v60 = vld [vmem:[%s3510_s22 + $0x8] sm:$0xff]  ;;  %v853_v62 = vld [vmem:[#allocation2 + $0x338] sm:$0xff] }
 0x1b1   : > { %2105 = vst [vmem:[#allocation2 + $0x120] sm:$0xff] %v1849_v0  ;;  %v1616_v21 = vmul.f32 %v1422_v11, %v1200_v1  ;;  %v1617_v22 = vmul.f32 %v1422_v11, %v1201_v2  ;;  %v1618_v28 = vmul.f32 %v1422_v11, %v1202_v4  ;;  %v1619_v34 = vmul.f32 %v1422_v11, %v1203_v12  ;;  %v548_v1 = vld [vmem:[%s3510_s22 + $0x10] sm:$0xff]  ;;  %v854_v2 = vld [vmem:[#allocation2 + $0x740] sm:$0xff] }
 0x1b2   : > { %2106 = vst [vmem:[#allocation2 + $0xd0] sm:$0xff] %v1850_v3  ;;  %v1868_v29 = vadd.f32 %v1612_v15, %v923_v8  ;;  %v1869_v30 = vadd.f32 %v1613_v16, %v924_v9  ;;  %v1870_v31 = vadd.f32 %v1614_v17, %v925_v10  ;;  %v1871_v35 = vadd.f32 %v1615_v18, %v926_v14  ;;  %v1367_v10 = vpop.permute.xlu0 %1366  ;;  %v550_v11 = vld [vmem:[%s3510_s22 + $0x20] sm:$0xff]  ;;  %v551_v16 = vld [vmem:[%s3510_s22 + $0x28] sm:$0xff]  ;;  %v857_v18 = vld [vmem:[#allocation2 + $0x5b8] sm:$0xff] }
 0x1b3   : > { %2107 = vst [vmem:[#allocation2 + $0x40] sm:$0xff] %v1851_v7  ;;  %v1872_v39 = vadd.f32 %v1616_v21, %v927_v20  ;;  %v1540_v49 = vmul.f32 %v1377_v23, %v1124_v13  ;;  %v1873_v50 = vadd.f32 %v1617_v22, %v928_v27  ;;  %v1541_v53 = vmul.f32 %v1377_v23, %v1125_v25  ;;  %v855_v7 = vld [vmem:[#allocation2 + $0x2e0] sm:$0xff]  ;;  %v856_v13 = vld [vmem:[#allocation2 + $0x5a8] sm:$0xff]  ;;  %v552_v21 = vld [vmem:[%s3510_s22 + $0x30] sm:$0xff] }
 0x1b4   : > { %2124 = vst [vmem:[#allocation2 + $0x628] sm:$0xff] %v1868_v29  ;;  %v1874_v56 = vadd.f32 %v1618_v28, %v929_v33  ;;  %v1130_v58 = vmul.f32 %v3841_v48, %v568_v36  ;;  %v1542_v59 = vmul.f32 %v1377_v23, %v1126_v26  ;;  %v1875_v61 = vadd.f32 %v1619_v34, %v930_v38  ;;  %v553_v26 = vld [vmem:[%s3510_s22 + $0x38] sm:$0xff]  ;;  %v836_v34 = vld [vmem:[#allocation2 + $0x3b0] sm:$0xff] }
 0x1b5   : > { %2125 = vst [vmem:[#allocation2 + $0x1f8] sm:$0xff] %v1869_v30  ;;  %v1543_v0 = vmul.f32 %v1377_v23, %v1127_v37  ;;  %v1544_v3 = vmul.f32 %v1377_v23, %v1128_v45  ;;  %v1796_v4 = vadd.f32 %v1540_v49, %v851_v51  ;;  %v1545_v8 = vmul.f32 %v1377_v23, %v1129_v52  ;;  %v835_v30 = vld [vmem:[#allocation2 + $0x2b0] sm:$0xff]  ;;  %v659_v37 = vld [vmem:[%s3510_s22 + $0x388] sm:$0xff] }
 0x1b6   : > { %2126 = vst [vmem:[#allocation2 + $0x388] sm:$0xff] %v1870_v31  ;;  %v1797_v9 = vadd.f32 %v1541_v53, %v852_v57  ;;  %v1109_v12 = vmul.f32 %v3830_v42, %v547_v60  ;;  %v1546_v14 = vmul.f32 %v1377_v23, %v1130_v58  ;;  %v1798_v15 = vadd.f32 %v1542_v59, %v853_v62  ;;  %v660_v49 = vld [vmem:[%s3510_s22 + $0x390] sm:$0xff]  ;;  %v661_v53 = vld [vmem:[%s3510_s22 + $0x398] sm:$0xff]  ;;  %v662_v60 = vld [vmem:[%s3510_s22 + $0x3a0] sm:$0xff] }
 0x1b7   : > { %2127 = vst [vmem:[#allocation2 + $0x278] sm:$0xff] %v1871_v35  ;;  %v1110_v17 = vmul.f32 %v3832_v43, %v548_v1  ;;  %v1547_v19 = vmul.f32 %v1377_v23, %v1131_v63  ;;  %v1799_v20 = vadd.f32 %v1543_v0, %v854_v2  ;;  %v1111_v22 = vmul.f32 %v3834_v44, %v549_v5  ;;  %v658_v23 = vld [vmem:[%s3510_s22 + $0x380] sm:$0xff]  ;;  %v1437_v59 = vpop.permute.xlu2 %1436  ;;  %v840_v62 = vld [vmem:[#allocation2 + $0x768] sm:$0xff] }
 0x1b8   : > { %2128 = vst [vmem:[#allocation2 + $0x478] sm:$0xff] %v1872_v39  ;;  %v1800_v25 = vadd.f32 %v1544_v3, %v855_v7  ;;  %v1112_v27 = vmul.f32 %v3837_v46, %v550_v11  ;;  %v1524_v28 = vmul.f32 %v1367_v10, %v1108_v6  ;;  %v1801_v29 = vadd.f32 %v1545_v8, %v856_v13  ;;  %v837_v39 = vld [vmem:[#allocation2 + $0x4d8] sm:$0xff]  ;;  %v663_v1 = vld [vmem:[%s3510_s22 + $0x3a8] sm:$0xff]  ;;  %v841_v3 = vld [vmem:[#allocation2 + $0x330] sm:$0xff] }
 0x1b9   : > { %2129 = vst [vmem:[#allocation2 + $0x2c0] sm:$0xff] %v1873_v50  ;;  %v1113_v31 = vmul.f32 %v3839_v47, %v551_v16  ;;  %v1525_v32 = vmul.f32 %v1367_v10, %v1109_v12  ;;  %v1802_v33 = vadd.f32 %v1546_v14, %v857_v18  ;;  %v1114_v35 = vmul.f32 %v3841_v48, %v552_v21  ;;  %v838_v50 = vld [vmem:[#allocation2 + $0x18] sm:$0xff]  ;;  %v664_v6 = vld [vmem:[%s3510_s22 + $0x3b0] sm:$0xff]  ;;  %v842_v8 = vld [vmem:[#allocation2 + $0x448] sm:$0xff] }
 0x1ba   : > { %2130 = vst [vmem:[#allocation2 + $0x1c8] sm:$0xff] %v1874_v56  ;;  %v1526_v36 = vmul.f32 %v1367_v10, %v1110_v17  ;;  %v1803_v38 = vadd.f32 %v1547_v19, %v858_v24  ;;  %v1115_v40 = vmul.f32 %v3848_v54, %v553_v26  ;;  %v1527_v45 = vmul.f32 %v1367_v10, %v1111_v22  ;;  %v839_v56 = vld [vmem:[#allocation2 + $0x450] sm:$0xff]  ;;  %v665_v11 = vld [vmem:[%s3510_s22 + $0x3b8] sm:$0xff]  ;;  %v948_v19 = vld [vmem:[#allocation2 + $0x1e0] sm:$0xff] }
 0x1bb   : > { %2131 = vst [vmem:[#allocation2 + $0x7c0] sm:$0xff] %v1875_v61  ;;  %v1528_v51 = vmul.f32 %v1367_v10, %v1112_v27  ;;  %v1780_v52 = vadd.f32 %v1524_v28, %v835_v30  ;;  %v1220_v55 = vmul.f32 %v3828_v41, %v658_v23  ;;  %v1529_v57 = vmul.f32 %v1367_v10, %v1113_v31  ;;  %v571_v22 = vld [vmem:[%s3510_s22 + $0xc8] sm:$0xff]  ;;  %v572_v28 = vld [vmem:[%s3510_s22 + $0xd0] sm:$0xff] }
 0x1bc   : > { %2052 = vst [vmem:[#allocation2 + $0x6e0] sm:$0xff] %v1796_v4  ;;  %v1781_v58 = vadd.f32 %v1525_v32, %v836_v34  ;;  %v1221_v61 = vmul.f32 %v3830_v42, %v659_v37  ;;  %v1530_v63 = vmul.f32 %v1367_v10, %v1114_v35  ;;  %v1782_v0 = vadd.f32 %v1526_v36, %v837_v39  ;;  %v573_v32 = vld [vmem:[%s3510_s22 + $0xd8] sm:$0xff]  ;;  %v1382_v36 = vpop.permute.xlu1 %1381  ;;  %v574_v37 = vld [vmem:[%s3510_s22 + $0xe0] sm:$0xff] }
 0x1bd   : > { %2053 = vst [vmem:[#allocation2 + $0x788] sm:$0xff] %v1797_v9  ;;  %v1222_v2 = vmul.f32 %v3832_v43, %v660_v49  ;;  %v1531_v4 = vmul.f32 %v1367_v10, %v1115_v40  ;;  %v1783_v5 = vadd.f32 %v1527_v45, %v838_v50  ;;  %v1223_v7 = vmul.f32 %v3834_v44, %v661_v53  ;;  %v570_v10 = vld [vmem:[%s3510_s22 + $0xc0] sm:$0xff]  ;;  %v952_v39 = vld [vmem:[#allocation2 + $0x6b8] sm:$0xff]  ;;  %v575_v49 = vld [vmem:[%s3510_s22 + $0xe8] sm:$0xff] }
 0x1be   : > { %2054 = vst [vmem:[#allocation2 + $0x338] sm:$0xff] %v1798_v15  ;;  %v1784_v9 = vadd.f32 %v1528_v51, %v839_v56  ;;  %v1224_v12 = vmul.f32 %v3837_v46, %v662_v60  ;;  %v1636_v13 = vmul.f32 %v1437_v59, %v1220_v55  ;;  %v1785_v14 = vadd.f32 %v1529_v57, %v840_v62  ;;  %v947_v15 = vld [vmem:[#allocation2 + $0x370] sm:$0xff]  ;;  %v953_v51 = vld [vmem:[#allocation2 + $0x140] sm:$0xff]  ;;  %v577_v60 = vld [vmem:[%s3510_s22 + $0xf8] sm:$0xff] }
 0x1bf   : > { %2055 = vst [vmem:[#allocation2 + $0x740] sm:$0xff] %v1799_v20  ;;  %v1225_v16 = vmul.f32 %v3839_v47, %v663_v1  ;;  %v1637_v17 = vmul.f32 %v1437_v59, %v1221_v61  ;;  %v1786_v18 = vadd.f32 %v1530_v63, %v841_v3  ;;  %v1226_v20 = vmul.f32 %v3841_v48, %v664_v6  ;;  %v576_v55 = vld [vmem:[%s3510_s22 + $0xf0] sm:$0xff] }
 0x1c0   : > { %2056 = vst [vmem:[#allocation2 + $0x2e0] sm:$0xff] %v1800_v25  ;;  %v1638_v21 = vmul.f32 %v1437_v59, %v1222_v2  ;;  %v1787_v24 = vadd.f32 %v1531_v4, %v842_v8  ;;  %v949_v25 = vld [vmem:[#allocation2 + $0x7b0] sm:$0xff]  ;;  %v1227_v26 = vmul.f32 %v3848_v54, %v665_v11  ;;  %v1639_v27 = vmul.f32 %v1437_v59, %v1223_v7  ;;  %v860_v4 = vld [vmem:[#allocation2 + $0x6f8] sm:$0xff]  ;;  %v555_v7 = vld [vmem:[%s3510_s22 + $0x48] sm:$0xff] }
 0x1c1   : > { %2057 = vst [vmem:[#allocation2 + $0x5a8] sm:$0xff] %v1801_v29  ;;  %v950_v29 = vld [vmem:[#allocation2 + $0x6c0] sm:$0xff]  ;;  %v1640_v30 = vmul.f32 %v1437_v59, %v1224_v12  ;;  %v1892_v31 = vadd.f32 %v1636_v13, %v947_v15  ;;  %v1132_v23 = vmul.f32 %v3828_v41, %v570_v10  ;;  %v1641_v34 = vmul.f32 %v1437_v59, %v1225_v16  ;;  %v954_v57 = vld [vmem:[#allocation2 + $0x5b0] sm:$0xff] }
 0x1c2   : > { %2058 = vst [vmem:[#allocation2 + $0x5b8] sm:$0xff] %v1802_v33  ;;  %v951_v33 = vld [vmem:[#allocation2 + $0xd8] sm:$0xff]  ;;  %v1893_v35 = vadd.f32 %v1637_v17, %v948_v19  ;;  %v1642_v40 = vmul.f32 %v1437_v59, %v1226_v20  ;;  %v1894_v45 = vadd.f32 %v1638_v21, %v949_v25  ;;  %v1134_v50 = vmul.f32 %v3832_v43, %v572_v28  ;;  %v556_v13 = vld [vmem:[%s3510_s22 + $0x50] sm:$0xff]  ;;  %v1372_v21 = vpop.permute.xlu0 %1371  ;;  %v864_v25 = vld [vmem:[#allocation2 + $0xc0] sm:$0xff] }
 0x1c3   : > { %2059 = vst [vmem:[#allocation2 + $0x568] sm:$0xff] %v1803_v38  ;;  %v1133_v38 = vmul.f32 %v3830_v42, %v571_v22  ;;  %v1895_v53 = vadd.f32 %v1639_v27, %v950_v29  ;;  %v1135_v56 = vmul.f32 %v3834_v44, %v573_v32  ;;  %v1136_v61 = vmul.f32 %v3837_v46, %v574_v37  ;;  %v557_v17 = vld [vmem:[%s3510_s22 + $0x58] sm:$0xff]  ;;  %v558_v22 = vld [vmem:[%s3510_s22 + $0x60] sm:$0xff]  ;;  %v559_v28 = vld [vmem:[%s3510_s22 + $0x68] sm:$0xff] }
 0x1c4   : > { %2036 = vst [vmem:[#allocation2 + $0x2b0] sm:$0xff] %v1780_v52  ;;  %v1643_v52 = vmul.f32 %v1437_v59, %v1227_v26  ;;  %v1548_v62 = vmul.f32 %v1382_v36, %v1132_v23  ;;  %v1897_v63 = vadd.f32 %v1641_v34, %v952_v39  ;;  %v1137_v1 = vmul.f32 %v3839_v47, %v575_v49  ;;  %v554_v59 = vld [vmem:[%s3510_s22 + $0x40] sm:$0xff]  ;;  %v560_v23 = vld [vmem:[%s3510_s22 + $0x70] sm:$0xff]  ;;  %v561_v37 = vld [vmem:[%s3510_s22 + $0x78] sm:$0xff] }
 0x1c5   : > { %2037 = vst [vmem:[#allocation2 + $0x3b0] sm:$0xff] %v1781_v58  ;;  %v1896_v58 = vadd.f32 %v1640_v30, %v951_v33  ;;  %v1549_v2 = vmul.f32 %v1382_v36, %v1133_v38  ;;  %v1898_v3 = vadd.f32 %v1642_v40, %v953_v51  ;;  %v1550_v6 = vmul.f32 %v1382_v36, %v1134_v50  ;;  %v865_v30 = vld [vmem:[#allocation2 + $0x1c0] sm:$0xff] }
 0x1c6   : > { %2038 = vst [vmem:[#allocation2 + $0x4d8] sm:$0xff] %v1782_v0  ;;  %v859_v0 = vld [vmem:[#allocation2 + $0x3e8] sm:$0xff]  ;;  %v1899_v8 = vadd.f32 %v1643_v52, %v954_v57  ;;  %v1139_v11 = vmul.f32 %v3848_v54, %v577_v60  ;;  %v1551_v12 = vmul.f32 %v1382_v36, %v1135_v56  ;;  %v1552_v15 = vmul.f32 %v1382_v36, %v1136_v61  ;;  %v866_v34 = vld [vmem:[#allocation2 + $0x280] sm:$0xff]  ;;  %v844_v52 = vld [vmem:[#allocation2 + $0x110] sm:$0xff] }
 0x1c7   : > { %2039 = vst [vmem:[#allocation2 + $0x18] sm:$0xff] %v1783_v5  ;;  %v1138_v5 = vmul.f32 %v3841_v48, %v576_v55  ;;  %v1804_v16 = vadd.f32 %v1548_v62, %v859_v0  ;;  %v1116_v10 = vmul.f32 %v3828_v41, %v554_v59  ;;  %v1553_v19 = vmul.f32 %v1382_v36, %v1137_v1  ;;  %v683_v56 = vld [vmem:[%s3510_s22 + $0x448] sm:$0xff]  ;;  %v684_v62 = vld [vmem:[%s3510_s22 + $0x450] sm:$0xff] }
 0x1c8   : > { %2040 = vst [vmem:[#allocation2 + $0x450] sm:$0xff] %v1784_v9  ;;  %v861_v9 = vld [vmem:[#allocation2 + $0x690] sm:$0xff]  ;;  %v1805_v20 = vadd.f32 %v1549_v2, %v860_v4  ;;  %v1118_v29 = vmul.f32 %v3832_v43, %v556_v13  ;;  %v1119_v33 = vmul.f32 %v3834_v44, %v557_v17  ;;  %v1120_v38 = vmul.f32 %v3837_v46, %v558_v22  ;;  %v685_v2 = vld [vmem:[%s3510_s22 + $0x458] sm:$0xff]  ;;  %v687_v13 = vld [vmem:[%s3510_s22 + $0x468] sm:$0xff] }
 0x1c9   : > { %2041 = vst [vmem:[#allocation2 + $0x768] sm:$0xff] %v1785_v14  ;;  %v862_v14 = vld [vmem:[#allocation2 + $0x368] sm:$0xff]  ;;  %v1554_v26 = vmul.f32 %v1382_v36, %v1138_v5  ;;  %v1806_v27 = vadd.f32 %v1550_v6, %v861_v9  ;;  %v1532_v39 = vmul.f32 %v1372_v21, %v1116_v10  ;;  %v1809_v40 = vadd.f32 %v1553_v19, %v864_v25  ;;  %v1452_v6 = vpop.permute.xlu2 %1451  ;;  %v848_v9 = vld [vmem:[#allocation2 + $0x550] sm:$0xff]  ;;  %v850_v19 = vld [vmem:[#allocation2 + $0x720] sm:$0xff] }
 0x1ca   : > { %2042 = vst [vmem:[#allocation2 + $0x330] sm:$0xff] %v1786_v18  ;;  %v863_v18 = vld [vmem:[#allocation2 + $0x138] sm:$0xff]  ;;  %v1807_v32 = vadd.f32 %v1551_v12, %v862_v14  ;;  %v1121_v49 = vmul.f32 %v3839_v47, %v559_v28  ;;  %v1534_v55 = vmul.f32 %v1372_v21, %v1118_v29  ;;  %v1123_v60 = vmul.f32 %v3848_v54, %v561_v37  ;;  %v688_v10 = vld [vmem:[%s3510_s22 + $0x470] sm:$0xff] }
 0x1cb   : > { %2043 = vst [vmem:[#allocation2 + $0x448] sm:$0xff] %v1787_v24  ;;  %v1117_v24 = vmul.f32 %v3830_v42, %v555_v7  ;;  %v1810_v51 = vadd.f32 %v1554_v26, %v865_v30  ;;  %v1535_v61 = vmul.f32 %v1372_v21, %v1119_v33  ;;  %v1536_v0 = vmul.f32 %v1372_v21, %v1120_v38  ;;  %v686_v7 = vld [vmem:[%s3510_s22 + $0x460] sm:$0xff]  ;;  %v689_v22 = vld [vmem:[%s3510_s22 + $0x478] sm:$0xff]  ;;  %v603_v33 = vld [vmem:[%s3510_s22 + $0x1c8] sm:$0xff] }
 0x1cc   : > { %2148 = vst [vmem:[#allocation2 + $0x370] sm:$0xff] %v1892_v31  ;;  %v1555_v31 = vmul.f32 %v1382_v36, %v1139_v11  ;;  %v682_v36 = vld [vmem:[%s3510_s22 + $0x440] sm:$0xff]  ;;  %v1537_v4 = vmul.f32 %v1372_v21, %v1121_v49  ;;  %v1246_v14 = vmul.f32 %v3832_v43, %v684_v62  ;;  %v1249_v28 = vmul.f32 %v3839_v47, %v687_v13  ;;  %v607_v62 = vld [vmem:[%s3510_s22 + $0x1e8] sm:$0xff] }
 0x1cd   : > { %2149 = vst [vmem:[#allocation2 + $0x1e0] sm:$0xff] %v1893_v35  ;;  %v1808_v35 = vadd.f32 %v1552_v15, %v863_v18  ;;  %v1533_v50 = vmul.f32 %v1372_v21, %v1117_v24  ;;  %v1244_v59 = vmul.f32 %v3828_v41, %v682_v36  ;;  %v849_v15 = vld [vmem:[#allocation2 + $0x508] sm:$0xff]  ;;  %v1247_v18 = vmul.f32 %v3834_v44, %v685_v2 }
 0x1ce   : > { %2150 = vst [vmem:[#allocation2 + $0x7b0] sm:$0xff] %v1894_v45  ;;  %v843_v45 = vld [vmem:[#allocation2 + $0x380] sm:$0xff]  ;;  %v1811_v57 = vadd.f32 %v1555_v31, %v866_v34  ;;  %v1248_v24 = vmul.f32 %v3837_v46, %v686_v7  ;;  %v1793_v26 = vadd.f32 %v1537_v4, %v848_v9  ;;  %v972_v31 = vld [vmem:[#allocation2 + $0x1e8] sm:$0xff]  ;;  %v1251_v37 = vmul.f32 %v3848_v54, %v689_v22  ;;  %v978_v4 = vld [vmem:[#allocation2 + $0x1b8] sm:$0xff] }
 0x1cf   : > { %2151 = vst [vmem:[#allocation2 + $0x6c0] sm:$0xff] %v1895_v53  ;;  %v1122_v53 = vmul.f32 %v3841_v48, %v560_v23  ;;  %v1788_v1 = vadd.f32 %v1532_v39, %v843_v45  ;;  %v1789_v5 = vadd.f32 %v1533_v50, %v844_v52  ;;  %v1660_v25 = vmul.f32 %v1452_v6, %v1244_v59  ;;  %v604_v39 = vld [vmem:[%s3510_s22 + $0x1d0] sm:$0xff]  ;;  %v605_v50 = vld [vmem:[%s3510_s22 + $0x1d8] sm:$0xff] }
 0x1d0   : > { %2152 = vst [vmem:[#allocation2 + $0xd8] sm:$0xff] %v1896_v58  ;;  %v845_v58 = vld [vmem:[#allocation2 + $0x518] sm:$0xff]  ;;  %v1662_v23 = vmul.f32 %v1452_v6, %v1246_v14  ;;  %v1663_v38 = vmul.f32 %v1452_v6, %v1247_v18  ;;  %v1664_v45 = vmul.f32 %v1452_v6, %v1248_v24  ;;  %v1665_v52 = vmul.f32 %v1452_v6, %v1249_v28  ;;  %v608_v59 = vld [vmem:[%s3510_s22 + $0x1f0] sm:$0xff]  ;;  %v595_v18 = vld [vmem:[%s3510_s22 + $0x188] sm:$0xff] }
 0x1d1   : > { %2153 = vst [vmem:[#allocation2 + $0x6b8] sm:$0xff] %v1897_v63  ;;  %v846_v63 = vld [vmem:[#allocation2 + $0x498] sm:$0xff]  ;;  %v1538_v11 = vmul.f32 %v1372_v21, %v1122_v53  ;;  %v1790_v12 = vadd.f32 %v1534_v55, %v845_v58  ;;  %v1402_v55 = vpop.permute.xlu1 %1401  ;;  %v1169_v13 = vmul.f32 %v3839_v47, %v607_v62 }
 0x1d2   : > { %2154 = vst [vmem:[#allocation2 + $0x140] sm:$0xff] %v1898_v3  ;;  %v847_v3 = vld [vmem:[#allocation2 + $0x320] sm:$0xff]  ;;  %v1791_v17 = vadd.f32 %v1535_v61, %v846_v63  ;;  %v976_v58 = vld [vmem:[#allocation2 + $0x658] sm:$0xff]  ;;  %v1166_v63 = vmul.f32 %v3832_v43, %v604_v39  ;;  %v599_v39 = vld [vmem:[%s3510_s22 + $0x1a8] sm:$0xff] }
 0x1d3   : > { %2155 = vst [vmem:[#allocation2 + $0x5b0] sm:$0xff] %v1899_v8  ;;  %v1245_v8 = vmul.f32 %v3830_v42, %v683_v56  ;;  %v1794_v30 = vadd.f32 %v1538_v11, %v849_v15  ;;  %v606_v56 = vld [vmem:[%s3510_s22 + $0x1e0] sm:$0xff]  ;;  %v609_v7 = vld [vmem:[%s3510_s22 + $0x1f8] sm:$0xff]  ;;  %v1921_v11 = vadd.f32 %v1665_v52, %v976_v58  ;;  %v898_v52 = vld [vmem:[#allocation2 + $0x390] sm:$0xff]  ;;  %v1161_v62 = vmul.f32 %v3839_v47, %v599_v39 }
 0x1d4   : > { %2060 = vst [vmem:[#allocation2 + $0x3e8] sm:$0xff] %v1804_v16  ;;  %v1539_v16 = vmul.f32 %v1372_v21, %v1123_v60  ;;  %v602_v21 = vld [vmem:[%s3510_s22 + $0x1c0] sm:$0xff]  ;;  %v1171_v22 = vmul.f32 %v3848_v54, %v609_v7 }
 0x1d5   : > { %2061 = vst [vmem:[#allocation2 + $0x6f8] sm:$0xff] %v1805_v20  ;;  %v1792_v20 = vadd.f32 %v1536_v0, %v847_v3  ;;  %v1661_v29 = vmul.f32 %v1452_v6, %v1245_v8  ;;  %v1164_v36 = vmul.f32 %v3828_v41, %v602_v21  ;;  %v977_v0 = vld [vmem:[#allocation2 + $0x458] sm:$0xff]  ;;  %v1167_v3 = vmul.f32 %v3834_v44, %v605_v50 }
 0x1d6   : > { %2062 = vst [vmem:[#allocation2 + $0x690] sm:$0xff] %v1806_v27  ;;  %v971_v27 = vld [vmem:[#allocation2 + $0x3c8] sm:$0xff]  ;;  %v1795_v34 = vadd.f32 %v1539_v16, %v850_v19  ;;  %v1168_v8 = vmul.f32 %v3837_v46, %v606_v56  ;;  %v892_v16 = vld [vmem:[#allocation2 + $0x3a0] sm:$0xff]  ;;  %v601_v56 = vld [vmem:[%s3510_s22 + $0x1b8] sm:$0xff] }
 0x1d7   : > { %2063 = vst [vmem:[#allocation2 + $0x368] sm:$0xff] %v1807_v32  ;;  %v1250_v32 = vmul.f32 %v3841_v48, %v688_v10  ;;  %v1916_v49 = vadd.f32 %v1660_v25, %v971_v27  ;;  %v1917_v53 = vadd.f32 %v1661_v29, %v972_v31  ;;  %v1580_v9 = vmul.f32 %v1402_v55, %v1164_v36  ;;  %v596_v25 = vld [vmem:[%s3510_s22 + $0x190] sm:$0xff]  ;;  %v597_v29 = vld [vmem:[%s3510_s22 + $0x198] sm:$0xff] }
 0x1d8   : > { %2064 = vst [vmem:[#allocation2 + $0x138] sm:$0xff] %v1808_v35  ;;  %v973_v35 = vld [vmem:[#allocation2 + $0x6d0] sm:$0xff]  ;;  %v1582_v10 = vmul.f32 %v1402_v55, %v1166_v63  ;;  %v1583_v24 = vmul.f32 %v1402_v55, %v1167_v3  ;;  %v1584_v27 = vmul.f32 %v1402_v55, %v1168_v8  ;;  %v1585_v31 = vmul.f32 %v1402_v55, %v1169_v13  ;;  %v707_v3 = vld [vmem:[%s3510_s22 + $0x508] sm:$0xff] }
 0x1d9   : > { %2065 = vst [vmem:[#allocation2 + $0xc0] sm:$0xff] %v1809_v40  ;;  %v974_v40 = vld [vmem:[#allocation2 + $0x688] sm:$0xff]  ;;  %v1666_v60 = vmul.f32 %v1452_v6, %v1250_v32  ;;  %v1918_v61 = vadd.f32 %v1662_v23, %v973_v35  ;;  %v1397_v23 = vpop.permute.xlu0 %1396  ;;  %v896_v35 = vld [vmem:[#allocation2 + $0x440] sm:$0xff]  ;;  %v600_v36 = vld [vmem:[%s3510_s22 + $0x1b0] sm:$0xff]  ;;  %v1163_v7 = vmul.f32 %v3848_v54, %v601_v56 }
 0x1da   : > { %2066 = vst [vmem:[#allocation2 + $0x1c0] sm:$0xff] %v1810_v51  ;;  %v975_v51 = vld [vmem:[#allocation2 + $0x730] sm:$0xff]  ;;  %v1919_v2 = vadd.f32 %v1663_v38, %v974_v40  ;;  %v1158_v40 = vmul.f32 %v3832_v43, %v596_v25  ;;  %v711_v25 = vld [vmem:[%s3510_s22 + $0x528] sm:$0xff] }
 0x1db   : > { %2067 = vst [vmem:[#allocation2 + $0x280] sm:$0xff] %v1811_v57  ;;  %v1165_v57 = vmul.f32 %v3830_v42, %v603_v33  ;;  %v1922_v15 = vadd.f32 %v1666_v60, %v977_v0  ;;  %v598_v33 = vld [vmem:[%s3510_s22 + $0x1a0] sm:$0xff]  ;;  %v1841_v60 = vadd.f32 %v1585_v31, %v896_v35  ;;  %v1273_v39 = vmul.f32 %v3839_v47, %v711_v25 }
 0x1dc   : > { %2044 = vst [vmem:[#allocation2 + $0x380] sm:$0xff] %v1788_v1  ;;  %v1667_v1 = vmul.f32 %v1452_v6, %v1251_v37  ;;  %v594_v6 = vld [vmem:[%s3510_s22 + $0x180] sm:$0xff] }
 0x1dd   : > { %2045 = vst [vmem:[#allocation2 + $0x110] sm:$0xff] %v1789_v5  ;;  %v1920_v5 = vadd.f32 %v1664_v45, %v975_v51  ;;  %v1581_v14 = vmul.f32 %v1402_v55, %v1165_v57  ;;  %v1156_v21 = vmul.f32 %v3828_v41, %v594_v6  ;;  %v897_v45 = vld [vmem:[#allocation2 + $0x50] sm:$0xff]  ;;  %v1159_v51 = vmul.f32 %v3834_v44, %v597_v29  ;;  %v890_v31 = vld [vmem:[#allocation2 + $0x620] sm:$0xff] }
 0x1de   : > { %2046 = vst [vmem:[#allocation2 + $0x518] sm:$0xff] %v1790_v12  ;;  %v891_v12 = vld [vmem:[#allocation2 + $0x148] sm:$0xff]  ;;  %v1923_v19 = vadd.f32 %v1667_v1, %v978_v4  ;;  %v1160_v57 = vmul.f32 %v3837_v46, %v598_v33  ;;  %v884_v1 = vld [vmem:[#allocation2 + $0x520] sm:$0xff]  ;;  %v713_v33 = vld [vmem:[%s3510_s22 + $0x538] sm:$0xff] }
 0x1df   : > { %2047 = vst [vmem:[#allocation2 + $0x498] sm:$0xff] %v1791_v17  ;;  %v1170_v17 = vmul.f32 %v3841_v48, %v608_v59  ;;  %v1836_v28 = vadd.f32 %v1580_v9, %v891_v12  ;;  %v1837_v32 = vadd.f32 %v1581_v14, %v892_v16  ;;  %v1572_v58 = vmul.f32 %v1397_v23, %v1156_v21  ;;  %v708_v9 = vld [vmem:[%s3510_s22 + $0x510] sm:$0xff]  ;;  %v709_v14 = vld [vmem:[%s3510_s22 + $0x518] sm:$0xff] }
 0x1e0   : > { %2048 = vst [vmem:[#allocation2 + $0x320] sm:$0xff] %v1792_v20  ;;  %v893_v20 = vld [vmem:[#allocation2 + $0x4e8] sm:$0xff]  ;;  %v1574_v59 = vmul.f32 %v1397_v23, %v1158_v40  ;;  %v1575_v8 = vmul.f32 %v1397_v23, %v1159_v51  ;;  %v1576_v12 = vmul.f32 %v1397_v23, %v1160_v57  ;;  %v1577_v16 = vmul.f32 %v1397_v23, %v1161_v62  ;;  %v712_v21 = vld [vmem:[%s3510_s22 + $0x530] sm:$0xff] }
 0x1e1   : > { %2049 = vst [vmem:[#allocation2 + $0x550] sm:$0xff] %v1793_v26  ;;  %v894_v26 = vld [vmem:[#allocation2 + $0x310] sm:$0xff]  ;;  %v1586_v37 = vmul.f32 %v1402_v55, %v1170_v17  ;;  %v1838_v38 = vadd.f32 %v1582_v10, %v893_v20  ;;  %v1467_v10 = vpop.permute.xlu2 %1466  ;;  %v888_v20 = vld [vmem:[#allocation2 + $0x420] sm:$0xff]  ;;  %v627_v51 = vld [vmem:[%s3510_s22 + $0x288] sm:$0xff]  ;;  %v1275_v56 = vmul.f32 %v3848_v54, %v713_v33 }
 0x1e2   : > { %2050 = vst [vmem:[#allocation2 + $0x508] sm:$0xff] %v1794_v30  ;;  %v895_v30 = vld [vmem:[#allocation2 + $0x38] sm:$0xff]  ;;  %v1839_v50 = vadd.f32 %v1583_v24, %v894_v26  ;;  %v1270_v26 = vmul.f32 %v3832_v43, %v708_v9  ;;  %v631_v9 = vld [vmem:[%s3510_s22 + $0x2a8] sm:$0xff] }
 0x1e3   : > { %2051 = vst [vmem:[#allocation2 + $0x720] sm:$0xff] %v1795_v34  ;;  %v1157_v34 = vmul.f32 %v3830_v42, %v595_v18  ;;  %v1842_v0 = vadd.f32 %v1586_v37, %v897_v45  ;;  %v710_v18 = vld [vmem:[%s3510_s22 + $0x520] sm:$0xff]  ;;  %v1833_v37 = vadd.f32 %v1577_v16, %v888_v20  ;;  %v1193_v25 = vmul.f32 %v3839_v47, %v631_v9 }
 0x1e4   : > { %2172 = vst [vmem:[#allocation2 + $0x3c8] sm:$0xff] %v1916_v49  ;;  %v1587_v49 = vmul.f32 %v1402_v55, %v1171_v22  ;;  %v706_v55 = vld [vmem:[%s3510_s22 + $0x500] sm:$0xff] }
 0x1e5   : > { %2173 = vst [vmem:[#allocation2 + $0x1e8] sm:$0xff] %v1917_v53  ;;  %v1840_v53 = vadd.f32 %v1584_v27, %v895_v30  ;;  %v1573_v63 = vmul.f32 %v1397_v23, %v1157_v34  ;;  %v1268_v6 = vmul.f32 %v3828_v41, %v706_v55  ;;  %v889_v27 = vld [vmem:[#allocation2 + $0xe0] sm:$0xff]  ;;  %v1271_v30 = vmul.f32 %v3834_v44, %v709_v14 }
 0x1e6   : > { %2174 = vst [vmem:[#allocation2 + $0x6d0] sm:$0xff] %v1918_v61  ;;  %v883_v61 = vld [vmem:[#allocation2 + $0x770] sm:$0xff]  ;;  %v1843_v4 = vadd.f32 %v1587_v49, %v898_v52  ;;  %v1272_v34 = vmul.f32 %v3837_v46, %v710_v18  ;;  %v996_v49 = vld [vmem:[#allocation2 + $0x5a0] sm:$0xff]  ;;  %v633_v18 = vld [vmem:[%s3510_s22 + $0x2b8] sm:$0xff] }
 0x1e7   : > { %2175 = vst [vmem:[#allocation2 + $0x688] sm:$0xff] %v1919_v2  ;;  %v1162_v2 = vmul.f32 %v3841_v48, %v600_v36  ;;  %v1828_v13 = vadd.f32 %v1572_v58, %v883_v61  ;;  %v1829_v17 = vadd.f32 %v1573_v63, %v884_v1  ;;  %v1684_v35 = vmul.f32 %v1467_v10, %v1268_v6  ;;  %v628_v58 = vld [vmem:[%s3510_s22 + $0x290] sm:$0xff]  ;;  %v629_v63 = vld [vmem:[%s3510_s22 + $0x298] sm:$0xff]  ;;  %v1002_v16 = vld [vmem:[#allocation2 + $0x200] sm:$0xff] }
 0x1e8   : > { %2176 = vst [vmem:[#allocation2 + $0x730] sm:$0xff] %v1920_v5  ;;  %v885_v5 = vld [vmem:[#allocation2 + $0x640] sm:$0xff]  ;;  %v1686_v36 = vmul.f32 %v1467_v10, %v1270_v26  ;;  %v1687_v57 = vmul.f32 %v1467_v10, %v1271_v30  ;;  %v1688_v61 = vmul.f32 %v1467_v10, %v1272_v34  ;;  %v1689_v1 = vmul.f32 %v1467_v10, %v1273_v39  ;;  %v632_v6 = vld [vmem:[%s3510_s22 + $0x2b0] sm:$0xff]  ;;  %v619_v30 = vld [vmem:[%s3510_s22 + $0x248] sm:$0xff] }
 0x1e9   : > { %2177 = vst [vmem:[#allocation2 + $0x658] sm:$0xff] %v1921_v11  ;;  %v886_v11 = vld [vmem:[#allocation2 + $0x250] sm:$0xff]  ;;  %v1578_v22 = vmul.f32 %v1397_v23, %v1162_v2  ;;  %v1830_v24 = vadd.f32 %v1574_v59, %v885_v5  ;;  %v1417_v59 = vpop.permute.xlu1 %1416  ;;  %v1000_v5 = vld [vmem:[#allocation2 + $0x7f8] sm:$0xff]  ;;  %v1195_v33 = vmul.f32 %v3848_v54, %v633_v18 }
 0x1ea   : > { %2178 = vst [vmem:[#allocation2 + $0x458] sm:$0xff] %v1922_v15  ;;  %v887_v15 = vld [vmem:[#allocation2 + $0x348] sm:$0xff]  ;;  %v1831_v29 = vadd.f32 %v1575_v8, %v886_v11  ;;  %v1190_v11 = vmul.f32 %v3832_v43, %v628_v58 }
 0x1eb   : > { %2179 = vst [vmem:[#allocation2 + $0x1b8] sm:$0xff] %v1923_v19  ;;  %v1269_v19 = vmul.f32 %v3830_v42, %v707_v3  ;;  %v1834_v45 = vadd.f32 %v1578_v22, %v889_v27  ;;  %v630_v3 = vld [vmem:[%s3510_s22 + $0x2a0] sm:$0xff]  ;;  %v1945_v22 = vadd.f32 %v1689_v1, %v1000_v5  ;;  %v623_v58 = vld [vmem:[%s3510_s22 + $0x268] sm:$0xff]  ;;  %v922_v1 = vld [vmem:[#allocation2 + $0x1d8] sm:$0xff] }
 0x1ec   : > { %2092 = vst [vmem:[#allocation2 + $0x148] sm:$0xff] %v1836_v28  ;;  %v1579_v28 = vmul.f32 %v1397_v23, %v1163_v7  ;;  %v626_v23 = vld [vmem:[%s3510_s22 + $0x280] sm:$0xff]  ;;  %v1185_v9 = vmul.f32 %v3839_v47, %v623_v58 }
 0x1ed   : > { %2093 = vst [vmem:[#allocation2 + $0x3a0] sm:$0xff] %v1837_v32  ;;  %v1832_v32 = vadd.f32 %v1576_v12, %v887_v15  ;;  %v1685_v40 = vmul.f32 %v1467_v10, %v1269_v19  ;;  %v1188_v55 = vmul.f32 %v3828_v41, %v626_v23  ;;  %v1001_v12 = vld [vmem:[#allocation2 + $0x4e0] sm:$0xff]  ;;  %v1191_v15 = vmul.f32 %v3834_v44, %v629_v63 }
 0x1ee   : > { %2094 = vst [vmem:[#allocation2 + $0x4e8] sm:$0xff] %v1838_v38  ;;  %v995_v38 = vld [vmem:[#allocation2 + $0x340] sm:$0xff]  ;;  %v1835_v52 = vadd.f32 %v1579_v28, %v890_v31  ;;  %v1192_v19 = vmul.f32 %v3837_v46, %v630_v3  ;;  %v916_v28 = vld [vmem:[#allocation2 + $0x1a8] sm:$0xff]  ;;  %v625_v3 = vld [vmem:[%s3510_s22 + $0x278] sm:$0xff] }
 0x1ef   : > { %2095 = vst [vmem:[#allocation2 + $0x310] sm:$0xff] %v1839_v50  ;;  %v1274_v50 = vmul.f32 %v3841_v48, %v712_v21  ;;  %v1940_v62 = vadd.f32 %v1684_v35, %v995_v38  ;;  %v1941_v2 = vadd.f32 %v1685_v40, %v996_v49  ;;  %v1604_v20 = vmul.f32 %v1417_v59, %v1188_v55  ;;  %v620_v35 = vld [vmem:[%s3510_s22 + $0x250] sm:$0xff]  ;;  %v621_v40 = vld [vmem:[%s3510_s22 + $0x258] sm:$0xff] }
 0x1f0   : > { %2096 = vst [vmem:[#allocation2 + $0x38] sm:$0xff] %v1840_v53  ;;  %v997_v53 = vld [vmem:[#allocation2 + $0x3d0] sm:$0xff]  ;;  %v1606_v21 = vmul.f32 %v1417_v59, %v1190_v11  ;;  %v1607_v34 = vmul.f32 %v1417_v59, %v1191_v15  ;;  %v1608_v38 = vmul.f32 %v1417_v59, %v1192_v19  ;;  %v1609_v49 = vmul.f32 %v1417_v59, %v1193_v25  ;;  %v731_v15 = vld [vmem:[%s3510_s22 + $0x5c8] sm:$0xff] }
 0x1f1   : > { %2097 = vst [vmem:[#allocation2 + $0x440] sm:$0xff] %v1841_v60  ;;  %v998_v60 = vld [vmem:[#allocation2 + $0x230] sm:$0xff]  ;;  %v1690_v7 = vmul.f32 %v1467_v10, %v1274_v50  ;;  %v1942_v8 = vadd.f32 %v1686_v36, %v997_v53  ;;  %v1412_v36 = vpop.permute.xlu0 %1411  ;;  %v1187_v18 = vmul.f32 %v3848_v54, %v625_v3 }
 0x1f2   : > { %2098 = vst [vmem:[#allocation2 + $0x50] sm:$0xff] %v1842_v0  ;;  %v999_v0 = vld [vmem:[#allocation2 + $0x560] sm:$0xff]  ;;  %v1943_v14 = vadd.f32 %v1687_v57, %v998_v60  ;;  %v920_v53 = vld [vmem:[#allocation2 + $0x610] sm:$0xff]  ;;  %v1182_v60 = vmul.f32 %v3832_v43, %v620_v35  ;;  %v735_v35 = vld [vmem:[%s3510_s22 + $0x5e8] sm:$0xff] }
 0x1f3   : > { %2099 = vst [vmem:[#allocation2 + $0x390] sm:$0xff] %v1843_v4  ;;  %v1189_v4 = vmul.f32 %v3830_v42, %v627_v51  ;;  %v1946_v27 = vadd.f32 %v1690_v7, %v1001_v12  ;;  %v622_v51 = vld [vmem:[%s3510_s22 + $0x260] sm:$0xff]  ;;  %v624_v55 = vld [vmem:[%s3510_s22 + $0x270] sm:$0xff]  ;;  %v1865_v7 = vadd.f32 %v1609_v49, %v920_v53  ;;  %v914_v49 = vld [vmem:[#allocation2 + $0x6d8] sm:$0xff]  ;;  %v1297_v58 = vmul.f32 %v3839_v47, %v735_v35 }
 0x1f4   : > { %2084 = vst [vmem:[#allocation2 + $0x770] sm:$0xff] %v1828_v13  ;;  %v1691_v13 = vmul.f32 %v1467_v10, %v1275_v56  ;;  %v618_v10 = vld [vmem:[%s3510_s22 + $0x240] sm:$0xff] }
 0x1f5   : > { %2085 = vst [vmem:[#allocation2 + $0x520] sm:$0xff] %v1829_v17  ;;  %v1944_v17 = vadd.f32 %v1688_v61, %v999_v0  ;;  %v1605_v26 = vmul.f32 %v1417_v59, %v1189_v4  ;;  %v1180_v23 = vmul.f32 %v3828_v41, %v618_v10  ;;  %v921_v61 = vld [vmem:[#allocation2 + $0x218] sm:$0xff]  ;;  %v1183_v0 = vmul.f32 %v3834_v44, %v621_v40 }
 0x1f6   : > { %2086 = vst [vmem:[#allocation2 + $0x640] sm:$0xff] %v1830_v24  ;;  %v915_v24 = vld [vmem:[#allocation2 + $0x398] sm:$0xff]  ;;  %v1947_v31 = vadd.f32 %v1691_v13, %v1002_v16  ;;  %v1184_v4 = vmul.f32 %v3837_v46, %v622_v51 }
 0x1f7   : > { %2087 = vst [vmem:[#allocation2 + $0x250] sm:$0xff] %v1831_v29  ;;  %v1194_v29 = vmul.f32 %v3841_v48, %v632_v6  ;;  %v1860_v39 = vadd.f32 %v1604_v20, %v915_v24  ;;  %v1861_v50 = vadd.f32 %v1605_v26, %v916_v28  ;;  %v1596_v5 = vmul.f32 %v1412_v36, %v1180_v23  ;;  %v908_v13 = vld [vmem:[#allocation2 + $0x2f8] sm:$0xff]  ;;  %v732_v20 = vld [vmem:[%s3510_s22 + $0x5d0] sm:$0xff] }
 0x1f8   : > { %2088 = vst [vmem:[#allocation2 + $0x348] sm:$0xff] %v1832_v32  ;;  %v917_v32 = vld [vmem:[#allocation2 + $0x698] sm:$0xff]  ;;  %v1598_v6 = vmul.f32 %v1412_v36, %v1182_v60  ;;  %v1599_v19 = vmul.f32 %v1412_v36, %v1183_v0  ;;  %v1600_v24 = vmul.f32 %v1412_v36, %v1184_v4  ;;  %v1601_v28 = vmul.f32 %v1412_v36, %v1185_v9  ;;  %v736_v23 = vld [vmem:[%s3510_s22 + $0x5f0] sm:$0xff]  ;;  %v651_v0 = vld [vmem:[%s3510_s22 + $0x348] sm:$0xff] }
 0x1f9   : > { %2089 = vst [vmem:[#allocation2 + $0x420] sm:$0xff] %v1833_v37  ;;  %v918_v37 = vld [vmem:[#allocation2 + $0x3b8] sm:$0xff]  ;;  %v1610_v56 = vmul.f32 %v1417_v59, %v1194_v29  ;;  %v1862_v57 = vadd.f32 %v1606_v21, %v917_v32  ;;  %v1482_v21 = vpop.permute.xlu2 %1481 }
 0x1fa   : > { %2090 = vst [vmem:[#allocation2 + $0xe0] sm:$0xff] %v1834_v45  ;;  %v919_v45 = vld [vmem:[#allocation2 + $0x5d8] sm:$0xff]  ;;  %v1863_v63 = vadd.f32 %v1607_v34, %v918_v37  ;;  %v1294_v37 = vmul.f32 %v3832_v43, %v732_v20  ;;  %v655_v20 = vld [vmem:[%s3510_s22 + $0x368] sm:$0xff] }
 0x1fb   : > { %2091 = vst [vmem:[#allocation2 + $0x620] sm:$0xff] %v1835_v52  ;;  %v1181_v52 = vmul.f32 %v3830_v42, %v619_v30  ;;  %v1866_v12 = vadd.f32 %v1610_v56, %v921_v61  ;;  %v733_v26 = vld [vmem:[%s3510_s22 + $0x5d8] sm:$0xff]  ;;  %v734_v30 = vld [vmem:[%s3510_s22 + $0x5e0] sm:$0xff]  ;;  %v1217_v35 = vmul.f32 %v3839_v47, %v655_v20 }
 0x1fc   : > { %2196 = vst [vmem:[#allocation2 + $0x340] sm:$0xff] %v1940_v62  ;;  %v1611_v62 = vmul.f32 %v1417_v59, %v1195_v33  ;;  %v730_v59 = vld [vmem:[%s3510_s22 + $0x5c0] sm:$0xff]  ;;  %v912_v32 = vld [vmem:[#allocation2 + $0x598] sm:$0xff] }
 0x1fd   : > { %2197 = vst [vmem:[#allocation2 + $0x5a0] sm:$0xff] %v1941_v2  ;;  %v1864_v2 = vadd.f32 %v1608_v38, %v919_v45  ;;  %v1597_v11 = vmul.f32 %v1412_v36, %v1181_v52  ;;  %v1292_v10 = vmul.f32 %v3828_v41, %v730_v59  ;;  %v913_v38 = vld [vmem:[#allocation2 + $0x7d8] sm:$0xff]  ;;  %v1295_v45 = vmul.f32 %v3834_v44, %v733_v26 }
 0x1fe   : > { %2198 = vst [vmem:[#allocation2 + $0x3d0] sm:$0xff] %v1942_v8  ;;  %v907_v8 = vld [vmem:[#allocation2 + $0x6f0] sm:$0xff]  ;;  %v1867_v16 = vadd.f32 %v1611_v62, %v922_v1  ;;  %v737_v51 = vld [vmem:[%s3510_s22 + $0x5f8] sm:$0xff]  ;;  %v1296_v52 = vmul.f32 %v3837_v46, %v734_v30  ;;  %v1857_v56 = vadd.f32 %v1601_v28, %v912_v32  ;;  %v1026_v28 = vld [vmem:[#allocation2 + $0x408] sm:$0xff] }
 0x1ff   : > { %2199 = vst [vmem:[#allocation2 + $0x230] sm:$0xff] %v1943_v14  ;;  %v1186_v14 = vmul.f32 %v3841_v48, %v624_v55  ;;  %v1852_v25 = vadd.f32 %v1596_v5, %v907_v8  ;;  %v1853_v29 = vadd.f32 %v1597_v11, %v908_v13  ;;  %v1708_v53 = vmul.f32 %v1482_v21, %v1292_v10  ;;  %v1020_v62 = vld [vmem:[#allocation2 + $0x378] sm:$0xff]  ;;  %v652_v5 = vld [vmem:[%s3510_s22 + $0x350] sm:$0xff] }
 0x200   : > { %2200 = vst [vmem:[#allocation2 + $0x560] sm:$0xff] %v1944_v17  ;;  %v909_v17 = vld [vmem:[#allocation2 + $0x758] sm:$0xff]  ;;  %v1710_v55 = vmul.f32 %v1482_v21, %v1294_v37  ;;  %v1299_v3 = vmul.f32 %v3848_v54, %v737_v51  ;;  %v1711_v4 = vmul.f32 %v1482_v21, %v1295_v45  ;;  %v1712_v8 = vmul.f32 %v1482_v21, %v1296_v52  ;;  %v656_v10 = vld [vmem:[%s3510_s22 + $0x370] sm:$0xff]  ;;  %v643_v45 = vld [vmem:[%s3510_s22 + $0x308] sm:$0xff] }
 0x201   : > { %2201 = vst [vmem:[#allocation2 + $0x7f8] sm:$0xff] %v1945_v22  ;;  %v910_v22 = vld [vmem:[#allocation2 + $0x178] sm:$0xff]  ;;  %v1602_v33 = vmul.f32 %v1412_v36, %v1186_v14  ;;  %v1854_v34 = vadd.f32 %v1598_v6, %v909_v17  ;;  %v1713_v13 = vmul.f32 %v1482_v21, %v1297_v58  ;;  %v1432_v6 = vpop.permute.xlu1 %1431  ;;  %v1024_v17 = vld [vmem:[#allocation2 + $0x288] sm:$0xff] }
 0x202   : > { %2202 = vst [vmem:[#allocation2 + $0x4e0] sm:$0xff] %v1946_v27  ;;  %v911_v27 = vld [vmem:[#allocation2 + $0x738] sm:$0xff]  ;;  %v1855_v40 = vadd.f32 %v1599_v19, %v910_v22  ;;  %v1214_v22 = vmul.f32 %v3832_v43, %v652_v5  ;;  %v647_v5 = vld [vmem:[%s3510_s22 + $0x328] sm:$0xff] }
 0x203   : > { %2203 = vst [vmem:[#allocation2 + $0x200] sm:$0xff] %v1947_v31  ;;  %v1293_v31 = vmul.f32 %v3830_v42, %v731_v15  ;;  %v1858_v61 = vadd.f32 %v1602_v33, %v913_v38  ;;  %v653_v11 = vld [vmem:[%s3510_s22 + $0x358] sm:$0xff]  ;;  %v654_v15 = vld [vmem:[%s3510_s22 + $0x360] sm:$0xff]  ;;  %v1969_v33 = vadd.f32 %v1713_v13, %v1024_v17 }
 0x204   : > { %2116 = vst [vmem:[#allocation2 + $0x398] sm:$0xff] %v1860_v39  ;;  %v1603_v39 = vmul.f32 %v1412_v36, %v1187_v18  ;;  %v650_v36 = vld [vmem:[%s3510_s22 + $0x340] sm:$0xff]  ;;  %v657_v30 = vld [vmem:[%s3510_s22 + $0x378] sm:$0xff] }
 0x205   : > { %2117 = vst [vmem:[#allocation2 + $0x1a8] sm:$0xff] %v1861_v50  ;;  %v1856_v50 = vadd.f32 %v1600_v24, %v911_v27  ;;  %v1709_v60 = vmul.f32 %v1482_v21, %v1293_v31  ;;  %v1212_v59 = vmul.f32 %v3828_v41, %v650_v36  ;;  %v1025_v24 = vld [vmem:[#allocation2 + $0x188] sm:$0xff]  ;;  %v1215_v27 = vmul.f32 %v3834_v44, %v653_v11  ;;  %v946_v13 = vld [vmem:[#allocation2 + $0x158] sm:$0xff] }
 0x206   : > { %2118 = vst [vmem:[#allocation2 + $0x698] sm:$0xff] %v1862_v57  ;;  %v1019_v57 = vld [vmem:[#allocation2 + $0x798] sm:$0xff]  ;;  %v1859_v1 = vadd.f32 %v1603_v39, %v914_v49  ;;  %v1216_v31 = vmul.f32 %v3837_v46, %v654_v15  ;;  %v1219_v51 = vmul.f32 %v3848_v54, %v657_v30 }
 0x207   : > { %2119 = vst [vmem:[#allocation2 + $0x3b8] sm:$0xff] %v1863_v63  ;;  %v1298_v63 = vmul.f32 %v3841_v48, %v736_v23  ;;  %v1964_v9 = vadd.f32 %v1708_v53, %v1019_v57  ;;  %v1965_v14 = vadd.f32 %v1709_v60, %v1020_v62  ;;  %v1628_v32 = vmul.f32 %v1432_v6, %v1212_v59  ;;  %v940_v39 = vld [vmem:[#allocation2 + $0x198] sm:$0xff]  ;;  %v644_v53 = vld [vmem:[%s3510_s22 + $0x310] sm:$0xff] }
 0x208   : > { %2120 = vst [vmem:[#allocation2 + $0x5d8] sm:$0xff] %v1864_v2  ;;  %v1021_v2 = vld [vmem:[#allocation2 + $0x160] sm:$0xff]  ;;  %v1630_v23 = vmul.f32 %v1432_v6, %v1214_v22  ;;  %v1631_v52 = vmul.f32 %v1432_v6, %v1215_v27  ;;  %v1632_v57 = vmul.f32 %v1432_v6, %v1216_v31  ;;  %v645_v60 = vld [vmem:[%s3510_s22 + $0x318] sm:$0xff]  ;;  %v1633_v62 = vmul.f32 %v1432_v6, %v1217_v35  ;;  %v648_v59 = vld [vmem:[%s3510_s22 + $0x330] sm:$0xff] }
 0x209   : > { %2121 = vst [vmem:[#allocation2 + $0x610] sm:$0xff] %v1865_v7  ;;  %v1022_v7 = vld [vmem:[#allocation2 + $0x260] sm:$0xff]  ;;  %v1714_v18 = vmul.f32 %v1482_v21, %v1298_v63  ;;  %v1966_v19 = vadd.f32 %v1710_v55, %v1021_v2  ;;  %v1427_v55 = vpop.permute.xlu0 %1426  ;;  %v944_v2 = vld [vmem:[#allocation2 + $0xb0] sm:$0xff]  ;;  %v649_v15 = vld [vmem:[%s3510_s22 + $0x338] sm:$0xff] }
 0x20a   : > { %2122 = vst [vmem:[#allocation2 + $0x218] sm:$0xff] %v1866_v12  ;;  %v1023_v12 = vld [vmem:[#allocation2 + $0x728] sm:$0xff]  ;;  %v1967_v26 = vadd.f32 %v1711_v4, %v1022_v7  ;;  %v1206_v7 = vmul.f32 %v3832_v43, %v644_v53  ;;  %v754_v22 = vld [vmem:[%s3510_s22 + $0x680] sm:$0xff]  ;;  %v1211_v30 = vmul.f32 %v3848_v54, %v649_v15 }
 0x20b   : > { %2123 = vst [vmem:[#allocation2 + $0x1d8] sm:$0xff] %v1867_v16  ;;  %v1213_v16 = vmul.f32 %v3830_v42, %v651_v0  ;;  %v1970_v38 = vadd.f32 %v1714_v18, %v1025_v24  ;;  %v646_v0 = vld [vmem:[%s3510_s22 + $0x320] sm:$0xff]  ;;  %v1889_v18 = vadd.f32 %v1633_v62, %v944_v2  ;;  %v755_v27 = vld [vmem:[%s3510_s22 + $0x688] sm:$0xff] }
 0x20c   : > { %2108 = vst [vmem:[#allocation2 + $0x6f0] sm:$0xff] %v1852_v25  ;;  %v1715_v25 = vmul.f32 %v1482_v21, %v1299_v3  ;;  %v642_v21 = vld [vmem:[%s3510_s22 + $0x300] sm:$0xff]  ;;  %v759_v53 = vld [vmem:[%s3510_s22 + $0x6a8] sm:$0xff] }
 0x20d   : > { %2109 = vst [vmem:[#allocation2 + $0x2f8] sm:$0xff] %v1853_v29  ;;  %v1968_v29 = vadd.f32 %v1712_v8, %v1023_v12  ;;  %v1629_v37 = vmul.f32 %v1432_v6, %v1213_v16  ;;  %v1204_v36 = vmul.f32 %v3828_v41, %v642_v21  ;;  %v945_v8 = vld [vmem:[#allocation2 + $0x630] sm:$0xff]  ;;  %v1207_v12 = vmul.f32 %v3834_v44, %v645_v60  ;;  %v938_v62 = vld [vmem:[#allocation2 + $0x648] sm:$0xff] }
 0x20e   : > { %2110 = vst [vmem:[#allocation2 + $0x758] sm:$0xff] %v1854_v34  ;;  %v939_v34 = vld [vmem:[#allocation2 + $0x58] sm:$0xff]  ;;  %v1971_v49 = vadd.f32 %v1715_v25, %v1026_v28  ;;  %v1208_v16 = vmul.f32 %v3837_v46, %v646_v0  ;;  %v932_v25 = vld [vmem:[#allocation2 + $0x7f0] sm:$0xff]  ;;  %v1316_v21 = vmul.f32 %v3828_v41, %v754_v22 }
 0x20f   : > { %2111 = vst [vmem:[#allocation2 + $0x178] sm:$0xff] %v1855_v40  ;;  %v1218_v40 = vmul.f32 %v3841_v48, %v656_v10  ;;  %v1884_v58 = vadd.f32 %v1628_v32, %v939_v34  ;;  %v1885_v63 = vadd.f32 %v1629_v37, %v940_v39  ;;  %v1620_v17 = vmul.f32 %v1427_v55, %v1204_v36  ;;  %v756_v32 = vld [vmem:[%s3510_s22 + $0x690] sm:$0xff]  ;;  %v757_v37 = vld [vmem:[%s3510_s22 + $0x698] sm:$0xff] }
 0x210   : > { %2112 = vst [vmem:[#allocation2 + $0x738] sm:$0xff] %v1856_v50  ;;  %v941_v50 = vld [vmem:[#allocation2 + $0x68] sm:$0xff]  ;;  %v1622_v10 = vmul.f32 %v1427_v55, %v1206_v7  ;;  %v1623_v31 = vmul.f32 %v1427_v55, %v1207_v12  ;;  %v1624_v34 = vmul.f32 %v1427_v55, %v1208_v16  ;;  %v760_v36 = vld [vmem:[%s3510_s22 + $0x6b0] sm:$0xff]  ;;  %v761_v0 = vld [vmem:[%s3510_s22 + $0x6b8] sm:$0xff] }
 0x211   : > { %2113 = vst [vmem:[#allocation2 + $0x598] sm:$0xff] %v1857_v56  ;;  %v942_v56 = vld [vmem:[#allocation2 + $0x600] sm:$0xff]  ;;  %v1634_v3 = vmul.f32 %v1432_v6, %v1218_v40  ;;  %v1886_v4 = vadd.f32 %v1630_v23, %v941_v50  ;;  %v1497_v23 = vpop.permute.xlu2 %1496  ;;  %v675_v12 = vld [vmem:[%s3510_s22 + $0x408] sm:$0xff]  ;;  %v1323_v15 = vmul.f32 %v3848_v54, %v761_v0 }
 0x212   : > { %2114 = vst [vmem:[#allocation2 + $0x7d8] sm:$0xff] %v1858_v61  ;;  %v943_v61 = vld [vmem:[#allocation2 + $0x3a8] sm:$0xff]  ;;  %v1887_v11 = vadd.f32 %v1631_v52, %v942_v56  ;;  %v936_v50 = vld [vmem:[#allocation2 + $0x540] sm:$0xff]  ;;  %v1318_v56 = vmul.f32 %v3832_v43, %v756_v32  ;;  %v1732_v2 = vmul.f32 %v1497_v23, %v1316_v21  ;;  %v680_v21 = vld [vmem:[%s3510_s22 + $0x430] sm:$0xff] }
 0x213   : > { %2115 = vst [vmem:[#allocation2 + $0x6d8] sm:$0xff] %v1859_v1  ;;  %v1205_v1 = vmul.f32 %v3830_v42, %v643_v45  ;;  %v1890_v24 = vadd.f32 %v1634_v3, %v945_v8  ;;  %v758_v45 = vld [vmem:[%s3510_s22 + $0x6a0] sm:$0xff]  ;;  %v679_v32 = vld [vmem:[%s3510_s22 + $0x428] sm:$0xff] }
 0x214   : > { %2220 = vst [vmem:[#allocation2 + $0x798] sm:$0xff] %v1964_v9  ;;  %v1635_v9 = vmul.f32 %v1432_v6, %v1219_v51  ;;  %v1209_v6 = vmul.f32 %v3839_v47, %v647_v5  ;;  %v1321_v5 = vmul.f32 %v3839_v47, %v759_v53  ;;  %v1241_v53 = vmul.f32 %v3839_v47, %v679_v32 }
 0x215   : > { %2221 = vst [vmem:[#allocation2 + $0x378] sm:$0xff] %v1965_v14  ;;  %v1888_v14 = vadd.f32 %v1632_v57, %v943_v61  ;;  %v1621_v20 = vmul.f32 %v1427_v55, %v1205_v1  ;;  %v937_v57 = vld [vmem:[#allocation2 + $0x588] sm:$0xff]  ;;  %v1319_v61 = vmul.f32 %v3834_v44, %v757_v37  ;;  %v1320_v1 = vmul.f32 %v3837_v46, %v758_v45  ;;  %v681_v45 = vld [vmem:[%s3510_s22 + $0x438] sm:$0xff] }
 0x216   : > { %2222 = vst [vmem:[#allocation2 + $0x160] sm:$0xff] %v1966_v19  ;;  %v931_v19 = vld [vmem:[#allocation2 + $0x418] sm:$0xff]  ;;  %v1891_v28 = vadd.f32 %v1635_v9, %v946_v13  ;;  %v1625_v39 = vmul.f32 %v1427_v55, %v1209_v6  ;;  %v1044_v9 = vld [vmem:[#allocation2 + $0x6b0] sm:$0xff]  ;;  %v1243_v0 = vmul.f32 %v3848_v54, %v681_v45 }
 0x217   : > { %2223 = vst [vmem:[#allocation2 + $0x260] sm:$0xff] %v1967_v26  ;;  %v1210_v26 = vmul.f32 %v3841_v48, %v648_v59  ;;  %v1876_v35 = vadd.f32 %v1620_v17, %v931_v19  ;;  %v1877_v40 = vadd.f32 %v1621_v20, %v932_v25  ;;  %v1734_v59 = vmul.f32 %v1497_v23, %v1318_v56  ;;  %v676_v17 = vld [vmem:[%s3510_s22 + $0x410] sm:$0xff]  ;;  %v677_v20 = vld [vmem:[%s3510_s22 + $0x418] sm:$0xff] }
 0x218   : > { %2224 = vst [vmem:[#allocation2 + $0x728] sm:$0xff] %v1968_v29  ;;  %v933_v29 = vld [vmem:[#allocation2 + $0x4b0] sm:$0xff]  ;;  %v1881_v3 = vadd.f32 %v1625_v39, %v936_v50  ;;  %v1735_v16 = vmul.f32 %v1497_v23, %v1319_v61  ;;  %v1736_v19 = vmul.f32 %v1497_v23, %v1320_v1  ;;  %v1737_v25 = vmul.f32 %v1497_v23, %v1321_v5  ;;  %v1050_v39 = vld [vmem:[#allocation2 + $0x500] sm:$0xff]  ;;  %v667_v61 = vld [vmem:[%s3510_s22 + $0x3c8] sm:$0xff] }
 0x219   : > { %2225 = vst [vmem:[#allocation2 + $0x288] sm:$0xff] %v1969_v33  ;;  %v934_v33 = vld [vmem:[#allocation2 + $0x318] sm:$0xff]  ;;  %v1626_v51 = vmul.f32 %v1427_v55, %v1210_v26  ;;  %v1878_v52 = vadd.f32 %v1622_v10, %v933_v29  ;;  %v1447_v10 = vpop.permute.xlu1 %1446  ;;  %v1048_v29 = vld [vmem:[#allocation2 + $0x490] sm:$0xff] }
 0x21a   : > { %2226 = vst [vmem:[#allocation2 + $0x188] sm:$0xff] %v1970_v38  ;;  %v935_v38 = vld [vmem:[#allocation2 + $0x90] sm:$0xff]  ;;  %v1879_v60 = vadd.f32 %v1623_v31, %v934_v33  ;;  %v1238_v33 = vmul.f32 %v3832_v43, %v676_v17  ;;  %v671_v17 = vld [vmem:[%s3510_s22 + $0x3e8] sm:$0xff] }
 0x21b   : > { %2227 = vst [vmem:[#allocation2 + $0x408] sm:$0xff] %v1971_v49  ;;  %v1317_v49 = vmul.f32 %v3830_v42, %v755_v27  ;;  %v1882_v8 = vadd.f32 %v1626_v51, %v937_v57  ;;  %v678_v27 = vld [vmem:[%s3510_s22 + $0x420] sm:$0xff]  ;;  %v1993_v51 = vadd.f32 %v1737_v25, %v1048_v29  ;;  %v1233_v32 = vmul.f32 %v3839_v47, %v671_v17 }
 0x21c   : > { %2140 = vst [vmem:[#allocation2 + $0x58] sm:$0xff] %v1884_v58  ;;  %v1627_v58 = vmul.f32 %v1427_v55, %v1211_v30  ;;  %v674_v55 = vld [vmem:[%s3510_s22 + $0x400] sm:$0xff] }
 0x21d   : > { %2141 = vst [vmem:[#allocation2 + $0x198] sm:$0xff] %v1885_v63  ;;  %v1880_v63 = vadd.f32 %v1624_v34, %v935_v38  ;;  %v1733_v7 = vmul.f32 %v1497_v23, %v1317_v49  ;;  %v1236_v22 = vmul.f32 %v3828_v41, %v674_v55  ;;  %v1049_v34 = vld [vmem:[#allocation2 + $0x570] sm:$0xff]  ;;  %v1239_v38 = vmul.f32 %v3834_v44, %v677_v20  ;;  %v970_v25 = vld [vmem:[#allocation2 + $0x6a0] sm:$0xff] }
 0x21e   : > { %2142 = vst [vmem:[#allocation2 + $0x68] sm:$0xff] %v1886_v4  ;;  %v1043_v4 = vld [vmem:[#allocation2 + $0x6e8] sm:$0xff]  ;;  %v1883_v13 = vadd.f32 %v1627_v58, %v938_v62  ;;  %v1240_v49 = vmul.f32 %v3837_v46, %v678_v27  ;;  %v673_v27 = vld [vmem:[%s3510_s22 + $0x3f8] sm:$0xff] }
 0x21f   : > { %2143 = vst [vmem:[#allocation2 + $0x600] sm:$0xff] %v1887_v11  ;;  %v1322_v11 = vmul.f32 %v3841_v48, %v760_v36  ;;  %v1988_v6 = vadd.f32 %v1732_v2, %v1043_v4  ;;  %v1989_v26 = vadd.f32 %v1733_v7, %v1044_v9  ;;  %v1652_v50 = vmul.f32 %v1447_v10, %v1236_v22  ;;  %v964_v58 = vld [vmem:[#allocation2 + $0x5c8] sm:$0xff]  ;;  %v668_v2 = vld [vmem:[%s3510_s22 + $0x3d0] sm:$0xff]  ;;  %v669_v7 = vld [vmem:[%s3510_s22 + $0x3d8] sm:$0xff] }
 0x220   : > { %2144 = vst [vmem:[#allocation2 + $0x3a8] sm:$0xff] %v1888_v14  ;;  %v1045_v14 = vld [vmem:[#allocation2 + $0x300] sm:$0xff]  ;;  %v1654_v36 = vmul.f32 %v1447_v10, %v1238_v33  ;;  %v1655_v1 = vmul.f32 %v1447_v10, %v1239_v38  ;;  %v1656_v4 = vmul.f32 %v1447_v10, %v1240_v49  ;;  %v1657_v9 = vmul.f32 %v1447_v10, %v1241_v53  ;;  %v672_v22 = vld [vmem:[%s3510_s22 + $0x3f0] sm:$0xff]  ;;  %v779_v38 = vld [vmem:[%s3510_s22 + $0x748] sm:$0xff] }
 0x221   : > { %2145 = vst [vmem:[#allocation2 + $0xb0] sm:$0xff] %v1889_v18  ;;  %v1046_v18 = vld [vmem:[#allocation2 + $0x108] sm:$0xff]  ;;  %v1738_v30 = vmul.f32 %v1497_v23, %v1322_v11  ;;  %v1990_v31 = vadd.f32 %v1734_v59, %v1045_v14  ;;  %v1442_v59 = vpop.permute.xlu0 %1441  ;;  %v968_v14 = vld [vmem:[#allocation2 + $0xf8] sm:$0xff]  ;;  %v1235_v45 = vmul.f32 %v3848_v54, %v673_v27 }
 0x222   : > { %2146 = vst [vmem:[#allocation2 + $0x630] sm:$0xff] %v1890_v24  ;;  %v1047_v24 = vld [vmem:[#allocation2 + $0x180] sm:$0xff]  ;;  %v1991_v37 = vadd.f32 %v1735_v16, %v1046_v18  ;;  %v1230_v18 = vmul.f32 %v3832_v43, %v668_v2  ;;  %v783_v2 = vld [vmem:[%s3510_s22 + $0x768] sm:$0xff] }
 0x223   : > { %2147 = vst [vmem:[#allocation2 + $0x158] sm:$0xff] %v1891_v28  ;;  %v1237_v28 = vmul.f32 %v3830_v42, %v675_v12  ;;  %v1994_v57 = vadd.f32 %v1738_v30, %v1049_v34  ;;  %v670_v12 = vld [vmem:[%s3510_s22 + $0x3e0] sm:$0xff]  ;;  %v1913_v30 = vadd.f32 %v1657_v9, %v968_v14  ;;  %v962_v9 = vld [vmem:[#allocation2 + $0x268] sm:$0xff]  ;;  %v1345_v17 = vmul.f32 %v3839_v47, %v783_v2 }
 0x224   : > { %2132 = vst [vmem:[#allocation2 + $0x418] sm:$0xff] %v1876_v35  ;;  %v1739_v35 = vmul.f32 %v1497_v23, %v1323_v15  ;;  %v666_v23 = vld [vmem:[%s3510_s22 + $0x3c0] sm:$0xff] }
 0x225   : > { %2133 = vst [vmem:[#allocation2 + $0x7f0] sm:$0xff] %v1877_v40  ;;  %v1992_v40 = vadd.f32 %v1736_v19, %v1047_v24  ;;  %v1653_v56 = vmul.f32 %v1447_v10, %v1237_v28  ;;  %v1228_v55 = vmul.f32 %v3828_v41, %v666_v23  ;;  %v969_v19 = vld [vmem:[#allocation2 + $0x488] sm:$0xff]  ;;  %v1231_v24 = vmul.f32 %v3834_v44, %v669_v7 }
 0x226   : > { %2134 = vst [vmem:[#allocation2 + $0x4b0] sm:$0xff] %v1878_v52  ;;  %v963_v52 = vld [vmem:[#allocation2 + $0x4a8] sm:$0xff]  ;;  %v1995_v62 = vadd.f32 %v1739_v35, %v1050_v39  ;;  %v1232_v28 = vmul.f32 %v3837_v46, %v670_v12  ;;  %v785_v12 = vld [vmem:[%s3510_s22 + $0x778] sm:$0xff] }
 0x227   : > { %2135 = vst [vmem:[#allocation2 + $0x318] sm:$0xff] %v1879_v60  ;;  %v1242_v60 = vmul.f32 %v3841_v48, %v680_v21  ;;  %v1908_v5 = vadd.f32 %v1652_v50, %v963_v52  ;;  %v1909_v11 = vadd.f32 %v1653_v56, %v964_v58  ;;  %v1644_v29 = vmul.f32 %v1442_v59, %v1228_v55  ;;  %v956_v35 = vld [vmem:[#allocation2 + $0x128] sm:$0xff]  ;;  %v780_v50 = vld [vmem:[%s3510_s22 + $0x750] sm:$0xff]  ;;  %v781_v56 = vld [vmem:[%s3510_s22 + $0x758] sm:$0xff] }
 0x228   : > { %2136 = vst [vmem:[#allocation2 + $0x90] sm:$0xff] %v1880_v63  ;;  %v965_v63 = vld [vmem:[#allocation2 + $0x438] sm:$0xff]  ;;  %v1646_v21 = vmul.f32 %v1442_v59, %v1230_v18  ;;  %v1647_v49 = vmul.f32 %v1442_v59, %v1231_v24  ;;  %v1648_v52 = vmul.f32 %v1442_v59, %v1232_v28  ;;  %v1649_v58 = vmul.f32 %v1442_v59, %v1233_v32  ;;  %v784_v55 = vld [vmem:[%s3510_s22 + $0x770] sm:$0xff]  ;;  %v699_v24 = vld [vmem:[%s3510_s22 + $0x4c8] sm:$0xff] }
 0x229   : > { %2137 = vst [vmem:[#allocation2 + $0x540] sm:$0xff] %v1881_v3  ;;  %v966_v3 = vld [vmem:[#allocation2 + $0x350] sm:$0xff]  ;;  %v1658_v15 = vmul.f32 %v1447_v10, %v1242_v60  ;;  %v1910_v16 = vadd.f32 %v1654_v36, %v965_v63  ;;  %v1512_v36 = vpop.permute.xlu2 %1511  ;;  %v960_v63 = vld [vmem:[#allocation2 + $0x240] sm:$0xff]  ;;  %v1347_v27 = vmul.f32 %v3848_v54, %v785_v12 }
 0x22a   : > { %2138 = vst [vmem:[#allocation2 + $0x588] sm:$0xff] %v1882_v8  ;;  %v967_v8 = vld [vmem:[#allocation2 + $0x2c8] sm:$0xff]  ;;  %v1911_v20 = vadd.f32 %v1655_v1, %v966_v3  ;;  %v1342_v3 = vmul.f32 %v3832_v43, %v780_v50 }
 0x22b   : > { %2139 = vst [vmem:[#allocation2 + $0x648] sm:$0xff] %v1883_v13  ;;  %v1229_v13 = vmul.f32 %v3830_v42, %v667_v61  ;;  %v1914_v34 = vadd.f32 %v1658_v15, %v969_v19  ;;  %v782_v61 = vld [vmem:[%s3510_s22 + $0x760] sm:$0xff]  ;;  %v1905_v15 = vadd.f32 %v1649_v58, %v960_v63  ;;  %v703_v50 = vld [vmem:[%s3510_s22 + $0x4e8] sm:$0xff]  ;;  %v1074_v58 = vld [vmem:[#allocation2 + $0x1f0] sm:$0xff] }
 0x22c   : > { %2244 = vst [vmem:[#allocation2 + $0x6e8] sm:$0xff] %v1988_v6  ;;  %v1659_v6 = vmul.f32 %v1447_v10, %v1243_v0  ;;  %v778_v10 = vld [vmem:[%s3510_s22 + $0x740] sm:$0xff]  ;;  %v1265_v2 = vmul.f32 %v3839_v47, %v703_v50 }
 0x22d   : > { %2245 = vst [vmem:[#allocation2 + $0x6b0] sm:$0xff] %v1989_v26  ;;  %v1912_v26 = vadd.f32 %v1656_v4, %v967_v8  ;;  %v1645_v33 = vmul.f32 %v1442_v59, %v1229_v13  ;;  %v1340_v23 = vmul.f32 %v3828_v41, %v778_v10  ;;  %v961_v4 = vld [vmem:[#allocation2 + $0x118] sm:$0xff]  ;;  %v1343_v8 = vmul.f32 %v3834_v44, %v781_v56 }
 0x22e   : > { %2246 = vst [vmem:[#allocation2 + $0x300] sm:$0xff] %v1990_v31  ;;  %v955_v31 = vld [vmem:[#allocation2 + $0x30] sm:$0xff]  ;;  %v1915_v39 = vadd.f32 %v1659_v6, %v970_v25  ;;  %v1344_v13 = vmul.f32 %v3837_v46, %v782_v61  ;;  %v705_v61 = vld [vmem:[%s3510_s22 + $0x4f8] sm:$0xff] }
 0x22f   : > { %2247 = vst [vmem:[#allocation2 + $0x108] sm:$0xff] %v1991_v37  ;;  %v1234_v37 = vmul.f32 %v3841_v48, %v672_v22  ;;  %v1900_v53 = vadd.f32 %v1644_v29, %v955_v31  ;;  %v1901_v60 = vadd.f32 %v1645_v33, %v956_v35  ;;  %v1756_v14 = vmul.f32 %v1512_v36, %v1340_v23  ;;  %v1068_v6 = vld [vmem:[#allocation2 + $0x430] sm:$0xff]  ;;  %v701_v33 = vld [vmem:[%s3510_s22 + $0x4d8] sm:$0xff] }
 0x230   : > { %2248 = vst [vmem:[#allocation2 + $0x180] sm:$0xff] %v1992_v40  ;;  %v957_v40 = vld [vmem:[#allocation2 + $0x1a0] sm:$0xff]  ;;  %v1758_v22 = vmul.f32 %v1512_v36, %v1342_v3  ;;  %v1759_v28 = vmul.f32 %v1512_v36, %v1343_v8  ;;  %v700_v29 = vld [vmem:[%s3510_s22 + $0x4d0] sm:$0xff]  ;;  %v1760_v31 = vmul.f32 %v1512_v36, %v1344_v13  ;;  %v1761_v35 = vmul.f32 %v1512_v36, %v1345_v17  ;;  %v691_v8 = vld [vmem:[%s3510_s22 + $0x488] sm:$0xff] }
 0x231   : > { %2249 = vst [vmem:[#allocation2 + $0x490] sm:$0xff] %v1993_v51  ;;  %v958_v51 = vld [vmem:[#allocation2 + $0x5f0] sm:$0xff]  ;;  %v1650_v0 = vmul.f32 %v1442_v59, %v1234_v37  ;;  %v1902_v1 = vadd.f32 %v1646_v21, %v957_v40  ;;  %v1462_v21 = vpop.permute.xlu1 %1461  ;;  %v1072_v40 = vld [vmem:[#allocation2 + $0x4b8] sm:$0xff]  ;;  %v1267_v12 = vmul.f32 %v3848_v54, %v705_v61 }
 0x232   : > { %2250 = vst [vmem:[#allocation2 + $0x570] sm:$0xff] %v1994_v57  ;;  %v959_v57 = vld [vmem:[#allocation2 + $0x670] sm:$0xff]  ;;  %v1903_v7 = vadd.f32 %v1647_v49, %v958_v51  ;;  %v1262_v51 = vmul.f32 %v3832_v43, %v700_v29  ;;  %v695_v29 = vld [vmem:[%s3510_s22 + $0x4a8] sm:$0xff] }
 0x233   : > { %2251 = vst [vmem:[#allocation2 + $0x500] sm:$0xff] %v1995_v62  ;;  %v1341_v62 = vmul.f32 %v3830_v42, %v779_v38  ;;  %v1906_v19 = vadd.f32 %v1650_v0, %v961_v4  ;;  %v702_v38 = vld [vmem:[%s3510_s22 + $0x4e0] sm:$0xff]  ;;  %v704_v23 = vld [vmem:[%s3510_s22 + $0x4f0] sm:$0xff]  ;;  %v2017_v0 = vadd.f32 %v1761_v35, %v1072_v40  ;;  %v1257_v50 = vmul.f32 %v3839_v47, %v695_v29 }
 0x234   : > { %2164 = vst [vmem:[#allocation2 + $0x4a8] sm:$0xff] %v1908_v5  ;;  %v1651_v5 = vmul.f32 %v1442_v59, %v1235_v45  ;;  %v698_v59 = vld [vmem:[%s3510_s22 + $0x4c0] sm:$0xff] }
 0x235   : > { %2165 = vst [vmem:[#allocation2 + $0x5c8] sm:$0xff] %v1909_v11  ;;  %v1904_v11 = vadd.f32 %v1648_v52, %v959_v57  ;;  %v1757_v18 = vmul.f32 %v1512_v36, %v1341_v62  ;;  %v1260_v10 = vmul.f32 %v3828_v41, %v698_v59  ;;  %v1073_v52 = vld [vmem:[#allocation2 + $0x298] sm:$0xff]  ;;  %v1263_v57 = vmul.f32 %v3834_v44, %v701_v33  ;;  %v994_v35 = vld [vmem:[#allocation2 + $0x700] sm:$0xff] }
 0x236   : > { %2166 = vst [vmem:[#allocation2 + $0x438] sm:$0xff] %v1910_v16  ;;  %v1067_v16 = vld [vmem:[#allocation2 + $0x7c8] sm:$0xff]  ;;  %v1907_v25 = vadd.f32 %v1651_v5, %v962_v9  ;;  %v1264_v62 = vmul.f32 %v3837_v46, %v702_v38  ;;  %v988_v5 = vld [vmem:[#allocation2 + $0x778] sm:$0xff] }
 0x237   : > { %2167 = vst [vmem:[#allocation2 + $0x350] sm:$0xff] %v1911_v20  ;;  %v1346_v20 = vmul.f32 %v3841_v48, %v784_v55  ;;  %v2012_v32 = vadd.f32 %v1756_v14, %v1067_v16  ;;  %v2013_v37 = vadd.f32 %v1757_v18, %v1068_v6  ;;  %v1676_v63 = vmul.f32 %v1462_v21, %v1260_v10  ;;  %v692_v14 = vld [vmem:[%s3510_s22 + $0x490] sm:$0xff]  ;;  %v693_v18 = vld [vmem:[%s3510_s22 + $0x498] sm:$0xff] }
 0x238   : > { %2168 = vst [vmem:[#allocation2 + $0x2c8] sm:$0xff] %v1912_v26  ;;  %v1069_v26 = vld [vmem:[#allocation2 + $0x578] sm:$0xff]  ;;  %v1678_v55 = vmul.f32 %v1462_v21, %v1262_v51  ;;  %v1679_v13 = vmul.f32 %v1462_v21, %v1263_v57  ;;  %v1680_v16 = vmul.f32 %v1462_v21, %v1264_v62  ;;  %v1681_v6 = vmul.f32 %v1462_v21, %v1265_v2  ;;  %v696_v10 = vld [vmem:[%s3510_s22 + $0x4b0] sm:$0xff]  ;;  %v723_v57 = vld [vmem:[%s3510_s22 + $0x588] sm:$0xff] }
 0x239   : > { %2169 = vst [vmem:[#allocation2 + $0xf8] sm:$0xff] %v1913_v30  ;;  %v1070_v30 = vld [vmem:[#allocation2 + $0x608] sm:$0xff]  ;;  %v1762_v45 = vmul.f32 %v1512_v36, %v1346_v20  ;;  %v2014_v49 = vadd.f32 %v1758_v22, %v1069_v26  ;;  %v1457_v22 = vpop.permute.xlu0 %1456  ;;  %v992_v26 = vld [vmem:[#allocation2 + $0x660] sm:$0xff]  ;;  %v697_v38 = vld [vmem:[%s3510_s22 + $0x4b8] sm:$0xff] }
 0x23a   : > { %2170 = vst [vmem:[#allocation2 + $0x488] sm:$0xff] %v1914_v34  ;;  %v1071_v34 = vld [vmem:[#allocation2 + $0x638] sm:$0xff]  ;;  %v2015_v56 = vadd.f32 %v1759_v28, %v1070_v30  ;;  %v1254_v30 = vmul.f32 %v3832_v43, %v692_v14  ;;  %v1259_v61 = vmul.f32 %v3848_v54, %v697_v38  ;;  %v727_v14 = vld [vmem:[%s3510_s22 + $0x5a8] sm:$0xff] }
 0x23b   : > { %2171 = vst [vmem:[#allocation2 + $0x6a0] sm:$0xff] %v1915_v39  ;;  %v1261_v39 = vmul.f32 %v3830_v42, %v699_v24  ;;  %v2018_v4 = vadd.f32 %v1762_v45, %v1073_v52  ;;  %v694_v24 = vld [vmem:[%s3510_s22 + $0x4a0] sm:$0xff]  ;;  %v1937_v45 = vadd.f32 %v1681_v6, %v992_v26  ;;  %v1289_v29 = vmul.f32 %v3839_v47, %v727_v14 }
 0x23c   : > { %2156 = vst [vmem:[#allocation2 + $0x30] sm:$0xff] %v1900_v53  ;;  %v1763_v53 = vmul.f32 %v1512_v36, %v1347_v27  ;;  %v690_v36 = vld [vmem:[%s3510_s22 + $0x480] sm:$0xff] }
 0x23d   : > { %2157 = vst [vmem:[#allocation2 + $0x128] sm:$0xff] %v1901_v60  ;;  %v2016_v60 = vadd.f32 %v1760_v31, %v1071_v34  ;;  %v1677_v3 = vmul.f32 %v1462_v21, %v1261_v39  ;;  %v1252_v59 = vmul.f32 %v3828_v41, %v690_v36  ;;  %v993_v31 = vld [vmem:[#allocation2 + $0x358] sm:$0xff]  ;;  %v1255_v34 = vmul.f32 %v3834_v44, %v693_v18  ;;  %v986_v6 = vld [vmem:[#allocation2 + $0x2a0] sm:$0xff] }
 0x23e   : > { %2158 = vst [vmem:[#allocation2 + $0x1a0] sm:$0xff] %v1902_v1  ;;  %v987_v1 = vld [vmem:[#allocation2 + $0x10] sm:$0xff]  ;;  %v2019_v9 = vadd.f32 %v1763_v53, %v1074_v58  ;;  %v1256_v39 = vmul.f32 %v3837_v46, %v694_v24  ;;  %v729_v24 = vld [vmem:[%s3510_s22 + $0x5b8] sm:$0xff] }
 0x23f   : > { %2159 = vst [vmem:[#allocation2 + $0x5f0] sm:$0xff] %v1903_v7  ;;  %v1266_v7 = vmul.f32 %v3841_v48, %v704_v23  ;;  %v1932_v17 = vadd.f32 %v1676_v63, %v987_v1  ;;  %v1933_v20 = vadd.f32 %v1677_v3, %v988_v5  ;;  %v1668_v40 = vmul.f32 %v1457_v22, %v1252_v59  ;;  %v980_v53 = vld [vmem:[#allocation2 + $0x4f0] sm:$0xff]  ;;  %v725_v3 = vld [vmem:[%s3510_s22 + $0x598] sm:$0xff] }
 0x240   : > { %2160 = vst [vmem:[#allocation2 + $0x670] sm:$0xff] %v1904_v11  ;;  %v989_v11 = vld [vmem:[#allocation2 + $0x7a8] sm:$0xff]  ;;  %v1670_v23 = vmul.f32 %v1457_v22, %v1254_v30  ;;  %v1671_v62 = vmul.f32 %v1457_v22, %v1255_v34  ;;  %v724_v63 = vld [vmem:[%s3510_s22 + $0x590] sm:$0xff]  ;;  %v1672_v1 = vmul.f32 %v1457_v22, %v1256_v39  ;;  %v1673_v5 = vmul.f32 %v1457_v22, %v1257_v50 }
 0x241   : > { %2161 = vst [vmem:[#allocation2 + $0x240] sm:$0xff] %v1905_v15  ;;  %v990_v15 = vld [vmem:[#allocation2 + $0x530] sm:$0xff]  ;;  %v1682_v27 = vmul.f32 %v1462_v21, %v1266_v7  ;;  %v1934_v28 = vadd.f32 %v1678_v55, %v989_v11  ;;  %v1477_v55 = vpop.permute.xlu1 %1476  ;;  %v984_v11 = vld [vmem:[#allocation2 + $0x4f8] sm:$0xff]  ;;  %v715_v34 = vld [vmem:[%s3510_s22 + $0x548] sm:$0xff]  ;;  %v1291_v38 = vmul.f32 %v3848_v54, %v729_v24 }
 0x242   : > { %2162 = vst [vmem:[#allocation2 + $0x118] sm:$0xff] %v1906_v19  ;;  %v991_v19 = vld [vmem:[#allocation2 + $0x590] sm:$0xff]  ;;  %v1935_v33 = vadd.f32 %v1679_v13, %v990_v15  ;;  %v1286_v15 = vmul.f32 %v3832_v43, %v724_v63  ;;  %v719_v63 = vld [vmem:[%s3510_s22 + $0x568] sm:$0xff] }
 0x243   : > { %2163 = vst [vmem:[#allocation2 + $0x268] sm:$0xff] %v1907_v25  ;;  %v1253_v25 = vmul.f32 %v3830_v42, %v691_v8  ;;  %v1938_v52 = vadd.f32 %v1682_v27, %v993_v31  ;;  %v726_v8 = vld [vmem:[%s3510_s22 + $0x5a0] sm:$0xff]  ;;  %v728_v59 = vld [vmem:[%s3510_s22 + $0x5b0] sm:$0xff]  ;;  %v1929_v27 = vadd.f32 %v1673_v5, %v984_v11  ;;  %v1281_v14 = vmul.f32 %v3839_v47, %v719_v63 }
 0x244   : > { %2268 = vst [vmem:[#allocation2 + $0x7c8] sm:$0xff] %v2012_v32  ;;  %v1683_v32 = vmul.f32 %v1462_v21, %v1267_v12  ;;  %v722_v21 = vld [vmem:[%s3510_s22 + $0x580] sm:$0xff]  ;;  %v1018_v5 = vld [vmem:[#allocation2 + $0x3f0] sm:$0xff] }
 0x245   : > { %2269 = vst [vmem:[#allocation2 + $0x430] sm:$0xff] %v2013_v37  ;;  %v1936_v37 = vadd.f32 %v1680_v16, %v991_v19  ;;  %v1669_v51 = vmul.f32 %v1457_v22, %v1253_v25  ;;  %v1284_v36 = vmul.f32 %v3828_v41, %v722_v21  ;;  %v985_v16 = vld [vmem:[#allocation2 + $0x78] sm:$0xff]  ;;  %v1287_v19 = vmul.f32 %v3834_v44, %v725_v3 }
 0x246   : > { %2270 = vst [vmem:[#allocation2 + $0x578] sm:$0xff] %v2014_v49  ;;  %v979_v49 = vld [vmem:[#allocation2 + $0x460] sm:$0xff]  ;;  %v1939_v58 = vadd.f32 %v1683_v32, %v994_v35  ;;  %v1288_v25 = vmul.f32 %v3837_v46, %v726_v8  ;;  %v1012_v32 = vld [vmem:[#allocation2 + $0x228] sm:$0xff]  ;;  %v721_v8 = vld [vmem:[%s3510_s22 + $0x578] sm:$0xff] }
 0x247   : > { %2271 = vst [vmem:[#allocation2 + $0x608] sm:$0xff] %v2015_v56  ;;  %v1258_v56 = vmul.f32 %v3841_v48, %v696_v10  ;;  %v1924_v2 = vadd.f32 %v1668_v40, %v979_v49  ;;  %v1925_v7 = vadd.f32 %v1669_v51, %v980_v53  ;;  %v1700_v26 = vmul.f32 %v1477_v55, %v1284_v36  ;;  %v716_v40 = vld [vmem:[%s3510_s22 + $0x550] sm:$0xff]  ;;  %v717_v51 = vld [vmem:[%s3510_s22 + $0x558] sm:$0xff] }
 0x248   : > { %2272 = vst [vmem:[#allocation2 + $0x638] sm:$0xff] %v2016_v60  ;;  %v981_v60 = vld [vmem:[#allocation2 + $0x528] sm:$0xff]  ;;  %v1702_v10 = vmul.f32 %v1477_v55, %v1286_v15  ;;  %v1703_v39 = vmul.f32 %v1477_v55, %v1287_v19  ;;  %v1704_v49 = vmul.f32 %v1477_v55, %v1288_v25  ;;  %v1705_v53 = vmul.f32 %v1477_v55, %v1289_v29  ;;  %v720_v36 = vld [vmem:[%s3510_s22 + $0x570] sm:$0xff] }
 0x249   : > { %2273 = vst [vmem:[#allocation2 + $0x4b8] sm:$0xff] %v2017_v0  ;;  %v982_v0 = vld [vmem:[#allocation2 + $0x258] sm:$0xff]  ;;  %v1674_v12 = vmul.f32 %v1457_v22, %v1258_v56  ;;  %v1926_v13 = vadd.f32 %v1670_v23, %v981_v60  ;;  %v1472_v23 = vpop.permute.xlu0 %1471  ;;  %v1016_v60 = vld [vmem:[#allocation2 + $0x80] sm:$0xff]  ;;  %v747_v19 = vld [vmem:[%s3510_s22 + $0x648] sm:$0xff]  ;;  %v1283_v24 = vmul.f32 %v3848_v54, %v721_v8 }
 0x24a   : > { %2274 = vst [vmem:[#allocation2 + $0x298] sm:$0xff] %v2018_v4  ;;  %v983_v4 = vld [vmem:[#allocation2 + $0x4d0] sm:$0xff]  ;;  %v1927_v18 = vadd.f32 %v1671_v62, %v982_v0  ;;  %v1278_v0 = vmul.f32 %v3832_v43, %v716_v40  ;;  %v751_v40 = vld [vmem:[%s3510_s22 + $0x668] sm:$0xff] }
 0x24b   : > { %2275 = vst [vmem:[#allocation2 + $0x1f0] sm:$0xff] %v2019_v9  ;;  %v1285_v9 = vmul.f32 %v3830_v42, %v723_v57  ;;  %v1930_v31 = vadd.f32 %v1674_v12, %v985_v16  ;;  %v718_v57 = vld [vmem:[%s3510_s22 + $0x560] sm:$0xff]  ;;  %v1961_v12 = vadd.f32 %v1705_v53, %v1016_v60  ;;  %v1313_v63 = vmul.f32 %v3839_v47, %v751_v40 }
 0x24c   : > { %2188 = vst [vmem:[#allocation2 + $0x10] sm:$0xff] %v1932_v17  ;;  %v1675_v17 = vmul.f32 %v1457_v22, %v1259_v61  ;;  %v714_v22 = vld [vmem:[%s3510_s22 + $0x540] sm:$0xff] }
 0x24d   : > { %2189 = vst [vmem:[#allocation2 + $0x778] sm:$0xff] %v1933_v20  ;;  %v1928_v20 = vadd.f32 %v1672_v1, %v983_v4  ;;  %v1701_v30 = vmul.f32 %v1477_v55, %v1285_v9  ;;  %v1276_v21 = vmul.f32 %v3828_v41, %v714_v22  ;;  %v1017_v1 = vld [vmem:[#allocation2 + $0x4c8] sm:$0xff]  ;;  %v1279_v4 = vmul.f32 %v3834_v44, %v717_v51  ;;  %v1010_v53 = vld [vmem:[#allocation2 + $0x760] sm:$0xff] }
 0x24e   : > { %2190 = vst [vmem:[#allocation2 + $0x7a8] sm:$0xff] %v1934_v28  ;;  %v1011_v28 = vld [vmem:[#allocation2 + $0x5d0] sm:$0xff]  ;;  %v1931_v35 = vadd.f32 %v1675_v17, %v986_v6  ;;  %v1280_v9 = vmul.f32 %v3837_v46, %v718_v57  ;;  %v1004_v17 = vld [vmem:[#allocation2 + $0x2a8] sm:$0xff]  ;;  %v753_v57 = vld [vmem:[%s3510_s22 + $0x678] sm:$0xff] }
 0x24f   : > { %2191 = vst [vmem:[#allocation2 + $0x530] sm:$0xff] %v1935_v33  ;;  %v1290_v33 = vmul.f32 %v3841_v48, %v728_v59  ;;  %v1956_v50 = vadd.f32 %v1700_v26, %v1011_v28  ;;  %v1957_v56 = vadd.f32 %v1701_v30, %v1012_v32  ;;  %v1692_v11 = vmul.f32 %v1472_v23, %v1276_v21  ;;  %v748_v26 = vld [vmem:[%s3510_s22 + $0x650] sm:$0xff]  ;;  %v749_v30 = vld [vmem:[%s3510_s22 + $0x658] sm:$0xff] }
 0x250   : > { %2192 = vst [vmem:[#allocation2 + $0x590] sm:$0xff] %v1936_v37  ;;  %v1013_v37 = vld [vmem:[#allocation2 + $0x208] sm:$0xff]  ;;  %v1694_v59 = vmul.f32 %v1472_v23, %v1278_v0  ;;  %v1695_v25 = vmul.f32 %v1472_v23, %v1279_v4  ;;  %v1696_v28 = vmul.f32 %v1472_v23, %v1280_v9  ;;  %v1697_v32 = vmul.f32 %v1472_v23, %v1281_v14  ;;  %v752_v21 = vld [vmem:[%s3510_s22 + $0x670] sm:$0xff] }
 0x251   : > { %2193 = vst [vmem:[#allocation2 + $0x660] sm:$0xff] %v1937_v45  ;;  %v1014_v45 = vld [vmem:[#allocation2 + $0x290] sm:$0xff]  ;;  %v1706_v61 = vmul.f32 %v1477_v55, %v1290_v33  ;;  %v1958_v62 = vadd.f32 %v1702_v10, %v1013_v37  ;;  %v1492_v10 = vpop.permute.xlu1 %1491  ;;  %v739_v4 = vld [vmem:[%s3510_s22 + $0x608] sm:$0xff]  ;;  %v1315_v8 = vmul.f32 %v3848_v54, %v753_v57 }
 0x252   : > { %2194 = vst [vmem:[#allocation2 + $0x358] sm:$0xff] %v1938_v52  ;;  %v1015_v52 = vld [vmem:[#allocation2 + $0x7a0] sm:$0xff]  ;;  %v1959_v3 = vadd.f32 %v1703_v39, %v1014_v45  ;;  %v1008_v37 = vld [vmem:[#allocation2 + $0x130] sm:$0xff]  ;;  %v1310_v45 = vmul.f32 %v3832_v43, %v748_v26  ;;  %v743_v26 = vld [vmem:[%s3510_s22 + $0x628] sm:$0xff] }
 0x253   : > { %2195 = vst [vmem:[#allocation2 + $0x700] sm:$0xff] %v1939_v58  ;;  %v1277_v58 = vmul.f32 %v3830_v42, %v715_v34  ;;  %v1962_v16 = vadd.f32 %v1706_v61, %v1017_v1  ;;  %v750_v34 = vld [vmem:[%s3510_s22 + $0x660] sm:$0xff]  ;;  %v1953_v61 = vadd.f32 %v1697_v32, %v1008_v37  ;;  %v1042_v32 = vld [vmem:[#allocation2 + $0x88] sm:$0xff]  ;;  %v1305_v40 = vmul.f32 %v3839_v47, %v743_v26 }
 0x254   : > { %2180 = vst [vmem:[#allocation2 + $0x460] sm:$0xff] %v1924_v2  ;;  %v1707_v2 = vmul.f32 %v1477_v55, %v1291_v38  ;;  %v746_v55 = vld [vmem:[%s3510_s22 + $0x640] sm:$0xff] }
 0x255   : > { %2181 = vst [vmem:[#allocation2 + $0x4f0] sm:$0xff] %v1925_v7  ;;  %v1960_v7 = vadd.f32 %v1704_v49, %v1015_v52  ;;  %v1693_v15 = vmul.f32 %v1472_v23, %v1277_v58  ;;  %v1308_v22 = vmul.f32 %v3828_v41, %v746_v55  ;;  %v1009_v49 = vld [vmem:[#allocation2 + $0x28] sm:$0xff]  ;;  %v1311_v52 = vmul.f32 %v3834_v44, %v749_v30 }
 0x256   : > { %2182 = vst [vmem:[#allocation2 + $0x528] sm:$0xff] %v1926_v13  ;;  %v1003_v13 = vld [vmem:[#allocation2 + $0x468] sm:$0xff]  ;;  %v1963_v6 = vadd.f32 %v1707_v2, %v1018_v5  ;;  %v1312_v58 = vmul.f32 %v3837_v46, %v750_v34  ;;  %v745_v34 = vld [vmem:[%s3510_s22 + $0x638] sm:$0xff] }
 0x257   : > { %2183 = vst [vmem:[#allocation2 + $0x258] sm:$0xff] %v1927_v18  ;;  %v1282_v18 = vmul.f32 %v3841_v48, %v720_v36  ;;  %v1948_v29 = vadd.f32 %v1692_v11, %v1003_v13  ;;  %v1949_v33 = vadd.f32 %v1693_v15, %v1004_v17  ;;  %v1724_v60 = vmul.f32 %v1492_v10, %v1308_v22  ;;  %v1036_v2 = vld [vmem:[#allocation2 + $0x8] sm:$0xff]  ;;  %v740_v11 = vld [vmem:[%s3510_s22 + $0x610] sm:$0xff]  ;;  %v741_v15 = vld [vmem:[%s3510_s22 + $0x618] sm:$0xff] }
 0x258   : > { %2184 = vst [vmem:[#allocation2 + $0x4d0] sm:$0xff] %v1928_v20  ;;  %v1005_v20 = vld [vmem:[#allocation2 + $0x1d0] sm:$0xff]  ;;  %v1726_v36 = vmul.f32 %v1492_v10, %v1310_v45  ;;  %v1727_v9 = vmul.f32 %v1492_v10, %v1311_v52  ;;  %v1728_v13 = vmul.f32 %v1492_v10, %v1312_v58  ;;  %v1729_v17 = vmul.f32 %v1492_v10, %v1313_v63  ;;  %v771_v52 = vld [vmem:[%s3510_s22 + $0x708] sm:$0xff] }
 0x259   : > { %2185 = vst [vmem:[#allocation2 + $0x4f8] sm:$0xff] %v1929_v27  ;;  %v1006_v27 = vld [vmem:[#allocation2 + $0x510] sm:$0xff]  ;;  %v1698_v38 = vmul.f32 %v1472_v23, %v1282_v18  ;;  %v1950_v39 = vadd.f32 %v1694_v59, %v1005_v20  ;;  %v1487_v59 = vpop.permute.xlu0 %1486  ;;  %v1040_v20 = vld [vmem:[#allocation2 + $0x20] sm:$0xff]  ;;  %v1307_v57 = vmul.f32 %v3848_v54, %v745_v34 }
 0x25a   : > { %2186 = vst [vmem:[#allocation2 + $0x78] sm:$0xff] %v1930_v31  ;;  %v1007_v31 = vld [vmem:[#allocation2 + $0x750] sm:$0xff]  ;;  %v1951_v51 = vadd.f32 %v1695_v25, %v1006_v27  ;;  %v1302_v27 = vmul.f32 %v3832_v43, %v740_v11  ;;  %v775_v11 = vld [vmem:[%s3510_s22 + $0x728] sm:$0xff] }
 0x25b   : > { %2187 = vst [vmem:[#allocation2 + $0x2a0] sm:$0xff] %v1931_v35  ;;  %v1309_v35 = vmul.f32 %v3830_v42, %v747_v19  ;;  %v1954_v1 = vadd.f32 %v1698_v38, %v1009_v49  ;;  %v742_v19 = vld [vmem:[%s3510_s22 + $0x620] sm:$0xff]  ;;  %v744_v22 = vld [vmem:[%s3510_s22 + $0x630] sm:$0xff]  ;;  %v1985_v38 = vadd.f32 %v1729_v17, %v1040_v20  ;;  %v1337_v26 = vmul.f32 %v3839_v47, %v775_v11 }
 0x25c   : > { %2212 = vst [vmem:[#allocation2 + $0x5d0] sm:$0xff] %v1956_v50  ;;  %v1699_v50 = vmul.f32 %v1472_v23, %v1283_v24  ;;  %v738_v23 = vld [vmem:[%s3510_s22 + $0x600] sm:$0xff] }
 0x25d   : > { %2213 = vst [vmem:[#allocation2 + $0x228] sm:$0xff] %v1957_v56  ;;  %v1952_v56 = vadd.f32 %v1696_v28, %v1007_v31  ;;  %v1725_v0 = vmul.f32 %v1492_v10, %v1309_v35  ;;  %v1300_v55 = vmul.f32 %v3828_v41, %v738_v23  ;;  %v1041_v28 = vld [vmem:[#allocation2 + $0x308] sm:$0xff]  ;;  %v1303_v31 = vmul.f32 %v3834_v44, %v741_v15  ;;  %v1034_v17 = vld [vmem:[#allocation2 + $0x780] sm:$0xff] }
 0x25e   : > { %2214 = vst [vmem:[#allocation2 + $0x208] sm:$0xff] %v1958_v62  ;;  %v1035_v62 = vld [vmem:[#allocation2 + $0x708] sm:$0xff]  ;;  %v1955_v5 = vadd.f32 %v1699_v50, %v1010_v53  ;;  %v1304_v35 = vmul.f32 %v3837_v46, %v742_v19  ;;  %v1028_v50 = vld [vmem:[#allocation2 + $0x98] sm:$0xff] }
 0x25f   : > { %2215 = vst [vmem:[#allocation2 + $0x290] sm:$0xff] %v1959_v3  ;;  %v1314_v3 = vmul.f32 %v3841_v48, %v752_v21  ;;  %v1980_v14 = vadd.f32 %v1724_v60, %v1035_v62  ;;  %v1981_v18 = vadd.f32 %v1725_v0, %v1036_v2  ;;  %v1716_v37 = vmul.f32 %v1487_v59, %v1300_v55  ;;  %v772_v60 = vld [vmem:[%s3510_s22 + $0x710] sm:$0xff]  ;;  %v773_v0 = vld [vmem:[%s3510_s22 + $0x718] sm:$0xff] }
 0x260   : > { %2216 = vst [vmem:[#allocation2 + $0x7a0] sm:$0xff] %v1960_v7  ;;  %v1037_v7 = vld [vmem:[#allocation2 + $0x428] sm:$0xff]  ;;  %v1718_v21 = vmul.f32 %v1487_v59, %v1302_v27  ;;  %v1719_v58 = vmul.f32 %v1487_v59, %v1303_v31  ;;  %v1720_v62 = vmul.f32 %v1487_v59, %v1304_v35  ;;  %v1721_v2 = vmul.f32 %v1487_v59, %v1305_v40  ;;  %v776_v55 = vld [vmem:[%s3510_s22 + $0x730] sm:$0xff]  ;;  %v777_v19 = vld [vmem:[%s3510_s22 + $0x738] sm:$0xff] }
 0x261   : > { %2217 = vst [vmem:[#allocation2 + $0x80] sm:$0xff] %v1961_v12  ;;  %v1038_v12 = vld [vmem:[#allocation2 + $0x170] sm:$0xff]  ;;  %v1730_v24 = vmul.f32 %v1492_v10, %v1314_v3  ;;  %v1982_v25 = vadd.f32 %v1726_v36, %v1037_v7  ;;  %v1507_v36 = vpop.permute.xlu1 %1506  ;;  %v1032_v7 = vld [vmem:[#allocation2 + $0x548] sm:$0xff]  ;;  %v1339_v34 = vmul.f32 %v3848_v54, %v777_v19 }
 0x262   : > { %2218 = vst [vmem:[#allocation2 + $0x4c8] sm:$0xff] %v1962_v16  ;;  %v1039_v16 = vld [vmem:[#allocation2 + $0x7e0] sm:$0xff]  ;;  %v1983_v30 = vadd.f32 %v1727_v9, %v1038_v12  ;;  %v1334_v12 = vmul.f32 %v3832_v43, %v772_v60  ;;  %v763_v31 = vld [vmem:[%s3510_s22 + $0x6c8] sm:$0xff] }
 0x263   : > { %2219 = vst [vmem:[#allocation2 + $0x3f0] sm:$0xff] %v1963_v6  ;;  %v1301_v6 = vmul.f32 %v3830_v42, %v739_v4  ;;  %v1986_v49 = vadd.f32 %v1730_v24, %v1041_v28  ;;  %v774_v4 = vld [vmem:[%s3510_s22 + $0x720] sm:$0xff]  ;;  %v1977_v24 = vadd.f32 %v1721_v2, %v1032_v7  ;;  %v767_v60 = vld [vmem:[%s3510_s22 + $0x6e8] sm:$0xff] }
 0x264   : > { %2204 = vst [vmem:[#allocation2 + $0x468] sm:$0xff] %v1948_v29  ;;  %v1731_v29 = vmul.f32 %v1492_v10, %v1315_v8  ;;  %v770_v10 = vld [vmem:[%s3510_s22 + $0x700] sm:$0xff]  ;;  %v1066_v2 = vld [vmem:[#allocation2 + $0x328] sm:$0xff]  ;;  %v1329_v11 = vmul.f32 %v3839_v47, %v767_v60 }
 0x265   : > { %2205 = vst [vmem:[#allocation2 + $0x2a8] sm:$0xff] %v1949_v33  ;;  %v1984_v33 = vadd.f32 %v1728_v13, %v1039_v16  ;;  %v1717_v45 = vmul.f32 %v1487_v59, %v1301_v6  ;;  %v1332_v23 = vmul.f32 %v3828_v41, %v770_v10  ;;  %v1033_v13 = vld [vmem:[#allocation2 + $0x220] sm:$0xff]  ;;  %v1335_v16 = vmul.f32 %v3834_v44, %v773_v0 }
 0x266   : > { %2206 = vst [vmem:[#allocation2 + $0x1d0] sm:$0xff] %v1950_v39  ;;  %v1027_v39 = vld [vmem:[#allocation2 + $0x678] sm:$0xff]  ;;  %v1987_v53 = vadd.f32 %v1731_v29, %v1042_v32  ;;  %v1336_v6 = vmul.f32 %v3837_v46, %v774_v4  ;;  %v1060_v29 = vld [vmem:[#allocation2 + $0x668] sm:$0xff] }
 0x267   : > { %2207 = vst [vmem:[#allocation2 + $0x510] sm:$0xff] %v1951_v51  ;;  %v1306_v51 = vmul.f32 %v3841_v48, %v744_v22  ;;  %v1972_v63 = vadd.f32 %v1716_v37, %v1027_v39  ;;  %v1973_v3 = vadd.f32 %v1717_v45, %v1028_v50  ;;  %v1748_v20 = vmul.f32 %v1507_v36, %v1332_v23  ;;  %v764_v37 = vld [vmem:[%s3510_s22 + $0x6d0] sm:$0xff]  ;;  %v765_v45 = vld [vmem:[%s3510_s22 + $0x6d8] sm:$0xff] }
 0x268   : > { %2208 = vst [vmem:[#allocation2 + $0x750] sm:$0xff] %v1952_v56  ;;  %v1029_v56 = vld [vmem:[#allocation2 + $0x470] sm:$0xff]  ;;  %v1750_v22 = vmul.f32 %v1507_v36, %v1334_v12  ;;  %v1751_v35 = vmul.f32 %v1507_v36, %v1335_v16  ;;  %v1752_v39 = vmul.f32 %v1507_v36, %v1336_v6  ;;  %v1753_v50 = vmul.f32 %v1507_v36, %v1337_v26  ;;  %v769_v4 = vld [vmem:[%s3510_s22 + $0x6f8] sm:$0xff]  ;;  %v795_v16 = vld [vmem:[%s3510_s22 + $0x7c8] sm:$0xff] }
 0x269   : > { %2209 = vst [vmem:[#allocation2 + $0x130] sm:$0xff] %v1953_v61  ;;  %v1030_v61 = vld [vmem:[#allocation2 + $0x410] sm:$0xff]  ;;  %v1722_v8 = vmul.f32 %v1487_v59, %v1306_v51  ;;  %v1974_v9 = vadd.f32 %v1718_v21, %v1029_v56  ;;  %v1502_v21 = vpop.permute.xlu0 %1501  ;;  %v1064_v56 = vld [vmem:[#allocation2 + $0xa0] sm:$0xff]  ;;  %v1331_v19 = vmul.f32 %v3848_v54, %v769_v4 }
 0x26a   : > { %2210 = vst [vmem:[#allocation2 + $0x28] sm:$0xff] %v1954_v1  ;;  %v1031_v1 = vld [vmem:[#allocation2 + $0x248] sm:$0xff]  ;;  %v1975_v15 = vadd.f32 %v1719_v58, %v1030_v61  ;;  %v1326_v61 = vmul.f32 %v3832_v43, %v764_v37  ;;  %v768_v23 = vld [vmem:[%s3510_s22 + $0x6f0] sm:$0xff] }
 0x26b   : > { %2211 = vst [vmem:[#allocation2 + $0x760] sm:$0xff] %v1955_v5  ;;  %v1333_v5 = vmul.f32 %v3830_v42, %v771_v52  ;;  %v1978_v28 = vadd.f32 %v1722_v8, %v1033_v13  ;;  %v766_v52 = vld [vmem:[%s3510_s22 + $0x6e0] sm:$0xff]  ;;  %v2009_v8 = vadd.f32 %v1753_v50, %v1064_v56  ;;  %v799_v37 = vld [vmem:[%s3510_s22 + $0x7e8] sm:$0xff] }
 0x26c   : > { %2236 = vst [vmem:[#allocation2 + $0x708] sm:$0xff] %v1980_v14  ;;  %v1723_v14 = vmul.f32 %v1487_v59, %v1307_v57  ;;  %v762_v59 = vld [vmem:[%s3510_s22 + $0x6c0] sm:$0xff]  ;;  %v1058_v50 = vld [vmem:[#allocation2 + $0x748] sm:$0xff]  ;;  %v1361_v60 = vmul.f32 %v3839_v47, %v799_v37 }
 0x26d   : > { %2237 = vst [vmem:[#allocation2 + $0x8] sm:$0xff] %v1981_v18  ;;  %v1976_v18 = vadd.f32 %v1720_v62, %v1031_v1  ;;  %v1749_v27 = vmul.f32 %v1507_v36, %v1333_v5  ;;  %v1324_v10 = vmul.f32 %v3828_v41, %v762_v59  ;;  %v1065_v62 = vld [vmem:[#allocation2 + $0x48] sm:$0xff]  ;;  %v1327_v1 = vmul.f32 %v3834_v44, %v765_v45 }
 0x26e   : > { %2238 = vst [vmem:[#allocation2 + $0x428] sm:$0xff] %v1982_v25  ;;  %v1059_v25 = vld [vmem:[#allocation2 + $0x168] sm:$0xff]  ;;  %v1979_v32 = vadd.f32 %v1723_v14, %v1034_v17  ;;  %v1328_v5 = vmul.f32 %v3837_v46, %v766_v52  ;;  %v1052_v14 = vld [vmem:[#allocation2 + $0x2f0] sm:$0xff]  ;;  %v801_v52 = vld [vmem:[%s3510_s22 + $0x7f8] sm:$0xff] }
 0x26f   : > { %2239 = vst [vmem:[#allocation2 + $0x170] sm:$0xff] %v1983_v30  ;;  %v1338_v30 = vmul.f32 %v3841_v48, %v776_v55  ;;  %v2004_v40 = vadd.f32 %v1748_v20, %v1059_v25  ;;  %v2005_v51 = vadd.f32 %v1749_v27, %v1060_v29  ;;  %v1740_v7 = vmul.f32 %v1502_v21, %v1324_v10  ;;  %v796_v20 = vld [vmem:[%s3510_s22 + $0x7d0] sm:$0xff]  ;;  %v797_v27 = vld [vmem:[%s3510_s22 + $0x7d8] sm:$0xff] }
 0x270   : > { %2240 = vst [vmem:[#allocation2 + $0x7e0] sm:$0xff] %v1984_v33  ;;  %v1061_v33 = vld [vmem:[#allocation2 + $0x270] sm:$0xff]  ;;  %v1742_v55 = vmul.f32 %v1502_v21, %v1326_v61  ;;  %v1743_v6 = vmul.f32 %v1502_v21, %v1327_v1  ;;  %v1744_v25 = vmul.f32 %v1502_v21, %v1328_v5  ;;  %v1745_v29 = vmul.f32 %v1502_v21, %v1329_v11  ;;  %v787_v1 = vld [vmem:[%s3510_s22 + $0x788] sm:$0xff] }
 0x271   : > { %2241 = vst [vmem:[#allocation2 + $0x20] sm:$0xff] %v1985_v38  ;;  %v1062_v38 = vld [vmem:[#allocation2 + $0x2d8] sm:$0xff]  ;;  %v1754_v57 = vmul.f32 %v1507_v36, %v1338_v30  ;;  %v2006_v58 = vadd.f32 %v1750_v22, %v1061_v33  ;;  %v1522_v22 = vpop.permute.xlu1 %1521  ;;  %v1056_v33 = vld [vmem:[#allocation2 + $0x210] sm:$0xff]  ;;  %v1363_v4 = vmul.f32 %v3848_v54, %v801_v52 }
 0x272   : > { %2242 = vst [vmem:[#allocation2 + $0x308] sm:$0xff] %v1986_v49  ;;  %v1063_v49 = vld [vmem:[#allocation2 + $0xc8] sm:$0xff]  ;;  %v2007_v0 = vadd.f32 %v1751_v35, %v1062_v38  ;;  %v1358_v38 = vmul.f32 %v3832_v43, %v796_v20  ;;  %v800_v10 = vld [vmem:[%s3510_s22 + $0x7f0] sm:$0xff]  ;;  %v1080_v52 = vld [vmem:[#allocation2 + $0x718] sm:$0xff] }
 0x273   : > { %2243 = vst [vmem:[#allocation2 + $0x88] sm:$0xff] %v1987_v53  ;;  %v1325_v53 = vmul.f32 %v3830_v42, %v763_v31  ;;  %v2010_v13 = vadd.f32 %v1754_v57, %v1065_v62  ;;  %v798_v31 = vld [vmem:[%s3510_s22 + $0x7e0] sm:$0xff]  ;;  %v2001_v57 = vadd.f32 %v1745_v29, %v1056_v33  ;;  %v791_v20 = vld [vmem:[%s3510_s22 + $0x7a8] sm:$0xff] }
 0x274   : > { %2228 = vst [vmem:[#allocation2 + $0x678] sm:$0xff] %v1972_v63  ;;  %v1755_v63 = vmul.f32 %v1507_v36, %v1339_v34  ;;  %v794_v36 = vld [vmem:[%s3510_s22 + $0x7c0] sm:$0xff] }
 0x275   : > { %2229 = vst [vmem:[#allocation2 + $0x98] sm:$0xff] %v1973_v3  ;;  %v2008_v3 = vadd.f32 %v1752_v39, %v1063_v49  ;;  %v1741_v12 = vmul.f32 %v1502_v21, %v1325_v53  ;;  %v1356_v59 = vmul.f32 %v3828_v41, %v794_v36  ;;  %v1057_v39 = vld [vmem:[#allocation2 + $0x4a0] sm:$0xff]  ;;  %v1359_v49 = vmul.f32 %v3834_v44, %v797_v27  ;;  %v792_v27 = vld [vmem:[%s3510_s22 + $0x7b0] sm:$0xff] }
 0x276   : > { %2230 = vst [vmem:[#allocation2 + $0x470] sm:$0xff] %v1974_v9  ;;  %v1051_v9 = vld [vmem:[#allocation2 + $0xe8] sm:$0xff]  ;;  %v2011_v17 = vadd.f32 %v1755_v63, %v1066_v2  ;;  %v1360_v53 = vmul.f32 %v3837_v46, %v798_v31  ;;  %v1075_v33 = vld [vmem:[#allocation2] sm:$0xff]  ;;  %v1354_v37 = vmul.f32 %v3841_v48, %v792_v27 }
 0x277   : > { %2231 = vst [vmem:[#allocation2 + $0x410] sm:$0xff] %v1975_v15  ;;  %v1330_v15 = vmul.f32 %v3841_v48, %v768_v23  ;;  %v1996_v26 = vadd.f32 %v1740_v7, %v1051_v9  ;;  %v1997_v30 = vadd.f32 %v1741_v12, %v1052_v14  ;;  %v1772_v56 = vmul.f32 %v1522_v22, %v1356_v59  ;;  %v1084_v63 = vld [vmem:[#allocation2 + $0xa8] sm:$0xff]  ;;  %v788_v7 = vld [vmem:[%s3510_s22 + $0x790] sm:$0xff]  ;;  %v789_v12 = vld [vmem:[%s3510_s22 + $0x798] sm:$0xff] }
 0x278   : > { %2232 = vst [vmem:[#allocation2 + $0x248] sm:$0xff] %v1976_v18  ;;  %v1053_v18 = vld [vmem:[#allocation2 + $0x7e8] sm:$0xff]  ;;  %v1774_v23 = vmul.f32 %v1522_v22, %v1358_v38  ;;  %v1775_v5 = vmul.f32 %v1522_v22, %v1359_v49  ;;  %v1776_v9 = vmul.f32 %v1522_v22, %v1360_v53  ;;  %v1777_v14 = vmul.f32 %v1522_v22, %v1361_v60  ;;  %v1082_v60 = vld [vmem:[#allocation2 + $0x190] sm:$0xff] }
 0x279   : > { %2233 = vst [vmem:[#allocation2 + $0x548] sm:$0xff] %v1977_v24  ;;  %v1054_v24 = vld [vmem:[#allocation2 + $0x360] sm:$0xff]  ;;  %v1746_v34 = vmul.f32 %v1502_v21, %v1330_v15  ;;  %v1998_v35 = vadd.f32 %v1742_v55, %v1053_v18  ;;  %v1517_v55 = vpop.permute.xlu0 %1516  ;;  %v1351_v59 = vmul.f32 %v3834_v44, %v789_v12 }
 0x27a   : > { %2234 = vst [vmem:[#allocation2 + $0x220] sm:$0xff] %v1978_v28  ;;  %v1055_v28 = vld [vmem:[#allocation2 + $0x60] sm:$0xff]  ;;  %v1999_v45 = vadd.f32 %v1743_v6, %v1054_v24  ;;  %v1350_v24 = vmul.f32 %v3832_v43, %v788_v7  ;;  %v1770_v53 = vmul.f32 %v1517_v55, %v1354_v37 }
 0x27b   : > { %2235 = vst [vmem:[#allocation2 + $0x780] sm:$0xff] %v1979_v32  ;;  %v1357_v32 = vmul.f32 %v3830_v42, %v795_v16  ;;  %v2002_v62 = vadd.f32 %v1746_v34, %v1057_v39  ;;  %v790_v16 = vld [vmem:[%s3510_s22 + $0x7a0] sm:$0xff]  ;;  %v1353_v34 = vmul.f32 %v3839_v47, %v791_v20  ;;  %v1077_v39 = vld [vmem:[#allocation2 + $0x650] sm:$0xff] }
 0x27c   : > { %2260 = vst [vmem:[#allocation2 + $0x168] sm:$0xff] %v2004_v40  ;;  %v1747_v40 = vmul.f32 %v1502_v21, %v1331_v19  ;;  %v786_v21 = vld [vmem:[%s3510_s22 + $0x780] sm:$0xff]  ;;  %v1766_v38 = vmul.f32 %v1517_v55, %v1350_v24 }
 0x27d   : > { %2261 = vst [vmem:[#allocation2 + $0x668] sm:$0xff] %v2005_v51  ;;  %v2000_v51 = vadd.f32 %v1744_v25, %v1055_v28  ;;  %v1773_v61 = vmul.f32 %v1522_v22, %v1357_v32  ;;  %v1348_v36 = vmul.f32 %v3828_v41, %v786_v21  ;;  %v1088_v18 = vld [vmem:[#allocation2 + $0x5e0] sm:$0xff]  ;;  %v1779_v41 = vmul.f32 %v1522_v22, %v1363_v4  ;;  %v1090_v28 = vld [vmem:[#allocation2 + $0x150] sm:$0xff] }
 0x27e   : > { %2262 = vst [vmem:[#allocation2 + $0x270] sm:$0xff] %v2006_v58  ;;  %v1083_v58 = vld [vmem:[#allocation2 + $0x710] sm:$0xff]  ;;  %v2003_v2 = vadd.f32 %v1747_v40, %v1058_v50  ;;  %v1089_v25 = vld [vmem:[#allocation2 + $0x580] sm:$0xff]  ;;  %v2033_v32 = vadd.f32 %v1777_v14, %v1088_v18  ;;  %v1079_v50 = vld [vmem:[#allocation2 + $0x3d8] sm:$0xff]  ;;  %v1769_v47 = vmul.f32 %v1517_v55, %v1353_v34 }
 0x27f   : > { %2263 = vst [vmem:[#allocation2 + $0x2d8] sm:$0xff] %v2007_v0  ;;  %v1362_v0 = vmul.f32 %v3841_v48, %v800_v10  ;;  %v2028_v11 = vadd.f32 %v1772_v56, %v1083_v58  ;;  %v2029_v15 = vadd.f32 %v1773_v61, %v1084_v63  ;;  %v1764_v31 = vmul.f32 %v1517_v55, %v1348_v36  ;;  %v1081_v48 = vld [vmem:[#allocation2 + $0x7d0] sm:$0xff]  ;;  %v2305_v7 = vld [vmem:[#allocation2 + $0x380] sm:$0xff] (%p2292_p3)  ;;  %v2311_v14 = vld [vmem:[#allocation2 + $0x508] sm:$0xff] (%p2292_p3) }
 0x280   : > { %2264 = vst [vmem:[#allocation2 + $0xc8] sm:$0xff] %v2008_v3  ;;  %v1085_v3 = vld [vmem:[#allocation2 + $0x2b8] sm:$0xff]  ;;  %v2035_v44 = vadd.f32 %v1779_v41, %v1090_v28  ;;  %v2022_v56 = vadd.f32 %v1766_v38, %v1077_v39  ;;  %v2026_v21 = vadd.f32 %v1770_v53, %v1081_v48  ;;  %v2297_v63 = vld [vmem:[#allocation2 + $0x2b0] sm:$0xff] (%p2292_p3)  ;;  %v2309_v36 = vld [vmem:[#allocation2 + $0x320] sm:$0xff] (%p2292_p3) }
 0x281   : > { %2265 = vst [vmem:[#allocation2 + $0xa0] sm:$0xff] %v2009_v8  ;;  %v1086_v8 = vld [vmem:[#allocation2 + $0x238] sm:$0xff]  ;;  %v1778_v19 = vmul.f32 %v1522_v22, %v1362_v0  ;;  %v2030_v6 = vadd.f32 %v1774_v23, %v1085_v3  ;;  %v1076_v22 = vld [vmem:[#allocation2 + $0x2d0] sm:$0xff]  ;;  %v2020_v49 = vadd.f32 %v1764_v31, %v1075_v33  ;;  %v2302_v3 = vld [vmem:[#allocation2 + $0x768] sm:$0xff] (%p2292_p3)  ;;  %v2553_v12 = vadd.f32 (%p2292_p3), %v2305_v7, %v2297_v63 }
 0x282   : > { %2266 = vst [vmem:[#allocation2 + $0x48] sm:$0xff] %v2010_v13  ;;  %v1087_v13 = vld [vmem:[#allocation2 + $0x1b0] sm:$0xff]  ;;  %v2299_v23 = vld [vmem:[#allocation2 + $0x4d8] sm:$0xff] (%p2292_p3)  ;;  %v2313_v18 = vld [vmem:[#allocation2 + $0x6e0] sm:$0xff] (%p2292_p3) }
 0x283   : > { %2267 = vst [vmem:[#allocation2 + $0x328] sm:$0xff] %v2011_v17  ;;  %v1349_v17 = vmul.f32 %v3830_v42, %v787_v1  ;;  %v2032_v29 = vadd.f32 %v1776_v9, %v1087_v13  ;;  %v1352_v42 = vmul.f32 %v3837_v46, %v790_v16  ;;  %v1078_v46 = vld [vmem:[#allocation2 + $0x480] sm:$0xff]  ;;  %v2298_v0 = vld [vmem:[#allocation2 + $0x3b0] sm:$0xff] (%p2292_p3)  ;;  %v2300_v1 = vld [vmem:[#allocation2 + $0x18] sm:$0xff] (%p2292_p3)  ;;  %v2554_v27 = vadd.f32 (%p2292_p3), %v2553_v12, %v2313_v18 }
 0x284   : > { %2252 = vst [vmem:[#allocation2 + $0xe8] sm:$0xff] %v1996_v26  ;;  %v2031_v26 = vadd.f32 %v1775_v5, %v1086_v8  ;;  %v2303_v4 = vld [vmem:[#allocation2 + $0x330] sm:$0xff] (%p2292_p3)  ;;  %v2304_v5 = vld [vmem:[#allocation2 + $0x448] sm:$0xff] (%p2292_p3)  ;;  %v2307_v9 = vld [vmem:[#allocation2 + $0x518] sm:$0xff] (%p2292_p3) }
 0x285   : > { %2253 = vst [vmem:[#allocation2 + $0x2f0] sm:$0xff] %v1997_v30  ;;  %v793_v30 = vld [vmem:[%s3510_s22 + $0x7b8] sm:$0xff]  ;;  %v1765_v43 = vmul.f32 %v1517_v55, %v1349_v17  ;;  %v1768_v10 = vmul.f32 %v1517_v55, %v1352_v42  ;;  %v2306_v8 = vld [vmem:[#allocation2 + $0x110] sm:$0xff] (%p2292_p3)  ;;  %v2312_v17 = vld [vmem:[#allocation2 + $0x720] sm:$0xff] (%p2292_p3)  ;;  %v2775_v24 = vadd.f32 (%p2292_p3), %v2311_v14, %v2303_v4 }
 0x286   : > { %2254 = vst [vmem:[#allocation2 + $0x7e8] sm:$0xff] %v1998_v35  ;;  %v2034_v35 = vadd.f32 %v1778_v19, %v1089_v25  ;;  %v1355_v40 = vmul.f32 %v3848_v54, %v793_v30  ;;  %v2025_v54 = vadd.f32 %v1769_v47, %v1080_v52  ;;  %v2310_v13 = vld [vmem:[#allocation2 + $0x550] sm:$0xff] (%p2292_p3)  ;;  %v2314_v19 = vld [vmem:[#allocation2 + $0x788] sm:$0xff] (%p2292_p3)  ;;  %v2315_v25 = vld [vmem:[#allocation2 + $0x338] sm:$0xff] (%p2292_p3)  ;;  %v2812_v28 = vadd.f32 (%p2292_p3), %v2312_v17, %v2304_v5 }
 0x287   : > { %2255 = vst [vmem:[#allocation2 + $0x360] sm:$0xff] %v1999_v45  ;;  %v1767_v45 = vmul.f32 %v1517_v55, %v1351_v59  ;;  %v2024_v61 = vadd.f32 %v1768_v10, %v1079_v50  ;;  %v2738_v20 = vadd.f32 (%p2292_p3), %v2310_v13, %v2302_v3  ;;  %v2316_v41 = vld [vmem:[#allocation2 + $0x740] sm:$0xff] (%p2292_p3)  ;;  %v2319_v30 = vld [vmem:[#allocation2 + $0x5b8] sm:$0xff] (%p2292_p3)  ;;  %v2320_v42 = vld [vmem:[#allocation2 + $0x568] sm:$0xff] (%p2292_p3) }
 0x288   : > { %2256 = vst [vmem:[#allocation2 + $0x60] sm:$0xff] %v2000_v51  ;;  %v2021_v51 = vadd.f32 %v1765_v43, %v1076_v22  ;;  %v2321_v34 = vld [vmem:[#allocation2 + $0x3e8] sm:$0xff] (%p2292_p3)  ;;  %v2322_v43 = vld [vmem:[#allocation2 + $0x6f8] sm:$0xff] (%p2292_p3)  ;;  %v2776_v37 = vadd.f32 (%p2292_p3), %v2775_v24, %v2319_v30  ;;  %v2813_v38 = vadd.f32 (%p2292_p3), %v2812_v28, %v2320_v42  ;;  %v2328_v50 = vld [vmem:[#allocation2 + $0x280] sm:$0xff] (%p2292_p3) }
 0x289   : > { %2257 = vst [vmem:[#allocation2 + $0x210] sm:$0xff] %v2001_v57  ;;  %v1771_v57 = vmul.f32 %v1517_v55, %v1355_v40  ;;  %v2023_v58 = vadd.f32 %v1767_v45, %v1078_v46  ;;  %v2627_v55 = vadd.f32 (%p2292_p3), %v2307_v9, %v2299_v23  ;;  %v2325_v39 = vld [vmem:[#allocation2 + $0x138] sm:$0xff] (%p2292_p3)  ;;  %v2326_v40 = vld [vmem:[#allocation2 + $0xc0] sm:$0xff] (%p2292_p3)  ;;  %v2555_v45 = vadd.f32 (%p2292_p3), %v2554_v27, %v2321_v34  ;;  %v2338_v3 = vld [vmem:[#allocation2 + $0x6a8] sm:$0xff] (%p2292_p3) }
 0x28a   : > { %2258 = vst [vmem:[#allocation2 + $0x4a0] sm:$0xff] %v2002_v62  ;;  %v2329_v47 = vld [vmem:[#allocation2 + $0x100] sm:$0xff] (%p2292_p3)  ;;  %v2331_v48 = vld [vmem:[#allocation2 + $0x558] sm:$0xff] (%p2292_p3)  ;;  %v2340_v9 = vld [vmem:[#allocation2 + $0x2e8] sm:$0xff] (%p2292_p3) }
 0x28b   : > { %2259 = vst [vmem:[#allocation2 + $0x748] sm:$0xff] %v2003_v2  ;;  %v2027_v62 = vadd.f32 %v1771_v57, %v1082_v60  ;;  %v2301_v2 = vld [vmem:[#allocation2 + $0x450] sm:$0xff] (%p2292_p3)  ;;  %v2628_v31 = vadd.f32 (%p2292_p3), %v2627_v55, %v2315_v25  ;;  %v2332_v57 = vld [vmem:[#allocation2 + $0x3e0] sm:$0xff] (%p2292_p3)  ;;  %v2344_v55 = vld [vmem:[#allocation2 + $0x5f8] sm:$0xff] (%p2292_p3) }
 0x28c   : > { %2284 = vst [vmem:[#allocation2 + $0x710] sm:$0xff] %v2028_v11  ;;  %v2308_v11 = vld [vmem:[#allocation2 + $0x498] sm:$0xff] (%p2292_p3)  ;;  %v2342_v14 = vld [vmem:[#allocation2 + $0x5c0] sm:$0xff] (%p2292_p3)  ;;  %v2349_v27 = vld [vmem:[#allocation2 + $0x348] sm:$0xff] (%p2292_p3) }
 0x28d   : > { %2285 = vst [vmem:[#allocation2 + $0xa8] sm:$0xff] %v2029_v15  ;;  %v2590_v15 = vadd.f32 (%p2292_p3), %v2306_v8, %v2298_v0  ;;  %v2664_v16 = vadd.f32 (%p2292_p3), %v2308_v11, %v2300_v1  ;;  %v2336_v1 = vld [vmem:[#allocation2 + $0x7b8] sm:$0xff] (%p2292_p3)  ;;  %v2341_v11 = vld [vmem:[#allocation2 + $0x6c8] sm:$0xff] (%p2292_p3)  ;;  %v2351_v42 = vld [vmem:[#allocation2 + $0xe0] sm:$0xff] (%p2292_p3) }
 0x28e   : > { %2286 = vst [vmem:[#allocation2 + $0x2b8] sm:$0xff] %v2030_v6  ;;  %v2701_v6 = vadd.f32 (%p2292_p3), %v2309_v36, %v2301_v2  ;;  %v2337_v2 = vld [vmem:[#allocation2 + $0x400] sm:$0xff] (%p2292_p3)  ;;  %v2339_v8 = vld [vmem:[#allocation2 + $0x3f8] sm:$0xff] (%p2292_p3) }
 0x28f   : > { %2287 = vst [vmem:[#allocation2 + $0x238] sm:$0xff] %v2031_v26  ;;  %v2317_v26 = vld [vmem:[#allocation2 + $0x2e0] sm:$0xff] (%p2292_p3)  ;;  %v2591_v59 = vadd.f32 (%p2292_p3), %v2590_v15, %v2314_v19  ;;  %v2343_v15 = vld [vmem:[#allocation2 + $0x5e8] sm:$0xff] (%p2292_p3)  ;;  %v2345_v19 = vld [vmem:[#allocation2 + $0x770] sm:$0xff] (%p2292_p3) }
 0x290   : > { %2288 = vst [vmem:[#allocation2 + $0x1b0] sm:$0xff] %v2032_v29  ;;  %v2318_v29 = vld [vmem:[#allocation2 + $0x5a8] sm:$0xff] (%p2292_p3)  ;;  %v2702_v33 = vadd.f32 (%p2292_p3), %v2701_v6, %v2317_v26  ;;  %v2346_v6 = vld [vmem:[#allocation2 + $0x520] sm:$0xff] (%p2292_p3)  ;;  %v2348_v26 = vld [vmem:[#allocation2 + $0x250] sm:$0xff] (%p2292_p3) }
 0x291   : > { %2289 = vst [vmem:[#allocation2 + $0x5e0] sm:$0xff] %v2033_v32  ;;  %v2665_v32 = vadd.f32 (%p2292_p3), %v2664_v16, %v2316_v41  ;;  %v2739_v22 = vadd.f32 (%p2292_p3), %v2738_v20, %v2318_v29  ;;  %v2592_v46 = vadd.f32 (%p2292_p3), %v2591_v59, %v2322_v43  ;;  %v2347_v20 = vld [vmem:[#allocation2 + $0x640] sm:$0xff] (%p2292_p3) }
 0x292   : > { %2290 = vst [vmem:[#allocation2 + $0x580] sm:$0xff] %v2034_v35  ;;  %v2323_v35 = vld [vmem:[#allocation2 + $0x690] sm:$0xff] (%p2292_p3)  ;;  %v2703_v52 = vadd.f32 (%p2292_p3), %v2702_v33, %v2325_v39  ;;  %v2350_v59 = vld [vmem:[#allocation2 + $0x420] sm:$0xff] (%p2292_p3) }
 0x293   : > { %2291 = vst [vmem:[#allocation2 + $0x150] sm:$0xff] %v2035_v44  ;;  %v2324_v44 = vld [vmem:[#allocation2 + $0x368] sm:$0xff] (%p2292_p3)  ;;  %v2629_v10 = vadd.f32 (%p2292_p3), %v2628_v31, %v2323_v35  ;;  %v2740_v53 = vadd.f32 (%p2292_p3), %v2739_v22, %v2326_v40  ;;  %v2352_v31 = vld [vmem:[#allocation2 + $0x620] sm:$0xff] (%p2292_p3)  ;;  %v2357_v40 = vld [vmem:[#allocation2 + $0x38] sm:$0xff] (%p2292_p3) }
 0x294   : > { %2276 = vst [vmem:[#allocation2] sm:$0xff] %v2020_v49  ;;  %v2327_v49 = vld [vmem:[#allocation2 + $0x1c0] sm:$0xff] (%p2292_p3)  ;;  %v2355_v22 = vld [vmem:[#allocation2 + $0x4e8] sm:$0xff] (%p2292_p3) }
 0x295   : > { %2277 = vst [vmem:[#allocation2 + $0x2d0] sm:$0xff] %v2021_v51  ;;  %v2666_v51 = vadd.f32 (%p2292_p3), %v2665_v32, %v2324_v44  ;;  %v2777_v60 = vadd.f32 (%p2292_p3), %v2776_v37, %v2327_v49  ;;  %v2630_v0 = vadd.f32 (%p2292_p3), %v2629_v10, %v2331_v48  ;;  %v2353_v32 = vld [vmem:[#allocation2 + $0x148] sm:$0xff] (%p2292_p3)  ;;  %v2354_v35 = vld [vmem:[#allocation2 + $0x3a0] sm:$0xff] (%p2292_p3)  ;;  %v2356_v37 = vld [vmem:[#allocation2 + $0x310] sm:$0xff] (%p2292_p3) }
 0x296   : > { %2278 = vst [vmem:[#allocation2 + $0x650] sm:$0xff] %v2022_v56  ;;  %v2330_v56 = vld [vmem:[#allocation2 + $0x3c0] sm:$0xff] (%p2292_p3) }
 0x297   : > { %2279 = vst [vmem:[#allocation2 + $0x480] sm:$0xff] %v2023_v58  ;;  %2296 = sbr.rel (!%p2292_p3) target bundleno = 754 (0x2f2), region = 48  ;;  %v2556_v58 = vadd.f32 (%p2292_p3), %v2555_v45, %v2329_v47  ;;  %v2593_v63 = vadd.f32 (%p2292_p3), %v2592_v46, %v2330_v56  ;;  %v2667_v23 = vadd.f32 (%p2292_p3), %v2666_v51, %v2332_v57  ;;  %v2631_v16 = vadd.f32 (%p2292_p3), %v2630_v0, %v2339_v8  ;;  %v2358_v45 = vld [vmem:[#allocation2 + $0x440] sm:$0xff] (%p2292_p3)  ;;  %v2359_v46 = vld [vmem:[#allocation2 + $0x50] sm:$0xff] (%p2292_p3)  ;;  %v2361_v51 = vld [vmem:[#allocation2 + $0x538] sm:$0xff] (%p2292_p3) }
 0x298   : > { %2280 = vst [vmem:[#allocation2 + $0x3d8] sm:$0xff] %v2024_v61  ;;  %v2814_v61 = vadd.f32 (%p2292_p3), %v2813_v38, %v2328_v50  ;;  %v2360_v47 = vld [vmem:[#allocation2 + $0x390] sm:$0xff] (%p2292_p3)  ;;  %v2368_v0 = vld [vmem:[#allocation2 + $0x40] sm:$0xff] (%p2292_p3) }
 0x299   : > { %2281 = vst [vmem:[#allocation2 + $0x718] sm:$0xff] %v2025_v54  ;;  %v2333_v54 = vld [vmem:[#allocation2 + $0x618] sm:$0xff] (%p2292_p3)  ;;  %v2557_v12 = vadd.f32 (%p2292_p3), %v2556_v58, %v2337_v2  ;;  %v2594_v36 = vadd.f32 (%p2292_p3), %v2593_v63, %v2338_v3  ;;  %v2668_v17 = vadd.f32 (%p2292_p3), %v2667_v23, %v2340_v9  ;;  %v2632_v30 = vadd.f32 (%p2292_p3), %v2631_v16, %v2347_v20  ;;  %v2363_v57 = vld [vmem:[#allocation2 + $0x790] sm:$0xff] (%p2292_p3)  ;;  %v2364_v58 = vld [vmem:[#allocation2 + $0x680] sm:$0xff] (%p2292_p3) }
 0x29a   : > { %2282 = vst [vmem:[#allocation2 + $0x7d0] sm:$0xff] %v2026_v21  ;;  %v2334_v21 = vld [vmem:[#allocation2 + $0x4c0] sm:$0xff] (%p2292_p3)  ;;  %v2704_v4 = vadd.f32 (%p2292_p3), %v2703_v52, %v2333_v54  ;;  %v2815_v13 = vadd.f32 (%p2292_p3), %v2814_v61, %v2336_v1  ;;  %v2362_v52 = vld [vmem:[#allocation2 + $0xf0] sm:$0xff] (%p2292_p3)  ;;  %v2376_v16 = vld [vmem:[#allocation2 + $0x6d8] sm:$0xff] (%p2292_p3) }
 0x29b   : > { %2283 = vst [vmem:[#allocation2 + $0x190] sm:$0xff] %v2027_v62  ;;  %v2335_v62 = vld [vmem:[#allocation2 + $0x70] sm:$0xff] (%p2292_p3)  ;;  %v2741_v5 = vadd.f32 (%p2292_p3), %v2740_v53, %v2334_v21  ;;  %v2558_v28 = vadd.f32 (%p2292_p3), %v2557_v12, %v2345_v19  ;;  %v2595_v29 = vadd.f32 (%p2292_p3), %v2594_v36, %v2346_v6  ;;  %v2669_v33 = vadd.f32 (%p2292_p3), %v2668_v17, %v2348_v26  ;;  %v2373_v12 = vld [vmem:[#allocation2 + $0x738] sm:$0xff] (%p2292_p3)  ;;  %v2378_v20 = vld [vmem:[#allocation2 + $0x1a8] sm:$0xff] (%p2292_p3) }
 0x29c   : > { %v2778_v7 = vadd.f32 %v2777_v60, %v2335_v62  ;;  %v2705_v18 = vadd.f32 %v2704_v4, %v2341_v11  ;;  %v2816_v41 = vadd.f32 %v2815_v13, %v2344_v55  ;;  %v2633_v49 = vadd.f32 %v2632_v30, %v2355_v22  ;;  %v2365_v60 = vld [vmem:[#allocation2 + $0xb8] sm:$0xff]  ;;  %v2366_v62 = vld [vmem:[#allocation2 + $0x120] sm:$0xff]  ;;  %v2367_v63 = vld [vmem:[#allocation2 + $0xd0] sm:$0xff] }
 0x29d   : > { %v2742_v24 = vadd.f32 %v2741_v5, %v2342_v14  ;;  %v2559_v38 = vadd.f32 %v2558_v28, %v2353_v32  ;;  %v2596_v10 = vadd.f32 %v2595_v29, %v2354_v35  ;;  %v2670_v50 = vadd.f32 %v2669_v33, %v2356_v37  ;;  %v2369_v3 = vld [vmem:[#allocation2 + $0x6f0] sm:$0xff]  ;;  %v2370_v4 = vld [vmem:[#allocation2 + $0x2f8] sm:$0xff]  ;;  %v2385_v33 = vld [vmem:[#allocation2 + $0x628] sm:$0xff] }
 0x29e   : > { %v2779_v25 = vadd.f32 %v2778_v7, %v2343_v15  ;;  %v2706_v34 = vadd.f32 %v2705_v18, %v2349_v27  ;;  %v2817_v39 = vadd.f32 %v2816_v41, %v2352_v31  ;;  %v2634_v23 = vadd.f32 %v2633_v49, %v2363_v57  ;;  %v2371_v5 = vld [vmem:[#allocation2 + $0x758] sm:$0xff]  ;;  %v2382_v28 = vld [vmem:[#allocation2 + $0x610] sm:$0xff]  ;;  %v2387_v37 = vld [vmem:[#allocation2 + $0x388] sm:$0xff] }
 0x29f   : > { %v2743_v43 = vadd.f32 %v2742_v24, %v2350_v59  ;;  %v2560_v61 = vadd.f32 %v2559_v38, %v2361_v51  ;;  %v2597_v54 = vadd.f32 %v2596_v10, %v2362_v52  ;;  %v2671_v1 = vadd.f32 %v2670_v50, %v2364_v58  ;;  %v2372_v11 = vld [vmem:[#allocation2 + $0x178] sm:$0xff]  ;;  %v2391_v10 = vld [vmem:[#allocation2 + $0x1c8] sm:$0xff]  ;;  %v2392_v49 = vld [vmem:[#allocation2 + $0x7c0] sm:$0xff] }
 0x2a0   : > { %v2780_v44 = vadd.f32 %v2779_v25, %v2351_v42  ;;  %v2707_v53 = vadd.f32 %v2706_v34, %v2357_v40  ;;  %v2818_v21 = vadd.f32 %v2817_v39, %v2360_v47  ;;  %v2374_v36 = vld [vmem:[#allocation2 + $0x598] sm:$0xff]  ;;  %v2635_v15 = vadd.f32 %v2634_v23, %v2371_v5  ;;  %v2400_v23 = vld [vmem:[#allocation2 + $0x648] sm:$0xff] }
 0x2a1   : > { %v2744_v56 = vadd.f32 %v2743_v43, %v2358_v45  ;;  %v2561_v13 = vadd.f32 %v2560_v61, %v2369_v3  ;;  %v2598_v14 = vadd.f32 %v2597_v54, %v2370_v4  ;;  %v2375_v55 = vld [vmem:[#allocation2 + $0x7d8] sm:$0xff]  ;;  %v2672_v18 = vadd.f32 %v2671_v1, %v2372_v11  ;;  %v2397_v61 = vld [vmem:[#allocation2 + $0x90] sm:$0xff]  ;;  %v2398_v54 = vld [vmem:[#allocation2 + $0x540] sm:$0xff] }
 0x2a2   : > { %v2781_v48 = vadd.f32 %v2780_v44, %v2359_v46  ;;  %v2708_v2 = vadd.f32 %v2707_v53, %v2365_v60  ;;  %v2819_v9 = vadd.f32 %v2818_v21, %v2368_v0  ;;  %v2377_v17 = vld [vmem:[#allocation2 + $0x398] sm:$0xff]  ;;  %v2390_v46 = vld [vmem:[#allocation2 + $0x2c0] sm:$0xff]  ;;  %v2394_v53 = vld [vmem:[#allocation2 + $0x7f0] sm:$0xff] }
 0x2a3   : > { %v2745_v7 = vadd.f32 %v2744_v56, %v2366_v62  ;;  %v2379_v24 = vld [vmem:[#allocation2 + $0x698] sm:$0xff]  ;;  %v2562_v41 = vadd.f32 %v2561_v13, %v2377_v17  ;;  %v2599_v30 = vadd.f32 %v2598_v14, %v2378_v20  ;;  %v2395_v56 = vld [vmem:[#allocation2 + $0x4b0] sm:$0xff]  ;;  %v2399_v0 = vld [vmem:[#allocation2 + $0x588] sm:$0xff] }
 0x2a4   : > { %v2782_v8 = vadd.f32 %v2781_v48, %v2367_v63  ;;  %v2709_v19 = vadd.f32 %v2708_v2, %v2373_v12  ;;  %v2380_v25 = vld [vmem:[#allocation2 + $0x3b8] sm:$0xff]  ;;  %v2820_v27 = vadd.f32 %v2819_v9, %v2376_v16  ;;  %v2636_v42 = vadd.f32 %v2635_v15, %v2379_v24  ;;  %v2406_v13 = vld [vmem:[#allocation2 + $0xb0] sm:$0xff] }
 0x2a5   : > { %v2746_v6 = vadd.f32 %v2745_v7, %v2374_v36  ;;  %v2381_v59 = vld [vmem:[#allocation2 + $0x5d8] sm:$0xff]  ;;  %v2673_v31 = vadd.f32 %v2672_v18, %v2380_v25  ;;  %v2563_v39 = vadd.f32 %v2562_v41, %v2385_v33  ;;  %v2403_v7 = vld [vmem:[#allocation2 + $0x68] sm:$0xff]  ;;  %v2407_v14 = vld [vmem:[#allocation2 + $0x630] sm:$0xff] }
 0x2a6   : > { %v2783_v26 = vadd.f32 %v2782_v8, %v2375_v55  ;;  %v2383_v29 = vld [vmem:[#allocation2 + $0x218] sm:$0xff]  ;;  %v2710_v43 = vadd.f32 %v2709_v19, %v2381_v59  ;;  %v2637_v50 = vadd.f32 %v2636_v42, %v2387_v37  ;;  %v2404_v8 = vld [vmem:[#allocation2 + $0x600] sm:$0xff]  ;;  %v2405_v36 = vld [vmem:[#allocation2 + $0x3a8] sm:$0xff] }
 0x2a7   : > { %v2384_v32 = vld [vmem:[#allocation2 + $0x1d8] sm:$0xff]  ;;  %v2747_v35 = vadd.f32 %v2746_v6, %v2382_v28  ;;  %v2409_v18 = vld [vmem:[#allocation2 + $0x370] sm:$0xff]  ;;  %v2410_v19 = vld [vmem:[#allocation2 + $0x1e0] sm:$0xff] }
 0x2a8   : > { %v2386_v34 = vld [vmem:[#allocation2 + $0x1f8] sm:$0xff]  ;;  %v2784_v22 = vadd.f32 %v2783_v26, %v2383_v29  ;;  %v2821_v45 = vadd.f32 %v2820_v27, %v2384_v32  ;;  %v2638_v63 = vadd.f32 %v2637_v50, %v2395_v56  ;;  %v2411_v25 = vld [vmem:[#allocation2 + $0x7b0] sm:$0xff]  ;;  %v2412_v41 = vld [vmem:[#allocation2 + $0x6c0] sm:$0xff] }
 0x2a9   : > { %v2388_v38 = vld [vmem:[#allocation2 + $0x278] sm:$0xff]  ;;  %v2600_v40 = vadd.f32 %v2599_v30, %v2386_v34  ;;  %v2748_v48 = vadd.f32 %v2747_v35, %v2390_v46  ;;  %v2415_v30 = vld [vmem:[#allocation2 + $0x140] sm:$0xff]  ;;  %v2416_v42 = vld [vmem:[#allocation2 + $0x5b0] sm:$0xff] }
 0x2aa   : > { %v2389_v44 = vld [vmem:[#allocation2 + $0x478] sm:$0xff]  ;;  %v2674_v47 = vadd.f32 %v2673_v31, %v2388_v38  ;;  %v2785_v57 = vadd.f32 %v2784_v22, %v2391_v10  ;;  %v2822_v58 = vadd.f32 %v2821_v45, %v2392_v49  ;;  %v2639_v55 = vadd.f32 %v2638_v63, %v2403_v7  ;;  %v2417_v34 = vld [vmem:[#allocation2 + $0x30] sm:$0xff]  ;;  %v2419_v35 = vld [vmem:[#allocation2 + $0x1a0] sm:$0xff] }
 0x2ab   : > { %v2711_v51 = vadd.f32 %v2710_v43, %v2389_v44  ;;  %v2393_v52 = vld [vmem:[#allocation2 + $0x418] sm:$0xff]  ;;  %v2601_v62 = vadd.f32 %v2600_v40, %v2394_v53  ;;  %v2749_v4 = vadd.f32 %v2748_v48, %v2398_v54  ;;  %v2418_v43 = vld [vmem:[#allocation2 + $0x128] sm:$0xff]  ;;  %v2420_v44 = vld [vmem:[#allocation2 + $0x5f0] sm:$0xff] }
 0x2ac   : > { %v2396_v60 = vld [vmem:[#allocation2 + $0x318] sm:$0xff]  ;;  %v2564_v21 = vadd.f32 %v2563_v39, %v2393_v52  ;;  %v2786_v11 = vadd.f32 %v2785_v57, %v2399_v0  ;;  %v2823_v12 = vadd.f32 %v2822_v58, %v2400_v23  ;;  %v2640_v31 = vadd.f32 %v2639_v55, %v2411_v25  ;;  %v2421_v39 = vld [vmem:[#allocation2 + $0x670] sm:$0xff]  ;;  %v2422_v40 = vld [vmem:[#allocation2 + $0x240] sm:$0xff] }
 0x2ad   : > { %v2401_v1 = vld [vmem:[#allocation2 + $0x58] sm:$0xff]  ;;  %v2675_v2 = vadd.f32 %v2674_v47, %v2396_v60  ;;  %v2712_v3 = vadd.f32 %v2711_v51, %v2397_v61  ;;  %v2750_v20 = vadd.f32 %v2749_v4, %v2406_v13  ;;  %v2424_v50 = vld [vmem:[#allocation2 + $0x268] sm:$0xff]  ;;  %v2428_v57 = vld [vmem:[#allocation2 + $0x350] sm:$0xff] }
 0x2ae   : > { %v2402_v5 = vld [vmem:[#allocation2 + $0x198] sm:$0xff]  ;;  %v2565_v9 = vadd.f32 %v2564_v21, %v2401_v1  ;;  %v2787_v24 = vadd.f32 %v2786_v11, %v2407_v14  ;;  %v2641_v10 = vadd.f32 %v2640_v31, %v2419_v35  ;;  %v2425_v47 = vld [vmem:[#allocation2 + $0x4a8] sm:$0xff]  ;;  %v2432_v1 = vld [vmem:[#allocation2 + $0x6a0] sm:$0xff] }
 0x2af   : > { %v2602_v15 = vadd.f32 %v2601_v62, %v2402_v5  ;;  %v2676_v16 = vadd.f32 %v2675_v2, %v2404_v8  ;;  %v2408_v17 = vld [vmem:[#allocation2 + $0x158] sm:$0xff]  ;;  %v2713_v6 = vadd.f32 %v2712_v3, %v2405_v36  ;;  %v2426_v56 = vld [vmem:[#allocation2 + $0x5c8] sm:$0xff]  ;;  %v2435_v8 = vld [vmem:[#allocation2 + $0x6d0] sm:$0xff] }
 0x2b0   : > { %v2413_v26 = vld [vmem:[#allocation2 + $0xd8] sm:$0xff]  ;;  %v2566_v27 = vadd.f32 %v2565_v9, %v2409_v18  ;;  %v2824_v28 = vadd.f32 %v2823_v12, %v2408_v17  ;;  %v2788_v37 = vadd.f32 %v2787_v24, %v2415_v30  ;;  %v2429_v54 = vld [vmem:[#allocation2 + $0x2c8] sm:$0xff]  ;;  %v2437_v11 = vld [vmem:[#allocation2 + $0x730] sm:$0xff] }
 0x2b1   : > { %v2603_v59 = vadd.f32 %v2602_v15, %v2410_v19  ;;  %v2414_v29 = vld [vmem:[#allocation2 + $0x6b8] sm:$0xff]  ;;  %v2677_v32 = vadd.f32 %v2676_v16, %v2412_v41  ;;  %v2714_v33 = vadd.f32 %v2713_v6, %v2413_v26  ;;  %v2431_v62 = vld [vmem:[#allocation2 + $0x488] sm:$0xff]  ;;  %v2441_v19 = vld [vmem:[#allocation2 + $0x460] sm:$0xff] }
 0x2b2   : > { %v2751_v22 = vadd.f32 %v2750_v20, %v2414_v29  ;;  %v2825_v38 = vadd.f32 %v2824_v28, %v2416_v42  ;;  %v2567_v45 = vadd.f32 %v2566_v27, %v2417_v34  ;;  %v2423_v49 = vld [vmem:[#allocation2 + $0x118] sm:$0xff]  ;;  %v2433_v2 = vld [vmem:[#allocation2 + $0x3c8] sm:$0xff]  ;;  %v2442_v6 = vld [vmem:[#allocation2 + $0x4f0] sm:$0xff] }
 0x2b3   : > { %v2604_v46 = vadd.f32 %v2603_v59, %v2418_v43  ;;  %v2678_v51 = vadd.f32 %v2677_v32, %v2420_v44  ;;  %v2715_v52 = vadd.f32 %v2714_v33, %v2421_v39  ;;  %v2427_v48 = vld [vmem:[#allocation2 + $0x438] sm:$0xff]  ;;  %v2789_v60 = vadd.f32 %v2788_v37, %v2423_v49  ;;  %v2434_v3 = vld [vmem:[#allocation2 + $0x1e8] sm:$0xff]  ;;  %v2445_v27 = vld [vmem:[#allocation2 + $0x4d0] sm:$0xff] }
 0x2b4   : > { %v2752_v53 = vadd.f32 %v2751_v22, %v2422_v40  ;;  %v2568_v58 = vadd.f32 %v2567_v45, %v2425_v47  ;;  %v2826_v61 = vadd.f32 %v2825_v38, %v2424_v50  ;;  %v2430_v21 = vld [vmem:[#allocation2 + $0xf8] sm:$0xff]  ;;  %v2642_v0 = vadd.f32 %v2641_v10, %v2427_v48  ;;  %v2436_v9 = vld [vmem:[#allocation2 + $0x688] sm:$0xff]  ;;  %v2448_v31 = vld [vmem:[#allocation2 + $0x2a0] sm:$0xff] }
 0x2b5   : > { %v2605_v63 = vadd.f32 %v2604_v46, %v2426_v56  ;;  %v2679_v23 = vadd.f32 %v2678_v51, %v2428_v57  ;;  %v2716_v4 = vadd.f32 %v2715_v52, %v2429_v54  ;;  %v2790_v7 = vadd.f32 %v2789_v60, %v2431_v62  ;;  %v2438_v14 = vld [vmem:[#allocation2 + $0x658] sm:$0xff]  ;;  %v2443_v20 = vld [vmem:[#allocation2 + $0x528] sm:$0xff]  ;;  %v2449_v32 = vld [vmem:[#allocation2 + $0x10] sm:$0xff] }
 0x2b6   : > { %v2753_v5 = vadd.f32 %v2752_v53, %v2430_v21  ;;  %v2569_v12 = vadd.f32 %v2568_v58, %v2433_v2  ;;  %v2827_v13 = vadd.f32 %v2826_v61, %v2432_v1  ;;  %v2439_v15 = vld [vmem:[#allocation2 + $0x458] sm:$0xff]  ;;  %v2643_v16 = vadd.f32 %v2642_v0, %v2435_v8  ;;  %v2451_v22 = vld [vmem:[#allocation2 + $0x7a8] sm:$0xff]  ;;  %v2452_v37 = vld [vmem:[#allocation2 + $0x530] sm:$0xff] }
 0x2b7   : > { %v2606_v36 = vadd.f32 %v2605_v63, %v2434_v3  ;;  %v2440_v55 = vld [vmem:[#allocation2 + $0x1b8] sm:$0xff]  ;;  %v2680_v17 = vadd.f32 %v2679_v23, %v2436_v9  ;;  %v2717_v18 = vadd.f32 %v2716_v4, %v2437_v11  ;;  %v2791_v25 = vadd.f32 %v2790_v7, %v2439_v15  ;;  %v2453_v40 = vld [vmem:[#allocation2 + $0x590] sm:$0xff]  ;;  %v2454_v45 = vld [vmem:[#allocation2 + $0x660] sm:$0xff] }
 0x2b8   : > { %v2754_v24 = vadd.f32 %v2753_v5, %v2438_v14  ;;  %v2828_v41 = vadd.f32 %v2827_v13, %v2440_v55  ;;  %v2444_v26 = vld [vmem:[#allocation2 + $0x258] sm:$0xff]  ;;  %v2570_v28 = vadd.f32 %v2569_v12, %v2441_v19  ;;  %v2644_v30 = vadd.f32 %v2643_v16, %v2443_v20  ;;  %v2456_v47 = vld [vmem:[#allocation2 + $0x700] sm:$0xff]  ;;  %v2459_v57 = vld [vmem:[#allocation2 + $0x3d0] sm:$0xff] }
 0x2b9   : > { %v2446_v59 = vld [vmem:[#allocation2 + $0x4f8] sm:$0xff]  ;;  %v2607_v29 = vadd.f32 %v2606_v36, %v2442_v6  ;;  %v2681_v33 = vadd.f32 %v2680_v17, %v2444_v26  ;;  %v2718_v34 = vadd.f32 %v2717_v18, %v2445_v27  ;;  %v2457_v51 = vld [vmem:[#allocation2 + $0x340] sm:$0xff]  ;;  %v2460_v58 = vld [vmem:[#allocation2 + $0x230] sm:$0xff] }
 0x2ba   : > { %v2447_v42 = vld [vmem:[#allocation2 + $0x78] sm:$0xff]  ;;  %v2755_v43 = vadd.f32 %v2754_v24, %v2446_v59  ;;  %v2571_v38 = vadd.f32 %v2570_v28, %v2449_v32  ;;  %v2829_v39 = vadd.f32 %v2828_v41, %v2448_v31  ;;  %v2645_v49 = vadd.f32 %v2644_v30, %v2451_v22  ;;  %v2458_v52 = vld [vmem:[#allocation2 + $0x5a0] sm:$0xff]  ;;  %v2465_v3 = vld [vmem:[#allocation2 + $0x468] sm:$0xff] }
 0x2bb   : > { %v2450_v35 = vld [vmem:[#allocation2 + $0x778] sm:$0xff]  ;;  %v2792_v44 = vadd.f32 %v2791_v25, %v2447_v42  ;;  %v2682_v50 = vadd.f32 %v2681_v33, %v2452_v37  ;;  %v2719_v53 = vadd.f32 %v2718_v34, %v2453_v40  ;;  %v2461_v60 = vld [vmem:[#allocation2 + $0x560] sm:$0xff]  ;;  %v2466_v4 = vld [vmem:[#allocation2 + $0x2a8] sm:$0xff] }
 0x2bc   : > { %v2455_v46 = vld [vmem:[#allocation2 + $0x358] sm:$0xff]  ;;  %v2608_v10 = vadd.f32 %v2607_v29, %v2450_v35  ;;  %v2756_v56 = vadd.f32 %v2755_v43, %v2454_v45  ;;  %v2572_v61 = vadd.f32 %v2571_v38, %v2457_v51  ;;  %v2830_v21 = vadd.f32 %v2829_v39, %v2456_v47  ;;  %v2463_v63 = vld [vmem:[#allocation2 + $0x4e0] sm:$0xff]  ;;  %v2467_v5 = vld [vmem:[#allocation2 + $0x1d0] sm:$0xff] }
 0x2bd   : > { %v2793_v48 = vadd.f32 %v2792_v44, %v2455_v46  ;;  %v2462_v62 = vld [vmem:[#allocation2 + $0x7f8] sm:$0xff]  ;;  %v2464_v0 = vld [vmem:[#allocation2 + $0x200] sm:$0xff]  ;;  %v2646_v23 = vadd.f32 %v2645_v49, %v2459_v57  ;;  %v2683_v1 = vadd.f32 %v2682_v50, %v2460_v58  ;;  %v2720_v2 = vadd.f32 %v2719_v53, %v2461_v60  ;;  %v2468_v11 = vld [vmem:[#allocation2 + $0x510] sm:$0xff] }
 0x2be   : > { %v2609_v54 = vadd.f32 %v2608_v10, %v2458_v52  ;;  %v2757_v7 = vadd.f32 %v2756_v56, %v2462_v62  ;;  %v2831_v9 = vadd.f32 %v2830_v21, %v2464_v0  ;;  %v2469_v12 = vld [vmem:[#allocation2 + $0x750] sm:$0xff]  ;;  %v2573_v13 = vadd.f32 %v2572_v61, %v2465_v3  ;;  %v2471_v55 = vld [vmem:[#allocation2 + $0x28] sm:$0xff]  ;;  %v2472_v16 = vld [vmem:[#allocation2 + $0x760] sm:$0xff] }
 0x2bf   : > { %v2794_v8 = vadd.f32 %v2793_v48, %v2463_v63  ;;  %v2470_v36 = vld [vmem:[#allocation2 + $0x130] sm:$0xff]  ;;  %v2647_v15 = vadd.f32 %v2646_v23, %v2467_v5  ;;  %v2684_v18 = vadd.f32 %v2683_v1, %v2468_v11  ;;  %v2721_v19 = vadd.f32 %v2720_v2, %v2469_v12  ;;  %v2474_v20 = vld [vmem:[#allocation2 + $0x228] sm:$0xff]  ;;  %v2477_v59 = vld [vmem:[#allocation2 + $0x7a0] sm:$0xff] }
 0x2c0   : > { %v2610_v14 = vadd.f32 %v2609_v54, %v2466_v4  ;;  %v2473_v17 = vld [vmem:[#allocation2 + $0x5d0] sm:$0xff]  ;;  %v2758_v6 = vadd.f32 %v2757_v7, %v2470_v36  ;;  %v2475_v24 = vld [vmem:[#allocation2 + $0x208] sm:$0xff]  ;;  %v2832_v27 = vadd.f32 %v2831_v9, %v2472_v16  ;;  %v2478_v28 = vld [vmem:[#allocation2 + $0x80] sm:$0xff] }
 0x2c1   : > { %v2476_v25 = vld [vmem:[#allocation2 + $0x290] sm:$0xff]  ;;  %v2574_v41 = vadd.f32 %v2573_v13, %v2473_v17  ;;  %v2795_v26 = vadd.f32 %v2794_v8, %v2471_v55  ;;  %v2479_v29 = vld [vmem:[#allocation2 + $0x4c8] sm:$0xff]  ;;  %v2648_v42 = vadd.f32 %v2647_v15, %v2475_v24  ;;  %v2481_v33 = vld [vmem:[#allocation2 + $0x798] sm:$0xff]  ;;  %v2722_v43 = vadd.f32 %v2721_v19, %v2477_v59 }
 0x2c2   : > { %v2611_v30 = vadd.f32 %v2610_v14, %v2474_v20  ;;  %v2685_v31 = vadd.f32 %v2684_v18, %v2476_v25  ;;  %v2480_v32 = vld [vmem:[#allocation2 + $0x3f0] sm:$0xff]  ;;  %v2482_v34 = vld [vmem:[#allocation2 + $0x378] sm:$0xff]  ;;  %v2759_v35 = vadd.f32 %v2758_v6, %v2478_v28  ;;  %v2483_v37 = vld [vmem:[#allocation2 + $0x160] sm:$0xff] }
 0x2c3   : > { %v2796_v22 = vadd.f32 %v2795_v26, %v2479_v29  ;;  %v2484_v38 = vld [vmem:[#allocation2 + $0x260] sm:$0xff]  ;;  %v2485_v44 = vld [vmem:[#allocation2 + $0x728] sm:$0xff]  ;;  %v2575_v39 = vadd.f32 %v2574_v41, %v2481_v33  ;;  %v2833_v45 = vadd.f32 %v2832_v27, %v2480_v32  ;;  %v2649_v50 = vadd.f32 %v2648_v42, %v2483_v37  ;;  %v2489_v52 = vld [vmem:[#allocation2 + $0x678] sm:$0xff] }
 0x2c4   : > { %v2612_v40 = vadd.f32 %v2611_v30, %v2482_v34  ;;  %v2486_v46 = vld [vmem:[#allocation2 + $0x288] sm:$0xff]  ;;  %v2686_v47 = vadd.f32 %v2685_v31, %v2484_v38  ;;  %v2723_v51 = vadd.f32 %v2722_v43, %v2485_v44  ;;  %v2490_v53 = vld [vmem:[#allocation2 + $0x98] sm:$0xff]  ;;  %v2491_v56 = vld [vmem:[#allocation2 + $0x470] sm:$0xff] }
 0x2c5   : > { %v2487_v10 = vld [vmem:[#allocation2 + $0x188] sm:$0xff]  ;;  %v2760_v48 = vadd.f32 %v2759_v35, %v2486_v46  ;;  %v2492_v60 = vld [vmem:[#allocation2 + $0x410] sm:$0xff]  ;;  %v2576_v21 = vadd.f32 %v2575_v39, %v2489_v52  ;;  %v2650_v63 = vadd.f32 %v2649_v50, %v2491_v56  ;;  %v2495_v0 = vld [vmem:[#allocation2 + $0x220] sm:$0xff] }
 0x2c6   : > { %v2488_v49 = vld [vmem:[#allocation2 + $0x408] sm:$0xff]  ;;  %v2797_v57 = vadd.f32 %v2796_v22, %v2487_v10  ;;  %v2613_v62 = vadd.f32 %v2612_v40, %v2490_v53  ;;  %v2496_v23 = vld [vmem:[#allocation2 + $0x780] sm:$0xff]  ;;  %v2687_v2 = vadd.f32 %v2686_v47, %v2492_v60  ;;  %v2500_v8 = vld [vmem:[#allocation2 + $0x170] sm:$0xff] }
 0x2c7   : > { %v2834_v58 = vadd.f32 %v2833_v45, %v2488_v49  ;;  %v2493_v61 = vld [vmem:[#allocation2 + $0x248] sm:$0xff]  ;;  %v2501_v36 = vld [vmem:[#allocation2 + $0x7e0] sm:$0xff]  ;;  %v2506_v19 = vld [vmem:[#allocation2 + $0x6b0] sm:$0xff] }
 0x2c8   : > { %v2494_v54 = vld [vmem:[#allocation2 + $0x548] sm:$0xff]  ;;  %v2724_v3 = vadd.f32 %v2723_v51, %v2493_v61  ;;  %v2798_v11 = vadd.f32 %v2797_v57, %v2495_v0  ;;  %v2502_v13 = vld [vmem:[#allocation2 + $0x20] sm:$0xff]  ;;  %v2688_v16 = vadd.f32 %v2687_v2, %v2500_v8  ;;  %v2510_v29 = vld [vmem:[#allocation2 + $0x490] sm:$0xff] }
 0x2c9   : > { %v2497_v1 = vld [vmem:[#allocation2 + $0x708] sm:$0xff]  ;;  %v2761_v4 = vadd.f32 %v2760_v48, %v2494_v54  ;;  %v2835_v12 = vadd.f32 %v2834_v58, %v2496_v23  ;;  %v2507_v25 = vld [vmem:[#allocation2 + $0x300] sm:$0xff]  ;;  %v2511_v30 = vld [vmem:[#allocation2 + $0x570] sm:$0xff] }
 0x2ca   : > { %v2498_v5 = vld [vmem:[#allocation2 + $0x8] sm:$0xff]  ;;  %v2577_v9 = vadd.f32 %v2576_v21, %v2497_v1  ;;  %v2725_v6 = vadd.f32 %v2724_v3, %v2501_v36  ;;  %v2509_v26 = vld [vmem:[#allocation2 + $0x180] sm:$0xff]  ;;  %v2514_v43 = vld [vmem:[#allocation2 + $0x2f0] sm:$0xff] }
 0x2cb   : > { %v2499_v7 = vld [vmem:[#allocation2 + $0x428] sm:$0xff]  ;;  %v2614_v15 = vadd.f32 %v2613_v62, %v2498_v5  ;;  %v2762_v20 = vadd.f32 %v2761_v4, %v2502_v13  ;;  %v2512_v42 = vld [vmem:[#allocation2 + $0x500] sm:$0xff]  ;;  %v2518_v40 = vld [vmem:[#allocation2 + $0x210] sm:$0xff] }
 0x2cc   : > { %v2503_v14 = vld [vmem:[#allocation2 + $0x308] sm:$0xff]  ;;  %v2651_v55 = vadd.f32 %v2650_v63, %v2499_v7  ;;  %v2726_v33 = vadd.f32 %v2725_v6, %v2509_v26  ;;  %v2516_v44 = vld [vmem:[#allocation2 + $0x360] sm:$0xff]  ;;  %v2523_v48 = vld [vmem:[#allocation2 + $0x270] sm:$0xff] }
 0x2cd   : > { %v2504_v17 = vld [vmem:[#allocation2 + $0x88] sm:$0xff]  ;;  %v2799_v24 = vadd.f32 %v2798_v11, %v2503_v14  ;;  %v2615_v59 = vadd.f32 %v2614_v15, %v2506_v19  ;;  %v2763_v22 = vadd.f32 %v2762_v20, %v2510_v29  ;;  %v2517_v39 = vld [vmem:[#allocation2 + $0x60] sm:$0xff]  ;;  %v2524_v57 = vld [vmem:[#allocation2 + $0x2d8] sm:$0xff] }
 0x2ce   : > { %v2505_v18 = vld [vmem:[#allocation2 + $0x6e8] sm:$0xff]  ;;  %v2836_v28 = vadd.f32 %v2835_v12, %v2504_v17  ;;  %v2652_v31 = vadd.f32 %v2651_v55, %v2507_v25  ;;  %v2519_v49 = vld [vmem:[#allocation2 + $0x4a0] sm:$0xff]  ;;  %v2727_v52 = vadd.f32 %v2726_v33, %v2517_v39  ;;  %v2530_v3 = vld [vmem:[#allocation2 + $0x430] sm:$0xff] }
 0x2cf   : > { %v2508_v41 = vld [vmem:[#allocation2 + $0x108] sm:$0xff]  ;;  %v2578_v27 = vadd.f32 %v2577_v9, %v2505_v18  ;;  %v2800_v37 = vadd.f32 %v2799_v24, %v2511_v30  ;;  %v2616_v46 = vadd.f32 %v2615_v59, %v2514_v43  ;;  %v2764_v53 = vadd.f32 %v2763_v22, %v2518_v40  ;;  %v2526_v21 = vld [vmem:[#allocation2 + $0xa0] sm:$0xff]  ;;  %v2531_v8 = vld [vmem:[#allocation2 + $0x578] sm:$0xff] }
 0x2d0   : > { %v2689_v32 = vadd.f32 %v2688_v16, %v2508_v41  ;;  %v2513_v34 = vld [vmem:[#allocation2 + $0xe8] sm:$0xff]  ;;  %v2837_v38 = vadd.f32 %v2836_v28, %v2512_v42  ;;  %v2533_v11 = vld [vmem:[#allocation2 + $0x638] sm:$0xff]  ;;  %v2536_v55 = vld [vmem:[#allocation2 + $0x1f0] sm:$0xff] }
 0x2d1   : > { %v2515_v35 = vld [vmem:[#allocation2 + $0x7e8] sm:$0xff]  ;;  %v2579_v45 = vadd.f32 %v2578_v27, %v2513_v34  ;;  %v2801_v60 = vadd.f32 %v2800_v37, %v2519_v49  ;;  %v2765_v5 = vadd.f32 %v2764_v53, %v2526_v21  ;;  %v2534_v14 = vld [vmem:[#allocation2 + $0x4b8] sm:$0xff]  ;;  %v2537_v19 = vld [vmem:[#allocation2] sm:$0xff] }
 0x2d2   : > { %v2653_v10 = vadd.f32 %v2652_v31, %v2515_v35  ;;  %v2520_v50 = vld [vmem:[#allocation2 + $0x748] sm:$0xff]  ;;  %v2690_v51 = vadd.f32 %v2689_v32, %v2516_v44  ;;  %v2535_v15 = vld [vmem:[#allocation2 + $0x298] sm:$0xff]  ;;  %v2538_v6 = vld [vmem:[#allocation2 + $0x2d0] sm:$0xff] }
 0x2d3   : > { %v2521_v47 = vld [vmem:[#allocation2 + $0x168] sm:$0xff]  ;;  %v2838_v61 = vadd.f32 %v2837_v38, %v2520_v50  ;;  %v2539_v20 = vld [vmem:[#allocation2 + $0x650] sm:$0xff]  ;;  %v2766_v24 = vadd.f32 %v2765_v5, %v2534_v14  ;;  %v2540_v26 = vld [vmem:[#allocation2 + $0x480] sm:$0xff] }
 0x2d4   : > { %v2522_v56 = vld [vmem:[#allocation2 + $0x668] sm:$0xff]  ;;  %v2580_v58 = vadd.f32 %v2579_v45, %v2521_v47  ;;  %v2654_v0 = vadd.f32 %v2653_v10, %v2523_v48  ;;  %v2691_v23 = vadd.f32 %v2690_v51, %v2524_v57  ;;  %v2541_v27 = vld [vmem:[#allocation2 + $0x3d8] sm:$0xff]  ;;  %v2543_v42 = vld [vmem:[#allocation2 + $0x7d0] sm:$0xff] }
 0x2d5   : > { %v2525_v54 = vld [vmem:[#allocation2 + $0xc8] sm:$0xff]  ;;  %v2617_v63 = vadd.f32 %v2616_v46, %v2522_v56  ;;  %v2542_v59 = vld [vmem:[#allocation2 + $0x718] sm:$0xff]  ;;  %v2544_v31 = vld [vmem:[#allocation2 + $0x190] sm:$0xff] }
 0x2d6   : > { %v2527_v62 = vld [vmem:[#allocation2 + $0x48] sm:$0xff]  ;;  %v2728_v4 = vadd.f32 %v2727_v52, %v2525_v54  ;;  %v2655_v16 = vadd.f32 %v2654_v0, %v2531_v8  ;;  %v2545_v32 = vld [vmem:[#allocation2 + $0x710] sm:$0xff]  ;;  %v2767_v43 = vadd.f32 %v2766_v24, %v2542_v59  ;;  %v2547_v22 = vld [vmem:[#allocation2 + $0x2b8] sm:$0xff] }
 0x2d7   : > { %v2528_v1 = vld [vmem:[#allocation2 + $0x328] sm:$0xff]  ;;  %v2802_v7 = vadd.f32 %v2801_v60, %v2527_v62  ;;  %v2618_v36 = vadd.f32 %v2617_v63, %v2530_v3  ;;  %v2548_v37 = vld [vmem:[#allocation2 + $0x238] sm:$0xff]  ;;  %v2549_v40 = vld [vmem:[#allocation2 + $0x1b0] sm:$0xff] }
 0x2d8   : > { %v2529_v2 = vld [vmem:[#allocation2 + $0x7c8] sm:$0xff]  ;;  %v2839_v13 = vadd.f32 %v2838_v61, %v2528_v1  ;;  %v2729_v18 = vadd.f32 %v2728_v4, %v2533_v11  ;;  %v2656_v30 = vadd.f32 %v2655_v16, %v2539_v20  ;;  %v2550_v45 = vld [vmem:[#allocation2 + $0x5e0] sm:$0xff]  ;;  %v2552_v47 = vld [vmem:[#allocation2 + $0x150] sm:$0xff] }
 0x2d9   : > { %v2532_v9 = vld [vmem:[#allocation2 + $0x608] sm:$0xff]  ;;  %v2581_v12 = vadd.f32 %v2580_v58, %v2529_v2  ;;  %v2803_v25 = vadd.f32 %v2802_v7, %v2535_v15  ;;  %v2619_v29 = vadd.f32 %v2618_v36, %v2538_v6  ;;  %v2551_v46 = vld [vmem:[#allocation2 + $0x580] sm:$0xff]  ;;  %v2768_v53 = vadd.f32 %v2767_v43, %v2550_v45 }
 0x2da   : > { %v2692_v17 = vadd.f32 %v2691_v23, %v2532_v9  ;;  %v2840_v41 = vadd.f32 %v2839_v13, %v2536_v55  ;;  %v2730_v34 = vadd.f32 %v2729_v18, %v2541_v27  ;;  %v2546_v35 = vld [vmem:[#allocation2 + $0xa8] sm:$0xff]  ;;  %v2657_v49 = vadd.f32 %v2656_v30, %v2547_v22 }
 0x2db   : > { %v2582_v28 = vadd.f32 %v2581_v12, %v2537_v19  ;;  %v2804_v44 = vadd.f32 %v2803_v25, %v2543_v42  ;;  %v2620_v10 = vadd.f32 %v2619_v29, %v2546_v35  ;;  %v2769_v21 = vrot.slane %v2768_v53, 4 }
 0x2dc   : > { %v2693_v33 = vadd.f32 %v2692_v17, %v2540_v26  ;;  %v2841_v39 = vadd.f32 %v2840_v41, %v2544_v31  ;;  %v2731_v52 = vadd.f32 %v2730_v34, %v2549_v40  ;;  %v2658_v57 = vrot.slane %v2657_v49, 4 }
 0x2dd   : > { %v2583_v38 = vadd.f32 %v2582_v28, %v2545_v32  ;;  %v2805_v56 = vadd.f32 %v2804_v44, %v2551_v46  ;;  %v2621_v48 = vrot.slane %v2620_v10, 4  ;;  %v2770_v4 = vadd.f32 %v2769_v21, %v2768_v53 }
 0x2de   : > { %v2694_v50 = vadd.f32 %v2693_v33, %v2548_v37  ;;  %v2842_v60 = vadd.f32 %v2841_v39, %v2552_v47  ;;  %v2732_v54 = vrot.slane %v2731_v52, 4  ;;  %v2659_v0 = vadd.f32 %v2658_v57, %v2657_v49 }
 0x2df   : > { %v2584_v51 = vrot.slane %v2583_v38, 4  ;;  %v2806_v62 = vrot.slane %v2805_v56, 4  ;;  %v2622_v63 = vadd.f32 %v2621_v48, %v2620_v10  ;;  %v2771_v13 = vrot.slane %v2770_v4, 2 }
 0x2e0   : > { %v2695_v58 = vrot.slane %v2694_v50, 4  ;;  %v2843_v1 = vrot.slane %v2842_v60, 4  ;;  %v2733_v3 = vadd.f32 %v2732_v54, %v2731_v52  ;;  %v2660_v8 = vrot.slane %v2659_v0, 2 }
 0x2e1   : > { %v2585_v61 = vadd.f32 %v2584_v51, %v2583_v38  ;;  %v2807_v5 = vadd.f32 %v2806_v62, %v2805_v56  ;;  %v2623_v7 = vrot.slane %v2622_v63, 2  ;;  %v2772_v6 = vadd.f32 %v2771_v13, %v2770_v4 }
 0x2e2   : > { %v2696_v23 = vadd.f32 %v2695_v58, %v2694_v50  ;;  %v2844_v11 = vadd.f32 %v2843_v1, %v2842_v60  ;;  %v2734_v36 = vrot.slane %v2733_v3, 2  ;;  %v2661_v55 = vadd.f32 %v2660_v8, %v2659_v0 }
 0x2e3   : > { %v2586_v2 = vrot.slane %v2585_v61, 2  ;;  %v2808_v14 = vrot.slane %v2807_v5, 2  ;;  %v2624_v15 = vadd.f32 %v2623_v7, %v2622_v63  ;;  %v2773_v28 = vrot.slane %v2772_v6, 1 }
 0x2e4   : > { %v2697_v9 = vrot.slane %v2696_v23, 2  ;;  %v2845_v17 = vrot.slane %v2844_v11, 2  ;;  %v2735_v19 = vadd.f32 %v2734_v36, %v2733_v3  ;;  %v2662_v25 = vrot.slane %v2661_v55, 1 }
 0x2e5   : > { %v2587_v12 = vadd.f32 %v2586_v2, %v2585_v61  ;;  %v2809_v20 = vadd.f32 %v2808_v14, %v2807_v5  ;;  %v2625_v24 = vrot.slane %v2624_v15, 1  ;;  %v2774_v34 = vadd.f32 %v2773_v28, %v2772_v6 }
 0x2e6   : > { %v2698_v16 = vadd.f32 %v2697_v9, %v2696_v23  ;;  %v2846_v26 = vadd.f32 %v2845_v17, %v2844_v11  ;;  %v2736_v59 = vrot.slane %v2735_v19, 1  ;;  %v2663_v42 = vadd.f32 %v2662_v25, %v2661_v55 }
 0x2e7   : > { %v2588_v18 = vrot.slane %v2587_v12, 1  ;;  %v2810_v29 = vrot.slane %v2809_v20, 1  ;;  %v2626_v30 = vadd.f32 %v2625_v24, %v2624_v15  ;;  %v2861_v39 = vrot.slane %v2774_v34, 3 }
 0x2e8   : > { %v2699_v41 = vrot.slane %v2698_v16, 1  ;;  %v2847_v32 = vrot.slane %v2846_v26, 1  ;;  %v2737_v33 = vadd.f32 %v2736_v59, %v2735_v19  ;;  %v2858_v37 = vrot.slane %v2663_v42, 6 }
 0x2e9   : > { %v2589_v27 = vadd.f32 %v2588_v18, %v2587_v12  ;;  %v2811_v43 = vadd.f32 %v2810_v29, %v2809_v20  ;;  %v2857_v22 = vrot.slane %v2626_v30, 7 }
 0x2ea   : > { %v2700_v31 = vadd.f32 %v2699_v41, %v2698_v16  ;;  %v2848_v35 = vadd.f32 %v2847_v32, %v2846_v26  ;;  %v2860_v44 = vrot.slane %v2737_v33, 4 }
 0x2eb   : > { %v2862_v40 = vrot.slane %v2811_v43, 2  ;;  %v2865_v46 = vsel %vm2864_vm0, %v2589_v27, %v2857_v22 }
 0x2ec   : > { %v2859_v38 = vrot.slane %v2700_v31, 5  ;;  %v2863_v45 = vrot.slane %v2848_v35, 1  ;;  %v2871_v50 = vsel %vm2870_vm3, %v2860_v44, %v2861_v39 }
 0x2ee   : > { %v2867_v10 = vsel %vm2866_vm1, %v2858_v37, %v2859_v38  ;;  %v2873_v47 = vsel %vm2872_vm4, %v2862_v40, %v2863_v45 }
 0x2ef   : > { %v2869_v49 = vsel %vm2868_vm2, %v2865_v46, %v2867_v10  ;;  %v2875_v51 = vsel %vm2874_vm5, %v2871_v50, %v2873_v47 }
 0x2f0   : > { %v2877_v52 = vsel %vm2876_vm6, %v2869_v49, %v2875_v51 }
 0x2f1   : > { %2879 = vst [vmem:[%s268_s7] sm:$0xff] %v2877_v52 }
 0x2f2 PF: > { %s3033_s23 = sshll.u32 %s3334_s19, 3  ;;  %s4444_s9 = sld [smem:[#allocation19_spill]] }
 0x2f3   : > { %s2893_s12 = sshll.u32 %s268_s7, 4  ;;  %s2881_s22 = scalar_lea.sflag [#allocation5], %s266_s2  ;;  %s2894_s12 = int_to_ptr.vmem [resolvable:$true] %s2893_s12 }
 0x2f8   : > { %s2891_s20 = scalar_lea.hbm %s4444_s9, %s3033_s23  ;;  %s3240_s24 = scalar_lea.hbm %s4444_s9, 16 }
 0x2f9   : > { %s2895_s30 = sshll.u32 %s2891_s20, 4  ;;  %s2896_s30 = int_to_ptr.hbm [resolvable:$true] %s2895_s30 }
 0x2fa   : > { %s3234_s3 = sshra.s32 %s2896_s30, 4  ;;  %s3235_s3 = int_to_ptr.hbm [resolvable:$true] %s3234_s3 }
 0x2fb   : > { %s3236_s10 = scalar_lea.hbm %s3235_s3, 8  ;;  %p3241_p6 = scmp.lt.s32.totalorder %s3235_s3, %s4444_s9 }
 0x2fc   : > { %p3237_p0 = scmp.ne.s32.totalorder %s3235_s3, %s3236_s10  ;;  %p3242_p7 = scmp.lt.s32.totalorder %s3240_s24, %s3236_s10 }
 0x2fe   : > { %p3238_p1 = pnand %p3237_p0, %p3452_p11  ;;  %p3243_p8 = por %p3242_p7, %p3241_p6 }
 0x300   : > { %p3239_p2 = pneg %p3238_p1 }
 0x302   : > { %p3244_p4 = pnand %p3243_p8, %p3239_p2 }
 0x304   : > { %3247 = shalt.err (!%p3244_p4)
}
 0x305   : > { %3046 = dma.vmem_to_hbm [thread:$0]  (%p3452_p11), %s2894_s12, 128, %s2896_s30, %s2881_s22  }
 0x306 PF: > { %s4445_s2 = sld [smem:[#allocation14_spill]] }
 0x307   : > { %s4446_s4 = sld [smem:[#allocation12_spill]] }
 0x30c   : > { %p3063_p9 = scmp.ge.s32.totalorder %s4445_s2, 2 }
 0x30d   : > { %s2907_s26 = sand.u32 1, %s4446_s4  }
 0x30e   : > { %p3057_p10 = pnand %p3063_p9, %p3457_p13  ;;  %s2908_s7 = scalar_lea.sflag [#allocation5], %s2907_s26 }
 0x310   : > { %p3058_p5 = pneg %p3057_p10 }
 0x312   : > { %3301 = dma.done.wait (%p3058_p5), %s2908_s7, 128  }
 0x313   : > { %3303 = vsyncadd (%p3058_p5), %s2908_s7, 4294967168  ;;  %s20_s22 = sadd.s32 1, %s4445_s2   ;;  %s4448_s18 = sld [smem:[#allocation13_spill]] }
 0x314   : > { %p17_p12 = scmp.ge.s32.totalorder %s20_s22, 6   ;;  %s4449_s23 = smov %s4460_s15 }
 0x315   : > { %s4450_s12 = smov %s3310_s13  ;;  %s4451_s13 = smov %s3314_s14 }
 0x316   : > { %s4452_s14 = smov %s3500_s27  ;;  %s4453_s15 = smov %s3322_s16 }
 0x317   : > { %s4454_s16 = smov %s3326_s17  ;;  %s4455_s17 = smov %s3503_s29 }
 0x318   : > { %s4456_s19 = smov %s3342_s21  ;;  %s4457_s20 = smov %s4449_s23 }
 0x319   : > { %s4458_s21 = smov %s4464_s11  ;;  %19 = sbr.rel (!%p17_p12) target bundleno = 14 (0xe), region = 93 }
 0x31e   :  { %2914 = vsyncpa [#allocation4], 1 }
 0x31f   :  { %2916 = vsyncpa [#allocation4 + $0x1], 1 }
 0x320   :  { %2917 = vsyncpa [#allocation7], 1 }
 0x321   :  { %2918 = vsyncpa [#allocation5], 1 }
 0x322   :  { %2920 = vsyncpa [#allocation5 + $0x1], 1 }

</bundles_post_ra>
